<compile_context>
chip_gen: v7x
topology: tpu7x:2x2x1
jax: 0.10.0
libtpu: 0.0.40
codegen_flags: <defaults>
</compile_context>

<pallas_src>
import jax
import jax.numpy as jnp
from jax.experimental import pallas as pl
from jax.experimental.pallas import tpu as pltpu

IMAGE_SIZE = 28
IN_DIM = IMAGE_SIZE * IMAGE_SIZE      # 784
IN_PAD = 896                           # 7 * 128, lane-dense padded image width
H1 = 512
H2 = 256
BOTTLENECK = 2
ZPAD = 128                             # lane-aligned padded bottleneck width


def _round_up(n, m):
    return ((n + m - 1) // m) * m


# ----------------------------------------------------------------------------- kernel
def _vae_kernel(x_ref, eps_ref,
                w1_ref, b1_ref, w2_ref, b2_ref,
                wmusg_ref, bmusg_ref,
                wd1_ref, bd1_ref, wd2_ref, bd2_ref, wd3_ref, bd3_ref,
                recon_ref, mu_ref, lv_ref):
    x = x_ref[...]                                                    # (BM, 896) f32

    # ---- encoder: Linear(784->512)+ReLU, Linear(512->256)+ReLU (bf16 MXU, f32 acc) ----
    h1 = jnp.dot(x.astype(jnp.bfloat16), w1_ref[...],
                 preferred_element_type=jnp.float32) + b1_ref[...]
    h1 = jnp.maximum(h1, 0.0)
    h2 = jnp.dot(h1.astype(jnp.bfloat16), w2_ref[...],
                 preferred_element_type=jnp.float32) + b2_ref[...]
    h2 = jnp.maximum(h2, 0.0)                                         # (BM, 256) f32

    # ---- fused mu / log_var heads: one (256,256) matmul, split at lane 128 ----
    heads = jnp.dot(h2.astype(jnp.bfloat16), wmusg_ref[...],
                    preferred_element_type=jnp.float32) + bmusg_ref[...]
    mu = heads[:, :ZPAD]                                              # cols >= 2 are 0
    lv = heads[:, ZPAD:]                                              # cols >= 2 are 0

    # ---- reparameterization: z = mu + eps * exp(0.5 * log_var) (f32 VPU/EUP) ----
    z = mu + eps_ref[...] * jnp.exp(0.5 * lv)                         # (BM, 128)

    # ---- decoder L1: bottleneck == 2 -> rank-2 VPU update (no padded MXU matmul) ----
    rows = z.shape[0]
    z0 = jnp.broadcast_to(z[:, 0:1], (rows, H2))
    z1 = jnp.broadcast_to(z[:, 1:2], (rows, H2))
    d1 = z0 * wd1_ref[0:1, :] + z1 * wd1_ref[1:2, :] + bd1_ref[...]
    d1 = jnp.maximum(d1, 0.0)                                         # (BM, 256)

    # ---- decoder L2/L3: Linear(256->512)+ReLU, Linear(512->896-padded) ----
    d2 = jnp.dot(d1.astype(jnp.bfloat16), wd2_ref[...],
                 preferred_element_type=jnp.float32) + bd2_ref[...]
    d2 = jnp.maximum(d2, 0.0)
    recon_ref[...] = jnp.dot(d2.astype(jnp.bfloat16), wd3_ref[...],
                             preferred_element_type=jnp.float32) + bd3_ref[...]

    mu_ref[...] = mu
    lv_ref[...] = lv


# ----------------------------------------------------------------------------- wrapper
def vae_forward(x, eps, prep, *, bm=None):
    """x: (B, 1, 28, 28) f32, eps: (B, BOTTLENECK) f32 ~ N(0,1), prep: prepare_params()."""
    B = x.shape[0]
    x_flat = x.reshape(B, IN_DIM).astype(jnp.float32)     # == torch x.view(-1, 784)

    if bm is None:
        bm = min(_round_up(B, 8), 256)                    # batch tile (rows per grid step)
    Bp = _round_up(B, bm)
    grid = (Bp // bm,)

    # Only the per-call tensors are padded here; all weight padding is done in prepare_params.
    x_pad = jnp.zeros((Bp, IN_PAD), jnp.float32).at[:B, :IN_DIM].set(x_flat)
    eps_pad = jnp.zeros((Bp, ZPAD), jnp.float32).at[:B, :BOTTLENECK].set(eps)

    def row_spec(width):                                   # batch-tiled arrays
        return pl.BlockSpec((bm, width), lambda i: (i, 0))

    def full_spec(shape):                                  # VMEM-resident weights / biases
        return pl.BlockSpec(shape, lambda i: (0, 0))

    in_specs = [
        row_spec(IN_PAD),                 # x
        row_spec(ZPAD),                   # eps
        full_spec((IN_PAD, H1)),          # w1 (bf16)
        full_spec((1, H1)),               # b1
        full_spec((H1, H2)),              # w2 (bf16)
        full_spec((1, H2)),               # b2
        full_spec((H2, 2 * ZPAD)),        # fused mu|log_var weight (bf16)
        full_spec((1, 2 * ZPAD)),         # fused mu|log_var bias
        full_spec((BOTTLENECK, H2)),      # wd1 (f32, rank-2 VPU path)
        full_spec((1, H2)),               # bd1
        full_spec((H2, H1)),              # wd2 (bf16)
        full_spec((1, H1)),               # bd2
        full_spec((H1, IN_PAD)),          # wd3 (bf16, output-padded)
        full_spec((1, IN_PAD)),           # bd3 (output-padded)
    ]
    out_specs = (row_spec(IN_PAD), row_spec(ZPAD), row_spec(ZPAD))
    out_shape = (
        jax.ShapeDtypeStruct((Bp, IN_PAD), jnp.float32),
        jax.ShapeDtypeStruct((Bp, ZPAD), jnp.float32),
        jax.ShapeDtypeStruct((Bp, ZPAD), jnp.float32),
    )

    args = (x_pad, eps_pad,
            prep["w1"], prep["b1"], prep["w2"], prep["b2"],
            prep["wmusg"], prep["bmusg"],
            prep["wd1"], prep["bd1"], prep["wd2"], prep["bd2"],
            prep["wd3"], prep["bd3"])

    in_bytes = sum(int(a.size) * a.dtype.itemsize for a in args)
    out_bytes = Bp * (IN_PAD + 2 * ZPAD) * 4
    cost = pl.CostEstimate(
        flops=2 * Bp * (IN_PAD * H1 + H1 * H2 + H2 * (2 * ZPAD) + H2 * H1 + H1 * IN_PAD),
        transcendentals=Bp * ZPAD,
        bytes_accessed=in_bytes + out_bytes,
    )

    recon_p, mu_p, lv_p = pl.pallas_call(
        _vae_kernel,
        out_shape=out_shape,
        grid_spec=pltpu.PrefetchScalarGridSpec(
            num_scalar_prefetch=0,
            grid=grid,
            in_specs=in_specs,
            out_specs=out_specs,
        ),
        compiler_params=pltpu.CompilerParams(
            dimension_semantics=("parallel",),
            vmem_limit_bytes=32 << 20,
        ),
        cost_estimate=cost,
    )(*args)

    recon = recon_p[:B, :IN_DIM].reshape(x.shape)          # == .view(x.shape)
    mu = mu_p[:B, :BOTTLENECK]
    log_var = lv_p[:B, :BOTTLENECK]
    return recon, mu, log_var


# ------------------------------------------------------------------------ params
def init_params(key):
    """Deterministic synthetic parameters (shapes match the PyTorch module, (in,out) layout)."""
    ks = jax.random.split(key, 14)

    def lin(kw, kb, fan_in, fan_out):
        bound = 1.0 / jnp.sqrt(fan_in)
        w = jax.random.uniform(kw, (fan_in, fan_out), jnp.float32, -bound, bound)
        b = jax.random.uniform(kb, (1, fan_out), jnp.float32, -bound, bound)
        return w, b

    p = {}
    p["w1"], p["b1"] = lin(ks[0], ks[1], IN_DIM, H1)            # encoder L1
    p["w2"], p["b2"] = lin(ks[2], ks[3], H1, H2)                # encoder L2
    p["wmu"], p["bmu"] = lin(ks[4], ks[5], H2, BOTTLENECK)      # mu head
    p["wsg"], p["bsg"] = lin(ks[6], ks[7], H2, BOTTLENECK)      # log_var head
    p["wd1"], p["bd1"] = lin(ks[8], ks[9], BOTTLENECK, H2)      # decoder L1
    p["wd2"], p["bd2"] = lin(ks[10], ks[11], H2, H1)            # decoder L2
    p["wd3"], p["bd3"] = lin(ks[12], ks[13], H1, IN_DIM)        # decoder L3
    return p


def prepare_params(p):
    """One-time padding / fusion / bf16 cast of the kernel-side parameters."""
    bf16, f32 = jnp.bfloat16, jnp.float32

    # encoder L1: pad K 784 -> 896 with zero input rows (exact).
    w1 = jnp.zeros((IN_PAD, H1), f32).at[:IN_DIM, :].set(p["w1"]).astype(bf16)
    # fused mu|log_var head: cols [0:2] = wmu, cols [128:130] = wsg, rest zero (exact).
    wmusg = jnp.zeros((H2, 2 * ZPAD), f32)
    wmusg = wmusg.at[:, :BOTTLENECK].set(p["wmu"])
    wmusg = wmusg.at[:, ZPAD:ZPAD + BOTTLENECK].set(p["wsg"]).astype(bf16)
    bmusg = jnp.zeros((1, 2 * ZPAD), f32)
    bmusg = bmusg.at[:, :BOTTLENECK].set(p["bmu"])
    bmusg = bmusg.at[:, ZPAD:ZPAD + BOTTLENECK].set(p["bsg"])
    # decoder L3: pad N 784 -> 896 with zero output columns (sliced off in wrapper).
    wd3 = jnp.zeros((H1, IN_PAD), f32).at[:, :IN_DIM].set(p["wd3"]).astype(bf16)
    bd3 = jnp.zeros((1, IN_PAD), f32).at[:, :IN_DIM].set(p["bd3"])

    return {
        "w1": w1, "b1": p["b1"].astype(f32),
        "w2": p["w2"].astype(bf16), "b2": p["b2"].astype(f32),
        "wmusg": wmusg, "bmusg": bmusg,
        "wd1": p["wd1"].astype(f32), "bd1": p["bd1"].astype(f32),   # f32: VPU rank-2 path
        "wd2": p["wd2"].astype(bf16), "bd2": p["bd2"].astype(f32),
        "wd3": wd3, "bd3": bd3,
    }


# ------------------------------------------------------------------------ reference
def _reference(x, eps, p):
    """Pure-JAX reference with the same bf16-operand / f32-accumulate matmuls."""
    def bdot(a, w):
        return jnp.dot(a.astype(jnp.bfloat16), w.astype(jnp.bfloat16),
                       preferred_element_type=jnp.float32)

    B = x.shape[0]
    xf = x.reshape(B, IN_DIM)
    h = jnp.maximum(bdot(xf, p["w1"]) + p["b1"], 0.0)
    h = jnp.maximum(bdot(h, p["w2"]) + p["b2"], 0.0)
    mu = bdot(h, p["wmu"]) + p["bmu"]
    lv = bdot(h, p["wsg"]) + p["bsg"]
    z = mu + eps * jnp.exp(0.5 * lv)
    d = jnp.maximum(z[:, 0:1] * p["wd1"][0:1, :] + z[:, 1:2] * p["wd1"][1:2, :] + p["bd1"], 0.0)
    d = jnp.maximum(bdot(d, p["wd2"]) + p["bd2"], 0.0)
    recon = (bdot(d, p["wd3"]) + p["bd3"]).reshape(x.shape)
    return recon, mu, lv


if __name__ == "__main__":
    key = jax.random.PRNGKey(0)
    k_param, k_x, k_eps = jax.random.split(key, 3)

    B = 8
    x = jax.random.uniform(k_x, (B, 1, IMAGE_SIZE, IMAGE_SIZE), jnp.float32)
    # Reparameterization noise is an explicit input (stands in for torch.randn_like).
    eps = jax.random.normal(k_eps, (B, BOTTLENECK), jnp.float32)

    params = init_params(k_param)
    prep = prepare_params(params)                       # one-time padding/fusion/bf16

    recon, mu, log_var = jax.block_until_ready(vae_forward(x, eps, prep))

    r_ref, mu_ref, lv_ref = _reference(x, eps, params)
    assert recon.shape == x.shape
    assert mu.shape == (B, BOTTLENECK) and log_var.shape == (B, BOTTLENECK)
    # Kernel and reference use identical bf16 operands + f32 accumulation; only the
    # summation order differs, so tolerances stay tight.
    assert jnp.allclose(mu, mu_ref, atol=2e-3, rtol=2e-3)
    assert jnp.allclose(log_var, lv_ref, atol=2e-3, rtol=2e-3)
    assert jnp.allclose(recon, r_ref, atol=2e-3, rtol=2e-3)

    print("KERNEL_OK")
</pallas_src>

<mosaic_0001>
module attributes {stable_mosaic.version = 11 : i64} {
  func.func @_vae_kernel(%arg0: i32, %arg1: memref<8x896xf32, #tpu.memory_space<vmem>>, %arg2: memref<8x128xf32, #tpu.memory_space<vmem>>, %arg3: memref<896x512xbf16, #tpu.memory_space<vmem>>, %arg4: memref<1x512xf32, #tpu.memory_space<vmem>>, %arg5: memref<512x256xbf16, #tpu.memory_space<vmem>>, %arg6: memref<1x256xf32, #tpu.memory_space<vmem>>, %arg7: memref<256x256xbf16, #tpu.memory_space<vmem>>, %arg8: memref<1x256xf32, #tpu.memory_space<vmem>>, %arg9: memref<2x256xf32, #tpu.memory_space<vmem>>, %arg10: memref<1x256xf32, #tpu.memory_space<vmem>>, %arg11: memref<256x512xbf16, #tpu.memory_space<vmem>>, %arg12: memref<1x512xf32, #tpu.memory_space<vmem>>, %arg13: memref<512x896xbf16, #tpu.memory_space<vmem>>, %arg14: memref<1x896xf32, #tpu.memory_space<vmem>>, %arg15: memref<8x896xf32, #tpu.memory_space<vmem>>, %arg16: memref<8x128xf32, #tpu.memory_space<vmem>>, %arg17: memref<8x128xf32, #tpu.memory_space<vmem>>) attributes {dimension_semantics = [#tpu.dimension_semantics<parallel>], iteration_bounds = array<i64: 1>, scalar_prefetch = 0 : i64, scratch_operands = 0 : i64, tpu.core_type = #tpu.core_type<tc>, window_params = [{transform_indices = @transform_0, window_bounds = array<i64: 8, 896>}, {transform_indices = @transform_1, window_bounds = array<i64: 8, 128>}, {pipeline_mode = #tpu.pipeline_mode<synchronous>, transform_indices = @transform_2, window_bounds = array<i64: 896, 512>}, {pipeline_mode = #tpu.pipeline_mode<synchronous>, transform_indices = @transform_3, window_bounds = array<i64: 1, 512>}, {pipeline_mode = #tpu.pipeline_mode<synchronous>, transform_indices = @transform_4, window_bounds = array<i64: 512, 256>}, {pipeline_mode = #tpu.pipeline_mode<synchronous>, transform_indices = @transform_5, window_bounds = array<i64: 1, 256>}, {pipeline_mode = #tpu.pipeline_mode<synchronous>, transform_indices = @transform_6, window_bounds = array<i64: 256, 256>}, {pipeline_mode = #tpu.pipeline_mode<synchronous>, transform_indices = @transform_7, window_bounds = array<i64: 1, 256>}, {pipeline_mode = #tpu.pipeline_mode<synchronous>, transform_indices = @transform_8, window_bounds = array<i64: 2, 256>}, {pipeline_mode = #tpu.pipeline_mode<synchronous>, transform_indices = @transform_9, window_bounds = array<i64: 1, 256>}, {pipeline_mode = #tpu.pipeline_mode<synchronous>, transform_indices = @transform_10, window_bounds = array<i64: 256, 512>}, {pipeline_mode = #tpu.pipeline_mode<synchronous>, transform_indices = @transform_11, window_bounds = array<i64: 1, 512>}, {pipeline_mode = #tpu.pipeline_mode<synchronous>, transform_indices = @transform_12, window_bounds = array<i64: 512, 896>}, {pipeline_mode = #tpu.pipeline_mode<synchronous>, transform_indices = @transform_13, window_bounds = array<i64: 1, 896>}, {transform_indices = @transform_14, window_bounds = array<i64: 8, 896>}, {transform_indices = @transform_15, window_bounds = array<i64: 8, 128>}, {transform_indices = @transform_16, window_bounds = array<i64: 8, 128>}]} {
    %c0 = arith.constant 0 : index
    %c0_0 = arith.constant 0 : index
    %0 = vector.load %arg1[%c0, %c0_0] : memref<8x896xf32, #tpu.memory_space<vmem>>, vector<8x896xf32>
    %1 = arith.truncf %0 : vector<8x896xf32> to vector<8x896xbf16>
    %c0_1 = arith.constant 0 : index
    %c0_2 = arith.constant 0 : index
    %2 = vector.load %arg3[%c0_1, %c0_2] : memref<896x512xbf16, #tpu.memory_space<vmem>>, vector<896x512xbf16>
    %cst = arith.constant dense<0.000000e+00> : vector<8x512xf32>
    %3 = tpu.matmul %1, %2, %cst {dimension_numbers = #tpu.dot_dimension_numbers<[1], [0], [0], [1], [0, 0, 1, 1], [], []>} : vector<8x896xbf16>, vector<896x512xbf16>, vector<8x512xf32> -> vector<8x512xf32>
    %c0_3 = arith.constant 0 : index
    %c0_4 = arith.constant 0 : index
    %4 = vector.load %arg4[%c0_3, %c0_4] : memref<1x512xf32, #tpu.memory_space<vmem>>, vector<1x512xf32>
    %5 = vector.broadcast %4 : vector<1x512xf32> to vector<8x512xf32>
    %6 = arith.addf %3, %5 : vector<8x512xf32>
    %cst_5 = arith.constant 0.000000e+00 : f32
    %7 = vector.broadcast %cst_5 : f32 to vector<8x512xf32>
    %8 = arith.maximumf %6, %7 : vector<8x512xf32>
    %9 = arith.truncf %8 : vector<8x512xf32> to vector<8x512xbf16>
    %c0_6 = arith.constant 0 : index
    %c0_7 = arith.constant 0 : index
    %10 = vector.load %arg5[%c0_6, %c0_7] : memref<512x256xbf16, #tpu.memory_space<vmem>>, vector<512x256xbf16>
    %cst_8 = arith.constant dense<0.000000e+00> : vector<8x256xf32>
    %11 = tpu.matmul %9, %10, %cst_8 {dimension_numbers = #tpu.dot_dimension_numbers<[1], [0], [0], [1], [0, 0, 1, 1], [], []>} : vector<8x512xbf16>, vector<512x256xbf16>, vector<8x256xf32> -> vector<8x256xf32>
    %c0_9 = arith.constant 0 : index
    %c0_10 = arith.constant 0 : index
    %12 = vector.load %arg6[%c0_9, %c0_10] : memref<1x256xf32, #tpu.memory_space<vmem>>, vector<1x256xf32>
    %13 = vector.broadcast %12 : vector<1x256xf32> to vector<8x256xf32>
    %14 = arith.addf %11, %13 : vector<8x256xf32>
    %cst_11 = arith.constant 0.000000e+00 : f32
    %15 = vector.broadcast %cst_11 : f32 to vector<8x256xf32>
    %16 = arith.maximumf %14, %15 : vector<8x256xf32>
    %17 = arith.truncf %16 : vector<8x256xf32> to vector<8x256xbf16>
    %c0_12 = arith.constant 0 : index
    %c0_13 = arith.constant 0 : index
    %18 = vector.load %arg7[%c0_12, %c0_13] : memref<256x256xbf16, #tpu.memory_space<vmem>>, vector<256x256xbf16>
    %cst_14 = arith.constant dense<0.000000e+00> : vector<8x256xf32>
    %19 = tpu.matmul %17, %18, %cst_14 {dimension_numbers = #tpu.dot_dimension_numbers<[1], [0], [0], [1], [0, 0, 1, 1], [], []>} : vector<8x256xbf16>, vector<256x256xbf16>, vector<8x256xf32> -> vector<8x256xf32>
    %c0_15 = arith.constant 0 : index
    %c0_16 = arith.constant 0 : index
    %20 = vector.load %arg8[%c0_15, %c0_16] : memref<1x256xf32, #tpu.memory_space<vmem>>, vector<1x256xf32>
    %21 = vector.broadcast %20 : vector<1x256xf32> to vector<8x256xf32>
    %22 = arith.addf %19, %21 : vector<8x256xf32>
    %23 = vector.extract_strided_slice %22 {offsets = [0, 0], sizes = [8, 128], strides = [1, 1]} : vector<8x256xf32> to vector<8x128xf32>
    %24 = vector.extract_strided_slice %22 {offsets = [0, 128], sizes = [8, 128], strides = [1, 1]} : vector<8x256xf32> to vector<8x128xf32>
    %c0_17 = arith.constant 0 : index
    %c0_18 = arith.constant 0 : index
    %25 = vector.load %arg2[%c0_17, %c0_18] : memref<8x128xf32, #tpu.memory_space<vmem>>, vector<8x128xf32>
    %cst_19 = arith.constant 5.000000e-01 : f32
    %26 = vector.broadcast %cst_19 : f32 to vector<8x128xf32>
    %27 = arith.mulf %26, %24 : vector<8x128xf32>
    %28 = math.exp %27 : vector<8x128xf32>
    %29 = arith.mulf %25, %28 : vector<8x128xf32>
    %30 = arith.addf %23, %29 : vector<8x128xf32>
    %31 = vector.extract_strided_slice %30 {offsets = [0, 0], sizes = [8, 1], strides = [1, 1]} : vector<8x128xf32> to vector<8x1xf32>
    %32 = vector.shape_cast %31 : vector<8x1xf32> to vector<8x1xf32>
    %33 = vector.broadcast %32 : vector<8x1xf32> to vector<8x256xf32>
    %34 = vector.extract_strided_slice %30 {offsets = [0, 1], sizes = [8, 1], strides = [1, 1]} : vector<8x128xf32> to vector<8x1xf32>
    %35 = vector.shape_cast %34 : vector<8x1xf32> to vector<8x1xf32>
    %36 = vector.broadcast %35 : vector<8x1xf32> to vector<8x256xf32>
    %c0_20 = arith.constant 0 : index
    %c0_21 = arith.constant 0 : index
    %37 = vector.load %arg9[%c0_20, %c0_21] : memref<2x256xf32, #tpu.memory_space<vmem>>, vector<1x256xf32>
    %38 = vector.broadcast %37 : vector<1x256xf32> to vector<8x256xf32>
    %39 = arith.mulf %33, %38 : vector<8x256xf32>
    %c1 = arith.constant 1 : index
    %c0_22 = arith.constant 0 : index
    %40 = vector.load %arg9[%c1, %c0_22] : memref<2x256xf32, #tpu.memory_space<vmem>>, vector<1x256xf32>
    %41 = vector.broadcast %40 : vector<1x256xf32> to vector<8x256xf32>
    %42 = arith.mulf %36, %41 : vector<8x256xf32>
    %43 = arith.addf %39, %42 : vector<8x256xf32>
    %c0_23 = arith.constant 0 : index
    %c0_24 = arith.constant 0 : index
    %44 = vector.load %arg10[%c0_23, %c0_24] : memref<1x256xf32, #tpu.memory_space<vmem>>, vector<1x256xf32>
    %45 = vector.broadcast %44 : vector<1x256xf32> to vector<8x256xf32>
    %46 = arith.addf %43, %45 : vector<8x256xf32>
    %cst_25 = arith.constant 0.000000e+00 : f32
    %47 = vector.broadcast %cst_25 : f32 to vector<8x256xf32>
    %48 = arith.maximumf %46, %47 : vector<8x256xf32>
    %49 = arith.truncf %48 : vector<8x256xf32> to vector<8x256xbf16>
    %c0_26 = arith.constant 0 : index
    %c0_27 = arith.constant 0 : index
    %50 = vector.load %arg11[%c0_26, %c0_27] : memref<256x512xbf16, #tpu.memory_space<vmem>>, vector<256x512xbf16>
    %cst_28 = arith.constant dense<0.000000e+00> : vector<8x512xf32>
    %51 = tpu.matmul %49, %50, %cst_28 {dimension_numbers = #tpu.dot_dimension_numbers<[1], [0], [0], [1], [0, 0, 1, 1], [], []>} : vector<8x256xbf16>, vector<256x512xbf16>, vector<8x512xf32> -> vector<8x512xf32>
    %c0_29 = arith.constant 0 : index
    %c0_30 = arith.constant 0 : index
    %52 = vector.load %arg12[%c0_29, %c0_30] : memref<1x512xf32, #tpu.memory_space<vmem>>, vector<1x512xf32>
    %53 = vector.broadcast %52 : vector<1x512xf32> to vector<8x512xf32>
    %54 = arith.addf %51, %53 : vector<8x512xf32>
    %cst_31 = arith.constant 0.000000e+00 : f32
    %55 = vector.broadcast %cst_31 : f32 to vector<8x512xf32>
    %56 = arith.maximumf %54, %55 : vector<8x512xf32>
    %57 = arith.truncf %56 : vector<8x512xf32> to vector<8x512xbf16>
    %c0_32 = arith.constant 0 : index
    %c0_33 = arith.constant 0 : index
    %58 = vector.load %arg13[%c0_32, %c0_33] : memref<512x896xbf16, #tpu.memory_space<vmem>>, vector<512x896xbf16>
    %cst_34 = arith.constant dense<0.000000e+00> : vector<8x896xf32>
    %59 = tpu.matmul %57, %58, %cst_34 {dimension_numbers = #tpu.dot_dimension_numbers<[1], [0], [0], [1], [0, 0, 1, 1], [], []>} : vector<8x512xbf16>, vector<512x896xbf16>, vector<8x896xf32> -> vector<8x896xf32>
    %c0_35 = arith.constant 0 : index
    %c0_36 = arith.constant 0 : index
    %60 = vector.load %arg14[%c0_35, %c0_36] : memref<1x896xf32, #tpu.memory_space<vmem>>, vector<1x896xf32>
    %61 = vector.broadcast %60 : vector<1x896xf32> to vector<8x896xf32>
    %62 = arith.addf %59, %61 : vector<8x896xf32>
    %c0_37 = arith.constant 0 : index
    %c0_38 = arith.constant 0 : index
    %63 = vector.load %arg15[%c0_37, %c0_38] : memref<8x896xf32, #tpu.memory_space<vmem>>, vector<8x896xf32>
    tpu.vector_store %arg15[%c0_37, %c0_38], %62 {strides = array<i32>} : memref<8x896xf32, #tpu.memory_space<vmem>>, vector<8x896xf32>,
    %c0_39 = arith.constant 0 : index
    %c0_40 = arith.constant 0 : index
    %64 = vector.load %arg16[%c0_39, %c0_40] : memref<8x128xf32, #tpu.memory_space<vmem>>, vector<8x128xf32>
    tpu.vector_store %arg16[%c0_39, %c0_40], %23 {strides = array<i32>} : memref<8x128xf32, #tpu.memory_space<vmem>>, vector<8x128xf32>,
    %c0_41 = arith.constant 0 : index
    %c0_42 = arith.constant 0 : index
    %65 = vector.load %arg17[%c0_41, %c0_42] : memref<8x128xf32, #tpu.memory_space<vmem>>, vector<8x128xf32>
    tpu.vector_store %arg17[%c0_41, %c0_42], %24 {strides = array<i32>} : memref<8x128xf32, #tpu.memory_space<vmem>>, vector<8x128xf32>,
    return
  }
  func.func @transform_0(%arg0: i32) -> (i32, i32) {
    %c0_i32 = arith.constant 0 : i32
    %c0_i32_0 = arith.constant 0 : i32
    return %arg0, %c0_i32 : i32, i32
  }
  func.func @transform_1(%arg0: i32) -> (i32, i32) {
    %c0_i32 = arith.constant 0 : i32
    %c0_i32_0 = arith.constant 0 : i32
    return %arg0, %c0_i32 : i32, i32
  }
  func.func @transform_2(%arg0: i32) -> (i32, i32) {
    %c0_i32 = arith.constant 0 : i32
    %c0_i32_0 = arith.constant 0 : i32
    %c0_i32_1 = arith.constant 0 : i32
    return %c0_i32, %c0_i32_0 : i32, i32
  }
  func.func @transform_3(%arg0: i32) -> (i32, i32) {
    %c0_i32 = arith.constant 0 : i32
    %c0_i32_0 = arith.constant 0 : i32
    %c0_i32_1 = arith.constant 0 : i32
    return %c0_i32, %c0_i32_0 : i32, i32
  }
  func.func @transform_4(%arg0: i32) -> (i32, i32) {
    %c0_i32 = arith.constant 0 : i32
    %c0_i32_0 = arith.constant 0 : i32
    %c0_i32_1 = arith.constant 0 : i32
    return %c0_i32, %c0_i32_0 : i32, i32
  }
  func.func @transform_5(%arg0: i32) -> (i32, i32) {
    %c0_i32 = arith.constant 0 : i32
    %c0_i32_0 = arith.constant 0 : i32
    %c0_i32_1 = arith.constant 0 : i32
    return %c0_i32, %c0_i32_0 : i32, i32
  }
  func.func @transform_6(%arg0: i32) -> (i32, i32) {
    %c0_i32 = arith.constant 0 : i32
    %c0_i32_0 = arith.constant 0 : i32
    %c0_i32_1 = arith.constant 0 : i32
    return %c0_i32, %c0_i32_0 : i32, i32
  }
  func.func @transform_7(%arg0: i32) -> (i32, i32) {
    %c0_i32 = arith.constant 0 : i32
    %c0_i32_0 = arith.constant 0 : i32
    %c0_i32_1 = arith.constant 0 : i32
    return %c0_i32, %c0_i32_0 : i32, i32
  }
  func.func @transform_8(%arg0: i32) -> (i32, i32) {
    %c0_i32 = arith.constant 0 : i32
    %c0_i32_0 = arith.constant 0 : i32
    %c0_i32_1 = arith.constant 0 : i32
    return %c0_i32, %c0_i32_0 : i32, i32
  }
  func.func @transform_9(%arg0: i32) -> (i32, i32) {
    %c0_i32 = arith.constant 0 : i32
    %c0_i32_0 = arith.constant 0 : i32
    %c0_i32_1 = arith.constant 0 : i32
    return %c0_i32, %c0_i32_0 : i32, i32
  }
  func.func @transform_10(%arg0: i32) -> (i32, i32) {
    %c0_i32 = arith.constant 0 : i32
    %c0_i32_0 = arith.constant 0 : i32
    %c0_i32_1 = arith.constant 0 : i32
    return %c0_i32, %c0_i32_0 : i32, i32
  }
  func.func @transform_11(%arg0: i32) -> (i32, i32) {
    %c0_i32 = arith.constant 0 : i32
    %c0_i32_0 = arith.constant 0 : i32
    %c0_i32_1 = arith.constant 0 : i32
    return %c0_i32, %c0_i32_0 : i32, i32
  }
  func.func @transform_12(%arg0: i32) -> (i32, i32) {
    %c0_i32 = arith.constant 0 : i32
    %c0_i32_0 = arith.constant 0 : i32
    %c0_i32_1 = arith.constant 0 : i32
    return %c0_i32, %c0_i32_0 : i32, i32
  }
  func.func @transform_13(%arg0: i32) -> (i32, i32) {
    %c0_i32 = arith.constant 0 : i32
    %c0_i32_0 = arith.constant 0 : i32
    %c0_i32_1 = arith.constant 0 : i32
    return %c0_i32, %c0_i32_0 : i32, i32
  }
  func.func @transform_14(%arg0: i32) -> (i32, i32) {
    %c0_i32 = arith.constant 0 : i32
    %c0_i32_0 = arith.constant 0 : i32
    return %arg0, %c0_i32 : i32, i32
  }
  func.func @transform_15(%arg0: i32) -> (i32, i32) {
    %c0_i32 = arith.constant 0 : i32
    %c0_i32_0 = arith.constant 0 : i32
    return %arg0, %c0_i32 : i32, i32
  }
  func.func @transform_16(%arg0: i32) -> (i32, i32) {
    %c0_i32 = arith.constant 0 : i32
    %c0_i32_0 = arith.constant 0 : i32
    return %arg0, %c0_i32 : i32, i32
  }
}

</mosaic_0001>

<bundles_post_ra>
// kernel: tpu_custom_call.1
= control target key start
LH: loop header
LB: loop body
LE: loop exit
PB: predicated region body
PF: predicated region fallthrough
CT: control target
= control target key end

     0   :  { %s7193_s0 = inlined_call_operand.hbm [shape: f32[8,896], index: 0, kind: input, shape index: {}]   ;;  %s7194_s1 = inlined_call_operand.hbm [shape: f32[8,128], index: 1, kind: input, shape index: {}]   ;;  %s7195_s2 = inlined_call_operand.hbm [shape: bf16[896,512], index: 2, kind: input, shape index: {}]   ;;  %s7196_s3 = inlined_call_operand.vmem [shape: f32[1,512], index: 3, kind: input, shape index: {}]   ;;  %s7197_s4 = inlined_call_operand.hbm [shape: bf16[512,256], index: 4, kind: input, shape index: {}]   ;;  %s7198_s5 = inlined_call_operand.vmem [shape: f32[1,256], index: 5, kind: input, shape index: {}]   ;;  %s7199_s6 = inlined_call_operand.hbm [shape: bf16[256,256], index: 6, kind: input, shape index: {}]   ;;  %s7200_s7 = inlined_call_operand.vmem [shape: f32[1,256], index: 7, kind: input, shape index: {}]   ;;  %s7201_s8 = inlined_call_operand.vmem [shape: f32[2,256], index: 8, kind: input, shape index: {}]   ;;  %s7202_s9 = inlined_call_operand.vmem [shape: f32[1,256], index: 9, kind: input, shape index: {}]   ;;  %s7203_s10 = inlined_call_operand.hbm [shape: bf16[256,512], index: 10, kind: input, shape index: {}]   ;;  %s7204_s11 = inlined_call_operand.vmem [shape: f32[1,512], index: 11, kind: input, shape index: {}]   ;;  %s7205_s12 = inlined_call_operand.hbm [shape: bf16[512,896], index: 12, kind: input, shape index: {}]   ;;  %s7206_s13 = inlined_call_operand.vmem [shape: f32[1,896], index: 13, kind: input, shape index: {}]   ;;  %s7207_s14 = inlined_call_operand.hbm [shape: f32[8,896], index: 14, kind: output, shape index: {0}]   ;;  %s7208_s15 = inlined_call_operand.hbm [shape: f32[8,128], index: 15, kind: output, shape index: {1}]   ;;  %s7209_s16 = inlined_call_operand.hbm [shape: f32[8,128], index: 16, kind: output, shape index: {2}]  }
   0x1   :  { %7212 = sst [smem:[#allocation24_spill]] %s7193_s0 }
   0x2   :  { %22 = vsyncpa [#allocation3], 0 }
   0x3   :  { %23 = vsyncpa [#allocation6], 0 }
   0x4   :  { %24 = vsyncpa [#allocation9], 0 }
   0x5   :  { %25 = vsyncpa [#allocation12], 0 }
   0x6   :  { %26 = vsyncpa [#allocation4], 0 }
   0x7   :  { %27 = vsyncpa [#allocation16], 0  ;;  %s6827_s21 = smov [#allocation5]   ;;  %s6828_s23 = smov [#allocation8]  }
   0x8   :  { %s44_s22 = sshll.u32 %s6827_s21, 4  ;;  %s67_s24 = sshll.u32 %s6828_s23, 4  ;;  %s45_s22 = int_to_ptr.vmem [resolvable:$true] %s44_s22  ;;  %s6930_s24 = int_to_ptr.vmem [resolvable:$true] %s67_s24 }
   0x9   :  { %s6595_s27 = scalar_lea.hbm %s7194_s1, 128 }
   0xa   :  { %p6596_p0 = scmp.ne.s32.totalorder %s7194_s1, %s6595_s27  ;;  %p6599_p1 = scmp.lt.u32.totalorder %s6595_s27, %s7194_s1 }
   0xc   :  { %p6601_p2 = pnand %p6599_p1, %p6596_p0 }
   0xe   :  { %6604 = shalt.err (!%p6601_p2)
}
   0xf   :  { %s6605_s17 = scalar_lea.vmem %s45_s22, 128  ;;  %p6610_p4 = scmp.lt.s32.totalorder %s45_s22, %s45_s22 }
  0x10   :  { %p6606_p3 = scmp.ne.s32.totalorder %s45_s22, %s6605_s17  ;;  %p6611_p5 = scmp.lt.s32.totalorder %s6605_s17, %s6605_s17 }
  0x12   :  { %p6612_p6 = por %p6611_p5, %p6610_p4 }
  0x14   :  { %p6613_p7 = pnand %p6612_p6, %p6606_p3 }
  0x16   :  { %6616 = shalt.err (!%p6613_p7)
}
  0x17   :  { %47 = dma.hbm_to_vmem [thread:$0]  %s7194_s1, 128, %s45_s22, [#allocation6]  }
  0x18   :  { %s6617_s23 = scalar_lea.hbm %s7197_s4, 8192 }
  0x19   :  { %p6618_p8 = scmp.ne.s32.totalorder %s7197_s4, %s6617_s23  ;;  %p6621_p9 = scmp.lt.u32.totalorder %s6617_s23, %s7197_s4 }
  0x1b   :  { %p6623_p10 = pnand %p6621_p9, %p6618_p8 }
  0x1d   :  { %6626 = shalt.err (!%p6623_p10)
}
  0x1e   :  { %s6627_s29 = scalar_lea.vmem %s6930_s24, 8192  ;;  %p6632_p12 = scmp.lt.s32.totalorder %s6930_s24, %s6930_s24 }
  0x1f   :  { %p6628_p11 = scmp.ne.s32.totalorder %s6930_s24, %s6627_s29  ;;  %p6633_p13 = scmp.lt.s32.totalorder %s6627_s29, %s6627_s29 }
  0x21   :  { %p6634_p0 = por %p6633_p13, %p6632_p12 }
  0x23   :  { %p6635_p1 = pnand %p6634_p0, %p6628_p11 }
  0x25   :  { %6638 = shalt.err (!%p6635_p1)
}
  0x26   :  { %s7211_s1 = smov 128   ;;  %s6830_s22 = smov 8  }
  0x27   :  { %73 = dma.hbm_to_vmem [thread:$0]  %s7197_s4, 8192, %s6930_s24, [#allocation9], %s7211_s1, %s7211_s1, %s6830_s22  }
  0x28   :  { %s6831_s17 = smov [#allocation11]   ;;  %s6832_s19 = smov [#allocation2]  }
  0x29   :  { %s99_s18 = sshll.u32 %s6831_s17, 4  ;;  %s34_s20 = sshll.u32 %s6832_s19, 4  ;;  %s100_s18 = int_to_ptr.vmem [resolvable:$true] %s99_s18  ;;  %s35_s20 = int_to_ptr.vmem [resolvable:$true] %s34_s20 }
  0x2a   :  { %s6639_s25 = scalar_lea.hbm %s7203_s10, 8192 }
  0x2b   :  { %p6640_p2 = scmp.ne.s32.totalorder %s7203_s10, %s6639_s25  ;;  %p6643_p3 = scmp.lt.u32.totalorder %s6639_s25, %s7203_s10 }
  0x2d   :  { %p6645_p4 = pnand %p6643_p3, %p6640_p2 }
  0x2f   :  { %6648 = shalt.err (!%p6645_p4)
}
  0x30   :  { %s6649_s4 = scalar_lea.vmem %s100_s18, 8192  ;;  %p6654_p6 = scmp.lt.s32.totalorder %s100_s18, %s100_s18 }
  0x31   :  { %p6650_p5 = scmp.ne.s32.totalorder %s100_s18, %s6649_s4  ;;  %p6655_p7 = scmp.lt.s32.totalorder %s6649_s4, %s6649_s4 }
  0x33   :  { %p6656_p8 = por %p6655_p7, %p6654_p6 }
  0x35   :  { %p6657_p9 = pnand %p6656_p8, %p6650_p5 }
  0x37   :  { %6660 = shalt.err (!%p6657_p9)
}
  0x38   :  { %s6833_s24 = smov 256   ;;  %s6834_s30 = smov 16  }
  0x39   :  { %105 = dma.hbm_to_vmem [thread:$0]  %s7203_s10, 8192, %s100_s18, [#allocation12], %s6833_s24, %s6833_s24, %s6834_s30  }
  0x3a   :  { %s7213_s23 = sld [smem:[#allocation24_spill]] }
  0x40   :  { %s6661_s25 = scalar_lea.hbm %s7213_s23, 896 }
  0x41   :  { %p6662_p10 = scmp.ne.s32.totalorder %s7213_s23, %s6661_s25  ;;  %p6665_p11 = scmp.lt.u32.totalorder %s6661_s25, %s7213_s23 }
  0x43   :  { %p6667_p12 = pnand %p6665_p11, %p6662_p10 }
  0x45   :  { %6670 = shalt.err (!%p6667_p12)
}
  0x46   :  { %s6671_s4 = scalar_lea.vmem %s35_s20, 896  ;;  %p6676_p0 = scmp.lt.s32.totalorder %s35_s20, %s35_s20 }
  0x47   :  { %p6672_p13 = scmp.ne.s32.totalorder %s35_s20, %s6671_s4  ;;  %p6677_p1 = scmp.lt.s32.totalorder %s6671_s4, %s6671_s4 }
  0x49   :  { %p6678_p2 = por %p6677_p1, %p6676_p0 }
  0x4b   :  { %p6679_p3 = pnand %p6678_p2, %p6672_p13 }
  0x4d   :  { %6682 = shalt.err (!%p6679_p3)
}
  0x4e   :  { %37 = dma.hbm_to_vmem [thread:$0]  %s7213_s23, 896, %s35_s20, [#allocation3]  }
  0x4f   :  { %s6835_s0 = smov [#allocation7]   ;;  %s6836_s19 = smov [#allocation10]  }
  0x50   :  { %s53_s17 = sshll.u32 %s6835_s0, 4  ;;  %s81_s21 = sshll.u32 %s6836_s19, 4  ;;  %s54_s17 = int_to_ptr.vmem [resolvable:$true] %s53_s17  ;;  %s6991_s21 = int_to_ptr.vmem [resolvable:$true] %s81_s21 }
  0x51   :  { %s6683_s27 = scalar_lea.hbm %s7195_s2, 28672 }
  0x52   :  { %p6684_p4 = scmp.ne.s32.totalorder %s7195_s2, %s6683_s27  ;;  %p6687_p5 = scmp.lt.u32.totalorder %s6683_s27, %s7195_s2 }
  0x54   :  { %p6689_p6 = pnand %p6687_p5, %p6684_p4 }
  0x56   :  { %6692 = shalt.err (!%p6689_p6)
}
  0x57   :  { %s6693_s20 = scalar_lea.vmem %s54_s17, 28672  ;;  %p6698_p8 = scmp.lt.s32.totalorder %s54_s17, %s54_s17 }
  0x58   :  { %p6694_p7 = scmp.ne.s32.totalorder %s54_s17, %s6693_s20  ;;  %p6699_p9 = scmp.lt.s32.totalorder %s6693_s20, %s6693_s20 }
  0x5a   :  { %p6700_p10 = por %p6699_p9, %p6698_p8 }
  0x5c   :  { %p6701_p11 = pnand %p6700_p10, %p6694_p7 }
  0x5e   :  { %6704 = shalt.err (!%p6701_p11)
}
  0x5f   :  { %59 = dma.hbm_to_vmem [thread:$0]  %s7195_s2, 28672, %s54_s17, [#allocation6], %s6833_s24, %s6833_s24, %s6834_s30  }
  0x60   :  { %s6705_s1 = scalar_lea.hbm %s7199_s6, 4096 }
  0x61   :  { %p6706_p12 = scmp.ne.s32.totalorder %s7199_s6, %s6705_s1  ;;  %p6709_p13 = scmp.lt.u32.totalorder %s6705_s1, %s7199_s6 }
  0x63   :  { %p6711_p0 = pnand %p6709_p13, %p6706_p12 }
  0x65   :  { %6714 = shalt.err (!%p6711_p0)
}
  0x66   :  { %s6715_s28 = scalar_lea.vmem %s6991_s21, 4096  ;;  %p6720_p2 = scmp.lt.s32.totalorder %s6991_s21, %s6991_s21 }
  0x67   :  { %p6716_p1 = scmp.ne.s32.totalorder %s6991_s21, %s6715_s28  ;;  %p6721_p3 = scmp.lt.s32.totalorder %s6715_s28, %s6715_s28 }
  0x69   :  { %p6722_p4 = por %p6721_p3, %p6720_p2 }
  0x6b   :  { %p6723_p5 = pnand %p6722_p4, %p6716_p1 }
  0x6d   :  { %6726 = shalt.err (!%p6723_p5)
}
  0x6e   :  { %s7214_s2 = smov 128   ;;  %s6837_s17 = smov [#allocation13]  }
  0x6f   :  { %87 = dma.hbm_to_vmem [thread:$0]  %s7199_s6, 4096, %s6991_s21, [#allocation9], %s7214_s2, %s7214_s2, %s6830_s22  }
  0x70   :  { %s113_s29 = sshll.u32 %s6837_s17, 4  ;;  %s6727_s23 = scalar_lea.hbm %s7205_s12, 28672  ;;  %s114_s29 = int_to_ptr.vmem [resolvable:$true] %s113_s29 }
  0x71   :  { %p6728_p6 = scmp.ne.s32.totalorder %s7205_s12, %s6727_s23  ;;  %p6731_p7 = scmp.lt.u32.totalorder %s6727_s23, %s7205_s12 }
  0x73   :  { %p6733_p8 = pnand %p6731_p7, %p6728_p6 }
  0x75   :  { %6736 = shalt.err (!%p6733_p8)
}
  0x76   :  { %s6737_s19 = scalar_lea.vmem %s114_s29, 28672  ;;  %p6742_p10 = scmp.lt.s32.totalorder %s114_s29, %s114_s29 }
  0x77   :  { %p6738_p9 = scmp.ne.s32.totalorder %s114_s29, %s6737_s19  ;;  %p6743_p11 = scmp.lt.s32.totalorder %s6737_s19, %s6737_s19 }
  0x79   :  { %p6744_p12 = por %p6743_p11, %p6742_p10 }
  0x7b   :  { %p6745_p13 = pnand %p6744_p12, %p6738_p9 }
  0x7d   :  { %6748 = shalt.err (!%p6745_p13)
}
  0x7e   :  { %s6838_s6 = smov 448   ;;  %s6839_s22 = smov 28  }
  0x7f   :  { %119 = dma.hbm_to_vmem [thread:$0]  %s7205_s12, 28672, %s114_s29, [#allocation12], %s6838_s6, %s6838_s6, %s6839_s22  }
  0x80   :  { %6815 = dma.done.wait [#allocation3], 896  }
  0x81   :  { %6816 = vsyncadd [#allocation3], 4294966400 }
  0x82   :  { %6817 = dma.done.wait [#allocation6], 28800  }
  0x83   :  { %6818 = vsyncadd [#allocation6], 4294938496 }
  0x84   :  { %6819 = dma.done.wait [#allocation9], 12288  }
  0x85   :  { %6820 = vsyncadd [#allocation9], 4294955008 }
  0x86   :  { %6821 = dma.done.wait [#allocation12], 36864  }
  0x87   :  { %6822 = vsyncadd [#allocation12], 4294930432  ;;  %v5697_v0 = vld [vmem:[#allocation7 + $0x4] ss:$16 sps:$4 sm:$0xff]   ;;  %v5699_v1 = vld [vmem:[#allocation7 + $0xc] ss:$16 sps:$4 sm:$0xff]  }
  0x88   :  { %1524 = vmatprep.subr.bf16.mxu0 %v5697_v0  ;;  %v5701_v2 = vld [vmem:[#allocation7] ss:$16 sps:$4 sm:$0xff]   ;;  %v5702_v3 = vld [vmem:[#allocation7 + $0x8] ss:$16 sps:$4 sm:$0xff]   ;;  %1688 = vmatprep.subr.bf16.mxu1 %v5699_v1  ;;  %v5703_v4 = vld [vmem:[#allocation7 + $0x24] ss:$16 sps:$4 sm:$0xff]  }
  0x89   :  { %1525 = vmatpush1.bf16.msra.mxu0 %v5701_v2  ;;  %1689 = vmatpush1.bf16.msra.mxu1 %v5702_v3  ;;  %v5705_v5 = vld [vmem:[#allocation7 + $0x2c] ss:$16 sps:$4 sm:$0xff]   ;;  %v5707_v6 = vld [vmem:[#allocation7 + $0x20] ss:$16 sps:$4 sm:$0xff]   ;;  %v5708_v7 = vld [vmem:[#allocation7 + $0x28] ss:$16 sps:$4 sm:$0xff]  }
  0x8a   :  { %1526 = vmatprep.subr.bf16.mxu0 %v5703_v4  ;;  %1690 = vmatprep.subr.bf16.mxu1 %v5705_v5  ;;  %v5709_v8 = vld [vmem:[#allocation7 + $0x44] ss:$16 sps:$4 sm:$0xff]   ;;  %v5711_v9 = vld [vmem:[#allocation7 + $0x4c] ss:$16 sps:$4 sm:$0xff]   ;;  %v5713_v10 = vld [vmem:[#allocation7 + $0x40] ss:$16 sps:$4 sm:$0xff]  }
  0x8b   :  { %v5714_v11 = vld [vmem:[#allocation7 + $0x48] ss:$16 sps:$4 sm:$0xff]   ;;  %v5715_v12 = vld [vmem:[#allocation7 + $0x64] ss:$16 sps:$4 sm:$0xff]   ;;  %v5717_v13 = vld [vmem:[#allocation7 + $0x6c] ss:$16 sps:$4 sm:$0xff]  }
  0x8c   :  { %v5719_v14 = vld [vmem:[#allocation7 + $0x60] ss:$16 sps:$4 sm:$0xff]   ;;  %v5720_v15 = vld [vmem:[#allocation7 + $0x68] ss:$16 sps:$4 sm:$0xff]   ;;  %v5721_v16 = vld [vmem:[#allocation7 + $0x84] ss:$16 sps:$4 sm:$0xff]  }
  0x8d   :  { %1527 = vmatpush1.bf16.msra.mxu0 %v5707_v6  ;;  %1691 = vmatpush1.bf16.msra.mxu1 %v5708_v7  ;;  %v5723_v17 = vld [vmem:[#allocation7 + $0x8c] ss:$16 sps:$4 sm:$0xff]   ;;  %v5725_v18 = vld [vmem:[#allocation7 + $0x80] ss:$16 sps:$4 sm:$0xff]   ;;  %v5726_v19 = vld [vmem:[#allocation7 + $0x88] ss:$16 sps:$4 sm:$0xff]  }
  0x8e   :  { %1528 = vmatprep.subr.bf16.mxu0 %v5709_v8  ;;  %1692 = vmatprep.subr.bf16.mxu1 %v5711_v9  ;;  %v5727_v20 = vld [vmem:[#allocation7 + $0xa4] ss:$16 sps:$4 sm:$0xff]   ;;  %v5729_v21 = vld [vmem:[#allocation7 + $0xac] ss:$16 sps:$4 sm:$0xff]   ;;  %v5731_v22 = vld [vmem:[#allocation7 + $0xa0] ss:$16 sps:$4 sm:$0xff]  }
  0x8f   :  { %v5732_v23 = vld [vmem:[#allocation7 + $0xa8] ss:$16 sps:$4 sm:$0xff]   ;;  %v5733_v24 = vld [vmem:[#allocation7 + $0xc4] ss:$16 sps:$4 sm:$0xff]   ;;  %v5735_v25 = vld [vmem:[#allocation7 + $0xcc] ss:$16 sps:$4 sm:$0xff]  }
  0x90   :  { %v5737_v26 = vld [vmem:[#allocation7 + $0xc0] ss:$16 sps:$4 sm:$0xff]   ;;  %v5738_v27 = vld [vmem:[#allocation7 + $0xc8] ss:$16 sps:$4 sm:$0xff]   ;;  %v5739_v28 = vld [vmem:[#allocation7 + $0xe4] ss:$16 sps:$4 sm:$0xff]  }
  0x91   :  { %1529 = vmatpush1.bf16.msra.mxu0 %v5713_v10  ;;  %1693 = vmatpush1.bf16.msra.mxu1 %v5714_v11  ;;  %v5741_v29 = vld [vmem:[#allocation7 + $0xec] ss:$16 sps:$4 sm:$0xff]   ;;  %v5743_v30 = vld [vmem:[#allocation7 + $0xe0] ss:$16 sps:$4 sm:$0xff]   ;;  %v5744_v31 = vld [vmem:[#allocation7 + $0xe8] ss:$16 sps:$4 sm:$0xff]  }
  0x92   :  { %1530 = vmatprep.subr.bf16.mxu0 %v5715_v12  ;;  %1694 = vmatprep.subr.bf16.mxu1 %v5717_v13  ;;  %v5745_v32 = vld [vmem:[#allocation7 + $0x104] ss:$16 sps:$4 sm:$0xff]   ;;  %v5747_v33 = vld [vmem:[#allocation7 + $0x10c] ss:$16 sps:$4 sm:$0xff]   ;;  %v5749_v34 = vld [vmem:[#allocation7 + $0x100] ss:$16 sps:$4 sm:$0xff]  }
  0x93   :  { %v5750_v35 = vld [vmem:[#allocation7 + $0x108] ss:$16 sps:$4 sm:$0xff]   ;;  %v5751_v36 = vld [vmem:[#allocation7 + $0x124] ss:$16 sps:$4 sm:$0xff]   ;;  %v5753_v37 = vld [vmem:[#allocation7 + $0x12c] ss:$16 sps:$4 sm:$0xff]  }
  0x94   :  { %v5755_v38 = vld [vmem:[#allocation7 + $0x120] ss:$16 sps:$4 sm:$0xff]   ;;  %v5756_v39 = vld [vmem:[#allocation7 + $0x128] ss:$16 sps:$4 sm:$0xff]   ;;  %v5757_v40 = vld [vmem:[#allocation7 + $0x144] ss:$16 sps:$4 sm:$0xff]  }
  0x95   :  { %1531 = vmatpush1.bf16.msra.mxu0 %v5719_v14  ;;  %1695 = vmatpush1.bf16.msra.mxu1 %v5720_v15  ;;  %v5759_v41 = vld [vmem:[#allocation7 + $0x14c] ss:$16 sps:$4 sm:$0xff]   ;;  %v5761_v42 = vld [vmem:[#allocation7 + $0x140] ss:$16 sps:$4 sm:$0xff]   ;;  %v5762_v43 = vld [vmem:[#allocation7 + $0x148] ss:$16 sps:$4 sm:$0xff]  }
  0x96   :  { %1532 = vmatprep.subr.bf16.mxu0 %v5721_v16  ;;  %1696 = vmatprep.subr.bf16.mxu1 %v5723_v17  ;;  %v5763_v44 = vld [vmem:[#allocation7 + $0x164] ss:$16 sps:$4 sm:$0xff]   ;;  %v5765_v45 = vld [vmem:[#allocation7 + $0x16c] ss:$16 sps:$4 sm:$0xff]   ;;  %v5767_v47 = vld [vmem:[#allocation7 + $0x160] ss:$16 sps:$4 sm:$0xff]  }
  0x97   :  { %v145_v46 = vld [vmem:[#allocation2 + $0x8] sm:$0xff]  ;;  %v5769_v50 = vld [vmem:[#allocation7 + $0x184] ss:$16 sps:$4 sm:$0xff]   ;;  %v5773_v52 = vld [vmem:[#allocation7 + $0x180] ss:$16 sps:$4 sm:$0xff]  }
  0x98   :  { %v152_v48 = vpack.c.bf16 %v145_v46, %v145_v46  ;;  %v5768_v49 = vld [vmem:[#allocation7 + $0x168] ss:$16 sps:$4 sm:$0xff]   ;;  %v5771_v51 = vld [vmem:[#allocation7 + $0x18c] ss:$16 sps:$4 sm:$0xff]   ;;  %v5775_v54 = vld [vmem:[#allocation7 + $0x1a4] ss:$16 sps:$4 sm:$0xff]  }
  0x99   :  { %1533 = vmatpush1.bf16.msra.mxu0 %v5725_v18  ;;  %1697 = vmatpush1.bf16.msra.mxu1 %v5726_v19  ;;  %v5774_v53 = vld [vmem:[#allocation7 + $0x188] ss:$16 sps:$4 sm:$0xff]   ;;  %v5777_v55 = vld [vmem:[#allocation7 + $0x1ac] ss:$16 sps:$4 sm:$0xff]   ;;  %v5779_v56 = vld [vmem:[#allocation7 + $0x1a0] ss:$16 sps:$4 sm:$0xff]  }
  0x9a   :  { %1534 = vmatprep.subr.bf16.mxu0 %v5727_v20  ;;  %1698 = vmatprep.subr.bf16.mxu1 %v5729_v21  ;;  %v5780_v57 = vld [vmem:[#allocation7 + $0x1a8] ss:$16 sps:$4 sm:$0xff]   ;;  %v5781_v58 = vld [vmem:[#allocation7 + $0x1c4] ss:$16 sps:$4 sm:$0xff]   ;;  %v5783_v59 = vld [vmem:[#allocation7 + $0x1cc] ss:$16 sps:$4 sm:$0xff]  }
  0x9b   :  { %1556 = vmatprep.mubr.bf16.mxu0 %v152_v48  ;;  %1720 = vmatprep.mubr.bf16.mxu1 %v152_v48  ;;  %v5785_v60 = vld [vmem:[#allocation7 + $0x1c0] ss:$16 sps:$4 sm:$0xff]   ;;  %v5786_v61 = vld [vmem:[#allocation7 + $0x1c8] ss:$16 sps:$4 sm:$0xff]   ;;  %v5787_v62 = vld [vmem:[#allocation7 + $0x1e4] ss:$16 sps:$4 sm:$0xff]  }
  0x9c   :  { %v5789_v63 = vld [vmem:[#allocation7 + $0x1ec] ss:$16 sps:$4 sm:$0xff]   ;;  %v5791_v0 = vld [vmem:[#allocation7 + $0x1e0] ss:$16 sps:$4 sm:$0xff]   ;;  %v5792_v1 = vld [vmem:[#allocation7 + $0x1e8] ss:$16 sps:$4 sm:$0xff]  }
  0x9d   :  { %1535 = vmatpush1.bf16.msra.mxu0 %v5731_v22  ;;  %1699 = vmatpush1.bf16.msra.mxu1 %v5732_v23  ;;  %v144_v2 = vld [vmem:[#allocation2] sm:$0xff]  ;;  %v5798_v4 = vld [vmem:[#allocation7 + $0x20c] ss:$16 sps:$4 sm:$0xff]   ;;  %v5796_v7 = vld [vmem:[#allocation7 + $0x208] ss:$16 sps:$4 sm:$0xff]  }
  0x9e   :  { %1536 = vmatprep.subr.bf16.mxu0 %v5733_v24  ;;  %1700 = vmatprep.subr.bf16.mxu1 %v5735_v25  ;;  %v5795_v3 = vld [vmem:[#allocation7 + $0x204] ss:$16 sps:$4 sm:$0xff]   ;;  %v151_v5 = vpack.c.bf16 %v144_v2, %v144_v2  ;;  %v5793_v6 = vld [vmem:[#allocation7 + $0x200] ss:$16 sps:$4 sm:$0xff]   ;;  %v5804_v9 = vld [vmem:[#allocation7 + $0x22c] ss:$16 sps:$4 sm:$0xff]  }
  0x9f   :  { %v5801_v8 = vld [vmem:[#allocation7 + $0x224] ss:$16 sps:$4 sm:$0xff]   ;;  %v5799_v10 = vld [vmem:[#allocation7 + $0x220] ss:$16 sps:$4 sm:$0xff]   ;;  %v5802_v11 = vld [vmem:[#allocation7 + $0x228] ss:$16 sps:$4 sm:$0xff]  }
  0xa0   :  { %v5807_v12 = vld [vmem:[#allocation7 + $0x244] ss:$16 sps:$4 sm:$0xff]   ;;  %v5810_v13 = vld [vmem:[#allocation7 + $0x24c] ss:$16 sps:$4 sm:$0xff]   ;;  %v5805_v14 = vld [vmem:[#allocation7 + $0x240] ss:$16 sps:$4 sm:$0xff]  }
  0xa1   :  { %1537 = vmatpush1.bf16.msra.mxu0 %v5737_v26  ;;  %1701 = vmatpush1.bf16.msra.mxu1 %v5738_v27  ;;  %v5808_v15 = vld [vmem:[#allocation7 + $0x248] ss:$16 sps:$4 sm:$0xff]   ;;  %v5813_v16 = vld [vmem:[#allocation7 + $0x264] ss:$16 sps:$4 sm:$0xff]   ;;  %v5816_v17 = vld [vmem:[#allocation7 + $0x26c] ss:$16 sps:$4 sm:$0xff]  }
  0xa2   :  { %1538 = vmatprep.subr.bf16.mxu0 %v5739_v28  ;;  %1702 = vmatprep.subr.bf16.mxu1 %v5741_v29  ;;  %v5811_v18 = vld [vmem:[#allocation7 + $0x260] ss:$16 sps:$4 sm:$0xff]   ;;  %v5814_v19 = vld [vmem:[#allocation7 + $0x268] ss:$16 sps:$4 sm:$0xff]   ;;  %v5819_v20 = vld [vmem:[#allocation7 + $0x284] ss:$16 sps:$4 sm:$0xff]  }
  0xa3   :  { %v5822_v21 = vld [vmem:[#allocation7 + $0x28c] ss:$16 sps:$4 sm:$0xff]   ;;  %v5817_v22 = vld [vmem:[#allocation7 + $0x280] ss:$16 sps:$4 sm:$0xff]   ;;  %v5820_v23 = vld [vmem:[#allocation7 + $0x288] ss:$16 sps:$4 sm:$0xff]  }
  0xa4   :  { %v5825_v24 = vld [vmem:[#allocation7 + $0x2a4] ss:$16 sps:$4 sm:$0xff]   ;;  %v5828_v25 = vld [vmem:[#allocation7 + $0x2ac] ss:$16 sps:$4 sm:$0xff]   ;;  %v5823_v26 = vld [vmem:[#allocation7 + $0x2a0] ss:$16 sps:$4 sm:$0xff]  }
  0xa5   :  { %1539 = vmatpush1.bf16.msra.mxu0 %v5743_v30  ;;  %1703 = vmatpush1.bf16.msra.mxu1 %v5744_v31  ;;  %v5826_v27 = vld [vmem:[#allocation7 + $0x2a8] ss:$16 sps:$4 sm:$0xff]   ;;  %v5831_v28 = vld [vmem:[#allocation7 + $0x2c4] ss:$16 sps:$4 sm:$0xff]   ;;  %v5834_v29 = vld [vmem:[#allocation7 + $0x2cc] ss:$16 sps:$4 sm:$0xff]  }
  0xa6   :  { %1540 = vmatprep.subr.bf16.mxu0 %v5745_v32  ;;  %1704 = vmatprep.subr.bf16.mxu1 %v5747_v33  ;;  %v147_v30 = vld [vmem:[#allocation2 + $0x18] sm:$0xff]  ;;  %v5829_v31 = vld [vmem:[#allocation7 + $0x2c0] ss:$16 sps:$4 sm:$0xff]  }
  0xa7   :  { %v154_v32 = vpack.c.bf16 %v147_v30, %v147_v30  ;;  %v5832_v33 = vld [vmem:[#allocation7 + $0x2c8] ss:$16 sps:$4 sm:$0xff]   ;;  %v5858_v48 = vld [vmem:[#allocation7 + $0x34c] ss:$16 sps:$4 sm:$0xff]  }
  0xa8   :  { %v5850_v46 = vld [vmem:[#allocation7 + $0x328] ss:$16 sps:$4 sm:$0xff]  }
  0xa9   :  { %1541 = vmatpush1.bf16.msra.mxu0 %v5749_v34  ;;  %1705 = vmatpush1.bf16.msra.mxu1 %v5750_v35  ;;  %v5837_v34 = vld [vmem:[#allocation7 + $0x2e4] ss:$16 sps:$4 sm:$0xff]   ;;  %v5840_v35 = vld [vmem:[#allocation7 + $0x2ec] ss:$16 sps:$4 sm:$0xff]   ;;  %v5880_v2 = vld [vmem:[#allocation7 + $0x3c8] ss:$16 sps:$4 sm:$0xff]  }
  0xaa   :  { %1542 = vmatprep.subr.bf16.mxu0 %v5751_v36  ;;  %1706 = vmatprep.subr.bf16.mxu1 %v5753_v37  ;;  %v5835_v36 = vld [vmem:[#allocation7 + $0x2e0] ss:$16 sps:$4 sm:$0xff]   ;;  %v5838_v37 = vld [vmem:[#allocation7 + $0x2e8] ss:$16 sps:$4 sm:$0xff]  }
  0xab   :  { %v5916_v30 = vld [vmem:[#allocation7 + $0x488] ss:$16 sps:$4 sm:$0xff]  }
  0xad   :  { %1543 = vmatpush1.bf16.msra.mxu0 %v5755_v38  ;;  %1707 = vmatpush1.bf16.msra.mxu1 %v5756_v39  ;;  %v5843_v38 = vld [vmem:[#allocation7 + $0x304] ss:$16 sps:$4 sm:$0xff]   ;;  %v5846_v39 = vld [vmem:[#allocation7 + $0x30c] ss:$16 sps:$4 sm:$0xff]  }
  0xae   :  { %1544 = vmatprep.subr.bf16.mxu0 %v5757_v40  ;;  %1708 = vmatprep.subr.bf16.mxu1 %v5759_v41  ;;  %v5841_v40 = vld [vmem:[#allocation7 + $0x300] ss:$16 sps:$4 sm:$0xff]   ;;  %v5844_v41 = vld [vmem:[#allocation7 + $0x308] ss:$16 sps:$4 sm:$0xff]  }
  0xb1   :  { %1545 = vmatpush1.bf16.msra.mxu0 %v5761_v42  ;;  %1709 = vmatpush1.bf16.msra.mxu1 %v5762_v43  ;;  %v5849_v42 = vld [vmem:[#allocation7 + $0x324] ss:$16 sps:$4 sm:$0xff]   ;;  %v5852_v43 = vld [vmem:[#allocation7 + $0x32c] ss:$16 sps:$4 sm:$0xff]  }
  0xb2   :  { %1546 = vmatprep.subr.bf16.mxu0 %v5763_v44  ;;  %1710 = vmatprep.subr.bf16.mxu1 %v5765_v45  ;;  %v6840_v44 = vmov 0   ;;  %v5847_v45 = vld [vmem:[#allocation7 + $0x320] ss:$16 sps:$4 sm:$0xff]  }
  0xb3   :  { %5695 = vset.pattern.permute.xlu0 %v6840_v44 }
  0xb5   :  { %1547 = vmatpush1.bf16.msra.mxu0 %v5767_v47  ;;  %1711 = vmatpush1.bf16.msra.mxu1 %v5768_v49  ;;  %v5855_v47 = vld [vmem:[#allocation7 + $0x344] ss:$16 sps:$4 sm:$0xff]   ;;  %v5853_v49 = vld [vmem:[#allocation7 + $0x340] ss:$16 sps:$4 sm:$0xff]  }
  0xb6   :  { %1548 = vmatprep.subr.bf16.mxu0 %v5769_v50  ;;  %1712 = vmatprep.subr.bf16.mxu1 %v5771_v51  ;;  %v5856_v50 = vld [vmem:[#allocation7 + $0x348] ss:$16 sps:$4 sm:$0xff]   ;;  %v5861_v51 = vld [vmem:[#allocation7 + $0x364] ss:$16 sps:$4 sm:$0xff]  }
  0xb9   :  { %1549 = vmatpush1.bf16.msra.mxu0 %v5773_v52  ;;  %1713 = vmatpush1.bf16.msra.mxu1 %v5774_v53  ;;  %v5864_v52 = vld [vmem:[#allocation7 + $0x36c] ss:$16 sps:$4 sm:$0xff]   ;;  %v5859_v53 = vld [vmem:[#allocation7 + $0x360] ss:$16 sps:$4 sm:$0xff]  }
  0xba   :  { %1550 = vmatprep.subr.bf16.mxu0 %v5775_v54  ;;  %1714 = vmatprep.subr.bf16.mxu1 %v5777_v55  ;;  %v5862_v54 = vld [vmem:[#allocation7 + $0x368] ss:$16 sps:$4 sm:$0xff]   ;;  %v5867_v55 = vld [vmem:[#allocation7 + $0x384] ss:$16 sps:$4 sm:$0xff]  }
  0xbd   :  { %1551 = vmatpush1.bf16.msra.mxu0 %v5779_v56  ;;  %1715 = vmatpush1.bf16.msra.mxu1 %v5780_v57  ;;  %v5870_v56 = vld [vmem:[#allocation7 + $0x38c] ss:$16 sps:$4 sm:$0xff]   ;;  %v5865_v57 = vld [vmem:[#allocation7 + $0x380] ss:$16 sps:$4 sm:$0xff]  }
  0xbe   :  { %1552 = vmatprep.subr.bf16.mxu0 %v5781_v58  ;;  %1716 = vmatprep.subr.bf16.mxu1 %v5783_v59  ;;  %v5868_v58 = vld [vmem:[#allocation7 + $0x388] ss:$16 sps:$4 sm:$0xff]   ;;  %v5873_v59 = vld [vmem:[#allocation7 + $0x3a4] ss:$16 sps:$4 sm:$0xff]  }
  0xc1   :  { %1553 = vmatpush1.bf16.msra.mxu0 %v5785_v60  ;;  %1717 = vmatpush1.bf16.msra.mxu1 %v5786_v61  ;;  %v5876_v60 = vld [vmem:[#allocation7 + $0x3ac] ss:$16 sps:$4 sm:$0xff]   ;;  %v5871_v61 = vld [vmem:[#allocation7 + $0x3a0] ss:$16 sps:$4 sm:$0xff]  }
  0xc2   :  { %1554 = vmatprep.subr.bf16.mxu0 %v5787_v62  ;;  %1718 = vmatprep.subr.bf16.mxu1 %v5789_v63  ;;  %v5874_v62 = vld [vmem:[#allocation7 + $0x3a8] ss:$16 sps:$4 sm:$0xff]   ;;  %v5879_v63 = vld [vmem:[#allocation7 + $0x3c4] ss:$16 sps:$4 sm:$0xff]  }
  0xc5   :  { %1555 = vmatpush1.bf16.msra.mxu0 %v5791_v0  ;;  %1719 = vmatpush1.bf16.msra.mxu1 %v5792_v1  ;;  %v5882_v0 = vld [vmem:[#allocation7 + $0x3cc] ss:$16 sps:$4 sm:$0xff]   ;;  %v5877_v1 = vld [vmem:[#allocation7 + $0x3c0] ss:$16 sps:$4 sm:$0xff]  }
  0xc6   :  { %1565 = vmatprep.subr.bf16.mxu0 %v5795_v3  ;;  %1729 = vmatprep.subr.bf16.mxu1 %v5798_v4  ;;  %v5885_v3 = vld [vmem:[#allocation7 + $0x3e4] ss:$16 sps:$4 sm:$0xff]   ;;  %v5888_v4 = vld [vmem:[#allocation7 + $0x3ec] ss:$16 sps:$4 sm:$0xff]  }
  0xc8   :  { %1557 = vmatmul.mubr.bf16.vlgmr.msra.gmra.mrb[0].mxu0 %v151_v5  ;;  %1721 = vmatmul.mubr.bf16.vlgmr.msra.gmra.mrb[0].mxu1 %v151_v5  ;;  %v5883_v5 = vld [vmem:[#allocation7 + $0x3e0] ss:$16 sps:$4 sm:$0xff]  }
  0xc9   :  { %1566 = vmatpush1.bf16.msra.mxu0 %v5793_v6  ;;  %1730 = vmatpush1.bf16.msra.mxu1 %v5796_v7  ;;  %v5886_v6 = vld [vmem:[#allocation7 + $0x3e8] ss:$16 sps:$4 sm:$0xff]   ;;  %v5891_v7 = vld [vmem:[#allocation7 + $0x404] ss:$16 sps:$4 sm:$0xff]  }
  0xca   :  { %1567 = vmatprep.subr.bf16.mxu0 %v5801_v8  ;;  %1731 = vmatprep.subr.bf16.mxu1 %v5804_v9  ;;  %v146_v8 = vld [vmem:[#allocation2 + $0x10] sm:$0xff]  ;;  %v5894_v9 = vld [vmem:[#allocation7 + $0x40c] ss:$16 sps:$4 sm:$0xff]  }
  0xcb   :  { %1597 = vmatprep.mubr.bf16.mxu0 %v154_v32  ;;  %1761 = vmatprep.mubr.bf16.mxu1 %v154_v32  ;;  %v5924_v32 = vld [vmem:[#allocation7 + $0x4ac] ss:$16 sps:$4 sm:$0xff]  }
  0xcd   :  { %1568 = vmatpush1.bf16.msra.mxu0 %v5799_v10  ;;  %1732 = vmatpush1.bf16.msra.mxu1 %v5802_v11  ;;  %v5889_v10 = vld [vmem:[#allocation7 + $0x400] ss:$16 sps:$4 sm:$0xff]   ;;  %v5892_v11 = vld [vmem:[#allocation7 + $0x408] ss:$16 sps:$4 sm:$0xff]  }
  0xce   :  { %1569 = vmatprep.subr.bf16.mxu0 %v5807_v12  ;;  %1733 = vmatprep.subr.bf16.mxu1 %v5810_v13  ;;  %v153_v12 = vpack.c.bf16 %v146_v8, %v146_v8  ;;  %v5897_v13 = vld [vmem:[#allocation7 + $0x424] ss:$16 sps:$4 sm:$0xff]  }
  0xcf   :  { %v5981_v8 = vld [vmem:[#allocation7 + $0x5e4] ss:$16 sps:$4 sm:$0xff]  }
  0xd1   :  { %1570 = vmatpush1.bf16.msra.mxu0 %v5805_v14  ;;  %1734 = vmatpush1.bf16.msra.mxu1 %v5808_v15  ;;  %v5900_v14 = vld [vmem:[#allocation7 + $0x42c] ss:$16 sps:$4 sm:$0xff]  }
  0xd2   :  { %1571 = vmatprep.subr.bf16.mxu0 %v5813_v16  ;;  %1735 = vmatprep.subr.bf16.mxu1 %v5816_v17  ;;  %v149_v15 = vld [vmem:[#allocation2 + $0x28] sm:$0xff]  ;;  %v5895_v17 = vld [vmem:[#allocation7 + $0x420] ss:$16 sps:$4 sm:$0xff]  }
  0xd3   :  { %v156_v16 = vpack.c.bf16 %v149_v15, %v149_v15  ;;  %v5985_v15 = vld [vmem:[#allocation7 + $0x600] ss:$16 sps:$4 sm:$0xff]  }
  0xd5   :  { %1572 = vmatpush1.bf16.msra.mxu0 %v5811_v18  ;;  %1736 = vmatpush1.bf16.msra.mxu1 %v5814_v19  ;;  %v5898_v18 = vld [vmem:[#allocation7 + $0x428] ss:$16 sps:$4 sm:$0xff]   ;;  %v5903_v19 = vld [vmem:[#allocation7 + $0x444] ss:$16 sps:$4 sm:$0xff]  }
  0xd6   :  { %1573 = vmatprep.subr.bf16.mxu0 %v5819_v20  ;;  %1737 = vmatprep.subr.bf16.mxu1 %v5822_v21  ;;  %v5906_v20 = vld [vmem:[#allocation7 + $0x44c] ss:$16 sps:$4 sm:$0xff]   ;;  %v5901_v21 = vld [vmem:[#allocation7 + $0x440] ss:$16 sps:$4 sm:$0xff]  }
  0xd9   :  { %1574 = vmatpush1.bf16.msra.mxu0 %v5817_v22  ;;  %1738 = vmatpush1.bf16.msra.mxu1 %v5820_v23  ;;  %v5904_v22 = vld [vmem:[#allocation7 + $0x448] ss:$16 sps:$4 sm:$0xff]   ;;  %v5909_v23 = vld [vmem:[#allocation7 + $0x464] ss:$16 sps:$4 sm:$0xff]  }
  0xda   :  { %1575 = vmatprep.subr.bf16.mxu0 %v5825_v24  ;;  %1739 = vmatprep.subr.bf16.mxu1 %v5828_v25  ;;  %v5912_v24 = vld [vmem:[#allocation7 + $0x46c] ss:$16 sps:$4 sm:$0xff]   ;;  %v5907_v25 = vld [vmem:[#allocation7 + $0x460] ss:$16 sps:$4 sm:$0xff]  }
  0xdd   :  { %1576 = vmatpush1.bf16.msra.mxu0 %v5823_v26  ;;  %1740 = vmatpush1.bf16.msra.mxu1 %v5826_v27  ;;  %v5910_v26 = vld [vmem:[#allocation7 + $0x468] ss:$16 sps:$4 sm:$0xff]   ;;  %v5915_v27 = vld [vmem:[#allocation7 + $0x484] ss:$16 sps:$4 sm:$0xff]  }
  0xde   :  { %1577 = vmatprep.subr.bf16.mxu0 %v5831_v28  ;;  %1741 = vmatprep.subr.bf16.mxu1 %v5834_v29  ;;  %v5918_v28 = vld [vmem:[#allocation7 + $0x48c] ss:$16 sps:$4 sm:$0xff]   ;;  %v5913_v29 = vld [vmem:[#allocation7 + $0x480] ss:$16 sps:$4 sm:$0xff]  }
  0xe1   :  { %1578 = vmatpush1.bf16.msra.mxu0 %v5829_v31  ;;  %1742 = vmatpush1.bf16.msra.mxu1 %v5832_v33  ;;  %v5921_v31 = vld [vmem:[#allocation7 + $0x4a4] ss:$16 sps:$4 sm:$0xff]   ;;  %v5919_v33 = vld [vmem:[#allocation7 + $0x4a0] ss:$16 sps:$4 sm:$0xff]  }
  0xe2   :  { %1579 = vmatprep.subr.bf16.mxu0 %v5837_v34  ;;  %1743 = vmatprep.subr.bf16.mxu1 %v5840_v35  ;;  %v5922_v34 = vld [vmem:[#allocation7 + $0x4a8] ss:$16 sps:$4 sm:$0xff]   ;;  %v5927_v35 = vld [vmem:[#allocation7 + $0x4c4] ss:$16 sps:$4 sm:$0xff]  }
  0xe5   :  { %1580 = vmatpush1.bf16.msra.mxu0 %v5835_v36  ;;  %1744 = vmatpush1.bf16.msra.mxu1 %v5838_v37  ;;  %v5930_v36 = vld [vmem:[#allocation7 + $0x4cc] ss:$16 sps:$4 sm:$0xff]   ;;  %v5925_v37 = vld [vmem:[#allocation7 + $0x4c0] ss:$16 sps:$4 sm:$0xff]  }
  0xe6   :  { %1581 = vmatprep.subr.bf16.mxu0 %v5843_v38  ;;  %1745 = vmatprep.subr.bf16.mxu1 %v5846_v39  ;;  %v5928_v38 = vld [vmem:[#allocation7 + $0x4c8] ss:$16 sps:$4 sm:$0xff]   ;;  %v5933_v39 = vld [vmem:[#allocation7 + $0x4e4] ss:$16 sps:$4 sm:$0xff]  }
  0xe9   :  { %1582 = vmatpush1.bf16.msra.mxu0 %v5841_v40  ;;  %1746 = vmatpush1.bf16.msra.mxu1 %v5844_v41  ;;  %v5936_v40 = vld [vmem:[#allocation7 + $0x4ec] ss:$16 sps:$4 sm:$0xff]   ;;  %v5931_v41 = vld [vmem:[#allocation7 + $0x4e0] ss:$16 sps:$4 sm:$0xff]  }
  0xea   :  { %1583 = vmatprep.subr.bf16.mxu0 %v5849_v42  ;;  %1747 = vmatprep.subr.bf16.mxu1 %v5852_v43  ;;  %v5934_v42 = vld [vmem:[#allocation7 + $0x4e8] ss:$16 sps:$4 sm:$0xff]   ;;  %v5939_v43 = vld [vmem:[#allocation7 + $0x504] ss:$16 sps:$4 sm:$0xff]  }
  0xed   :  { %1584 = vmatpush1.bf16.msra.mxu0 %v5847_v45  ;;  %1748 = vmatpush1.bf16.msra.mxu1 %v5850_v46  ;;  %v5942_v45 = vld [vmem:[#allocation7 + $0x50c] ss:$16 sps:$4 sm:$0xff]   ;;  %v5937_v46 = vld [vmem:[#allocation7 + $0x500] ss:$16 sps:$4 sm:$0xff]  }
  0xee   :  { %1585 = vmatprep.subr.bf16.mxu0 %v5855_v47  ;;  %1749 = vmatprep.subr.bf16.mxu1 %v5858_v48  ;;  %v5940_v47 = vld [vmem:[#allocation7 + $0x508] ss:$16 sps:$4 sm:$0xff]   ;;  %v5945_v48 = vld [vmem:[#allocation7 + $0x524] ss:$16 sps:$4 sm:$0xff]  }
  0xf1   :  { %1586 = vmatpush1.bf16.msra.mxu0 %v5853_v49  ;;  %1750 = vmatpush1.bf16.msra.mxu1 %v5856_v50  ;;  %v5948_v49 = vld [vmem:[#allocation7 + $0x52c] ss:$16 sps:$4 sm:$0xff]   ;;  %v5943_v50 = vld [vmem:[#allocation7 + $0x520] ss:$16 sps:$4 sm:$0xff]  }
  0xf2   :  { %1587 = vmatprep.subr.bf16.mxu0 %v5861_v51  ;;  %1751 = vmatprep.subr.bf16.mxu1 %v5864_v52  ;;  %v5946_v51 = vld [vmem:[#allocation7 + $0x528] ss:$16 sps:$4 sm:$0xff]   ;;  %v5951_v52 = vld [vmem:[#allocation7 + $0x544] ss:$16 sps:$4 sm:$0xff]  }
  0xf5   :  { %1588 = vmatpush1.bf16.msra.mxu0 %v5859_v53  ;;  %1752 = vmatpush1.bf16.msra.mxu1 %v5862_v54  ;;  %v5954_v53 = vld [vmem:[#allocation7 + $0x54c] ss:$16 sps:$4 sm:$0xff]   ;;  %v5949_v54 = vld [vmem:[#allocation7 + $0x540] ss:$16 sps:$4 sm:$0xff]  }
  0xf6   :  { %1589 = vmatprep.subr.bf16.mxu0 %v5867_v55  ;;  %1753 = vmatprep.subr.bf16.mxu1 %v5870_v56  ;;  %v5952_v55 = vld [vmem:[#allocation7 + $0x548] ss:$16 sps:$4 sm:$0xff]   ;;  %v5957_v56 = vld [vmem:[#allocation7 + $0x564] ss:$16 sps:$4 sm:$0xff]  }
  0xf9   :  { %1590 = vmatpush1.bf16.msra.mxu0 %v5865_v57  ;;  %1754 = vmatpush1.bf16.msra.mxu1 %v5868_v58  ;;  %v5960_v57 = vld [vmem:[#allocation7 + $0x56c] ss:$16 sps:$4 sm:$0xff]   ;;  %v5955_v58 = vld [vmem:[#allocation7 + $0x560] ss:$16 sps:$4 sm:$0xff]  }
  0xfa   :  { %1591 = vmatprep.subr.bf16.mxu0 %v5873_v59  ;;  %1755 = vmatprep.subr.bf16.mxu1 %v5876_v60  ;;  %v5958_v59 = vld [vmem:[#allocation7 + $0x568] ss:$16 sps:$4 sm:$0xff]   ;;  %v5963_v60 = vld [vmem:[#allocation7 + $0x584] ss:$16 sps:$4 sm:$0xff]  }
  0xfd   :  { %1592 = vmatpush1.bf16.msra.mxu0 %v5871_v61  ;;  %1756 = vmatpush1.bf16.msra.mxu1 %v5874_v62  ;;  %v5966_v61 = vld [vmem:[#allocation7 + $0x58c] ss:$16 sps:$4 sm:$0xff]   ;;  %v5961_v62 = vld [vmem:[#allocation7 + $0x580] ss:$16 sps:$4 sm:$0xff]  }
  0xfe   :  { %1593 = vmatprep.subr.bf16.mxu0 %v5879_v63  ;;  %1757 = vmatprep.subr.bf16.mxu1 %v5882_v0  ;;  %v5964_v63 = vld [vmem:[#allocation7 + $0x588] ss:$16 sps:$4 sm:$0xff]   ;;  %v5969_v0 = vld [vmem:[#allocation7 + $0x5a4] ss:$16 sps:$4 sm:$0xff]  }
 0x101   :  { %1594 = vmatpush1.bf16.msra.mxu0 %v5877_v1  ;;  %1758 = vmatpush1.bf16.msra.mxu1 %v5880_v2  ;;  %v5972_v1 = vld [vmem:[#allocation7 + $0x5ac] ss:$16 sps:$4 sm:$0xff]   ;;  %v5967_v2 = vld [vmem:[#allocation7 + $0x5a0] ss:$16 sps:$4 sm:$0xff]  }
 0x102   :  { %1595 = vmatprep.subr.bf16.mxu0 %v5885_v3  ;;  %1759 = vmatprep.subr.bf16.mxu1 %v5888_v4  ;;  %v5970_v3 = vld [vmem:[#allocation7 + $0x5a8] ss:$16 sps:$4 sm:$0xff]   ;;  %v5975_v4 = vld [vmem:[#allocation7 + $0x5c4] ss:$16 sps:$4 sm:$0xff]  }
 0x105   :  { %1596 = vmatpush1.bf16.msra.mxu0 %v5883_v5  ;;  %1760 = vmatpush1.bf16.msra.mxu1 %v5886_v6  ;;  %v5978_v5 = vld [vmem:[#allocation7 + $0x5cc] ss:$16 sps:$4 sm:$0xff]   ;;  %v5973_v6 = vld [vmem:[#allocation7 + $0x5c0] ss:$16 sps:$4 sm:$0xff]  }
 0x106   :  { %1606 = vmatprep.subr.bf16.mxu0 %v5891_v7  ;;  %1770 = vmatprep.subr.bf16.mxu1 %v5894_v9  ;;  %v5976_v7 = vld [vmem:[#allocation7 + $0x5c8] ss:$16 sps:$4 sm:$0xff]   ;;  %v5984_v9 = vld [vmem:[#allocation7 + $0x5ec] ss:$16 sps:$4 sm:$0xff]  }
 0x108   :  { %1598 = vmatmul.mubr.bf16.vlgmr.msra.gmra.mrb[0].mxu0 %v153_v12  ;;  %1762 = vmatmul.mubr.bf16.vlgmr.msra.gmra.mrb[0].mxu1 %v153_v12  ;;  %v148_v12 = vld [vmem:[#allocation2 + $0x20] sm:$0xff] }
 0x109   :  { %1607 = vmatpush1.bf16.msra.mxu0 %v5889_v10  ;;  %1771 = vmatpush1.bf16.msra.mxu1 %v5892_v11  ;;  %v5979_v10 = vld [vmem:[#allocation7 + $0x5e0] ss:$16 sps:$4 sm:$0xff]   ;;  %v5982_v11 = vld [vmem:[#allocation7 + $0x5e8] ss:$16 sps:$4 sm:$0xff]  }
 0x10a   :  { %1608 = vmatprep.subr.bf16.mxu0 %v5897_v13  ;;  %1772 = vmatprep.subr.bf16.mxu1 %v5900_v14  ;;  %v5987_v13 = vld [vmem:[#allocation7 + $0x604] ss:$16 sps:$4 sm:$0xff]   ;;  %v5990_v14 = vld [vmem:[#allocation7 + $0x60c] ss:$16 sps:$4 sm:$0xff]  }
 0x10b   :  { %1638 = vmatprep.mubr.bf16.mxu0 %v156_v16  ;;  %1802 = vmatprep.mubr.bf16.mxu1 %v156_v16  ;;  %v5988_v16 = vld [vmem:[#allocation7 + $0x608] ss:$16 sps:$4 sm:$0xff]  }
 0x10d   :  { %1609 = vmatpush1.bf16.msra.mxu0 %v5895_v17  ;;  %1773 = vmatpush1.bf16.msra.mxu1 %v5898_v18  ;;  %v155_v17 = vpack.c.bf16 %v148_v12, %v148_v12  ;;  %v5993_v18 = vld [vmem:[#allocation7 + $0x624] ss:$16 sps:$4 sm:$0xff]  }
 0x10e   :  { %1610 = vmatprep.subr.bf16.mxu0 %v5903_v19  ;;  %1774 = vmatprep.subr.bf16.mxu1 %v5906_v20  ;;  %v5996_v19 = vld [vmem:[#allocation7 + $0x62c] ss:$16 sps:$4 sm:$0xff]   ;;  %v5991_v20 = vld [vmem:[#allocation7 + $0x620] ss:$16 sps:$4 sm:$0xff]  }
 0x10f   :  { %v6077_v12 = vld [vmem:[#allocation8 + $0xe4] ss:$8 sps:$4 sm:$0xff]  }
 0x111   :  { %1611 = vmatpush1.bf16.msra.mxu0 %v5901_v21  ;;  %1775 = vmatpush1.bf16.msra.mxu1 %v5904_v22  ;;  %v5994_v21 = vld [vmem:[#allocation7 + $0x628] ss:$16 sps:$4 sm:$0xff]   ;;  %v5999_v22 = vld [vmem:[#allocation7 + $0x644] ss:$16 sps:$4 sm:$0xff]  }
 0x112   :  { %1612 = vmatprep.subr.bf16.mxu0 %v5909_v23  ;;  %1776 = vmatprep.subr.bf16.mxu1 %v5912_v24  ;;  %v6002_v23 = vld [vmem:[#allocation7 + $0x64c] ss:$16 sps:$4 sm:$0xff]   ;;  %v5997_v24 = vld [vmem:[#allocation7 + $0x640] ss:$16 sps:$4 sm:$0xff]  }
 0x115   :  { %1613 = vmatpush1.bf16.msra.mxu0 %v5907_v25  ;;  %1777 = vmatpush1.bf16.msra.mxu1 %v5910_v26  ;;  %v6000_v25 = vld [vmem:[#allocation7 + $0x648] ss:$16 sps:$4 sm:$0xff]   ;;  %v6005_v26 = vld [vmem:[#allocation7 + $0x664] ss:$16 sps:$4 sm:$0xff]  }
 0x116   :  { %1614 = vmatprep.subr.bf16.mxu0 %v5915_v27  ;;  %1778 = vmatprep.subr.bf16.mxu1 %v5918_v28  ;;  %v6008_v27 = vld [vmem:[#allocation7 + $0x66c] ss:$16 sps:$4 sm:$0xff]   ;;  %v6003_v28 = vld [vmem:[#allocation7 + $0x660] ss:$16 sps:$4 sm:$0xff]  }
 0x119   :  { %1615 = vmatpush1.bf16.msra.mxu0 %v5913_v29  ;;  %1779 = vmatpush1.bf16.msra.mxu1 %v5916_v30  ;;  %v6006_v29 = vld [vmem:[#allocation7 + $0x668] ss:$16 sps:$4 sm:$0xff]   ;;  %v6011_v30 = vld [vmem:[#allocation7 + $0x684] ss:$16 sps:$4 sm:$0xff]  }
 0x11a   :  { %1616 = vmatprep.subr.bf16.mxu0 %v5921_v31  ;;  %1780 = vmatprep.subr.bf16.mxu1 %v5924_v32  ;;  %v6014_v31 = vld [vmem:[#allocation7 + $0x68c] ss:$16 sps:$4 sm:$0xff]   ;;  %v6009_v32 = vld [vmem:[#allocation7 + $0x680] ss:$16 sps:$4 sm:$0xff]  }
 0x11d   :  { %1617 = vmatpush1.bf16.msra.mxu0 %v5919_v33  ;;  %1781 = vmatpush1.bf16.msra.mxu1 %v5922_v34  ;;  %v6012_v33 = vld [vmem:[#allocation7 + $0x688] ss:$16 sps:$4 sm:$0xff]   ;;  %v6017_v34 = vld [vmem:[#allocation7 + $0x6a4] ss:$16 sps:$4 sm:$0xff]  }
 0x11e   :  { %1618 = vmatprep.subr.bf16.mxu0 %v5927_v35  ;;  %1782 = vmatprep.subr.bf16.mxu1 %v5930_v36  ;;  %v6020_v35 = vld [vmem:[#allocation7 + $0x6ac] ss:$16 sps:$4 sm:$0xff]   ;;  %v6018_v36 = vld [vmem:[#allocation7 + $0x6a8] ss:$16 sps:$4 sm:$0xff]  }
 0x121   :  { %1619 = vmatpush1.bf16.msra.mxu0 %v5925_v37  ;;  %1783 = vmatpush1.bf16.msra.mxu1 %v5928_v38  ;;  %v6023_v37 = vld [vmem:[#allocation7 + $0x6c4] ss:$16 sps:$4 sm:$0xff]   ;;  %v6026_v38 = vld [vmem:[#allocation7 + $0x6cc] ss:$16 sps:$4 sm:$0xff]  }
 0x122   :  { %1620 = vmatprep.subr.bf16.mxu0 %v5933_v39  ;;  %1784 = vmatprep.subr.bf16.mxu1 %v5936_v40  ;;  %v6021_v39 = vld [vmem:[#allocation7 + $0x6c0] ss:$16 sps:$4 sm:$0xff]   ;;  %v6024_v40 = vld [vmem:[#allocation7 + $0x6c8] ss:$16 sps:$4 sm:$0xff]  }
 0x125   :  { %1621 = vmatpush1.bf16.msra.mxu0 %v5931_v41  ;;  %1785 = vmatpush1.bf16.msra.mxu1 %v5934_v42  ;;  %v6029_v41 = vld [vmem:[#allocation7 + $0x6e4] ss:$16 sps:$4 sm:$0xff]   ;;  %v6032_v42 = vld [vmem:[#allocation7 + $0x6ec] ss:$16 sps:$4 sm:$0xff]  }
 0x126   :  { %1622 = vmatprep.subr.bf16.mxu0 %v5939_v43  ;;  %1786 = vmatprep.subr.bf16.mxu1 %v5942_v45  ;;  %v6027_v43 = vld [vmem:[#allocation7 + $0x6e0] ss:$16 sps:$4 sm:$0xff]   ;;  %v6030_v45 = vld [vmem:[#allocation7 + $0x6e8] ss:$16 sps:$4 sm:$0xff]  }
 0x129   :  { %1623 = vmatpush1.bf16.msra.mxu0 %v5937_v46  ;;  %1787 = vmatpush1.bf16.msra.mxu1 %v5940_v47  ;;  %v150_v46 = vld [vmem:[#allocation2 + $0x30] sm:$0xff]  ;;  %v6035_v47 = vld [vmem:[#allocation8 + $0x4] ss:$8 sps:$4 sm:$0xff]  }
 0x12a   :  { %1624 = vmatprep.subr.bf16.mxu0 %v5945_v48  ;;  %1788 = vmatprep.subr.bf16.mxu1 %v5948_v49  ;;  %v6033_v48 = vld [vmem:[#allocation8] ss:$8 sps:$4 sm:$0xff]   ;;  %v157_v49 = vpack.c.bf16 %v150_v46, %v150_v46  ;;  %v6170_v46 = vld [vmem:[#allocation10 + $0xd4] ss:$8 sps:$4 sm:$0xff]  }
 0x12d   :  { %1625 = vmatpush1.bf16.msra.mxu0 %v5943_v50  ;;  %1789 = vmatpush1.bf16.msra.mxu1 %v5946_v51  ;;  %v6038_v50 = vld [vmem:[#allocation8 + $0x14] ss:$8 sps:$4 sm:$0xff]   ;;  %v6036_v51 = vld [vmem:[#allocation8 + $0x10] ss:$8 sps:$4 sm:$0xff]  }
 0x12e   :  { %1626 = vmatprep.subr.bf16.mxu0 %v5951_v52  ;;  %1790 = vmatprep.subr.bf16.mxu1 %v5954_v53  ;;  %v6041_v52 = vld [vmem:[#allocation8 + $0x24] ss:$8 sps:$4 sm:$0xff]   ;;  %v6039_v53 = vld [vmem:[#allocation8 + $0x20] ss:$8 sps:$4 sm:$0xff]  }
 0x131   :  { %1627 = vmatpush1.bf16.msra.mxu0 %v5949_v54  ;;  %1791 = vmatpush1.bf16.msra.mxu1 %v5952_v55  ;;  %v6044_v54 = vld [vmem:[#allocation8 + $0x34] ss:$8 sps:$4 sm:$0xff]   ;;  %v6042_v55 = vld [vmem:[#allocation8 + $0x30] ss:$8 sps:$4 sm:$0xff]  }
 0x132   :  { %1628 = vmatprep.subr.bf16.mxu0 %v5957_v56  ;;  %1792 = vmatprep.subr.bf16.mxu1 %v5960_v57  ;;  %v6047_v56 = vld [vmem:[#allocation8 + $0x44] ss:$8 sps:$4 sm:$0xff]   ;;  %v6045_v57 = vld [vmem:[#allocation8 + $0x40] ss:$8 sps:$4 sm:$0xff]  }
 0x135   :  { %1629 = vmatpush1.bf16.msra.mxu0 %v5955_v58  ;;  %1793 = vmatpush1.bf16.msra.mxu1 %v5958_v59  ;;  %v6050_v58 = vld [vmem:[#allocation8 + $0x54] ss:$8 sps:$4 sm:$0xff]   ;;  %v6048_v59 = vld [vmem:[#allocation8 + $0x50] ss:$8 sps:$4 sm:$0xff]  }
 0x136   :  { %1630 = vmatprep.subr.bf16.mxu0 %v5963_v60  ;;  %1794 = vmatprep.subr.bf16.mxu1 %v5966_v61  ;;  %v6053_v60 = vld [vmem:[#allocation8 + $0x64] ss:$8 sps:$4 sm:$0xff]   ;;  %v6051_v61 = vld [vmem:[#allocation8 + $0x60] ss:$8 sps:$4 sm:$0xff]  }
 0x139   :  { %1631 = vmatpush1.bf16.msra.mxu0 %v5961_v62  ;;  %1795 = vmatpush1.bf16.msra.mxu1 %v5964_v63  ;;  %v6056_v62 = vld [vmem:[#allocation8 + $0x74] ss:$8 sps:$4 sm:$0xff]   ;;  %v6054_v63 = vld [vmem:[#allocation8 + $0x70] ss:$8 sps:$4 sm:$0xff]  }
 0x13a   :  { %1632 = vmatprep.subr.bf16.mxu0 %v5969_v0  ;;  %1796 = vmatprep.subr.bf16.mxu1 %v5972_v1  ;;  %v6059_v0 = vld [vmem:[#allocation8 + $0x84] ss:$8 sps:$4 sm:$0xff]   ;;  %v6057_v1 = vld [vmem:[#allocation8 + $0x80] ss:$8 sps:$4 sm:$0xff]  }
 0x13d   :  { %1633 = vmatpush1.bf16.msra.mxu0 %v5967_v2  ;;  %1797 = vmatpush1.bf16.msra.mxu1 %v5970_v3  ;;  %v6062_v2 = vld [vmem:[#allocation8 + $0x94] ss:$8 sps:$4 sm:$0xff]   ;;  %v6060_v3 = vld [vmem:[#allocation8 + $0x90] ss:$8 sps:$4 sm:$0xff]  }
 0x13e   :  { %1634 = vmatprep.subr.bf16.mxu0 %v5975_v4  ;;  %1798 = vmatprep.subr.bf16.mxu1 %v5978_v5  ;;  %v6065_v4 = vld [vmem:[#allocation8 + $0xa4] ss:$8 sps:$4 sm:$0xff]   ;;  %v6063_v5 = vld [vmem:[#allocation8 + $0xa0] ss:$8 sps:$4 sm:$0xff]  }
 0x141   :  { %1635 = vmatpush1.bf16.msra.mxu0 %v5973_v6  ;;  %1799 = vmatpush1.bf16.msra.mxu1 %v5976_v7  ;;  %v6068_v6 = vld [vmem:[#allocation8 + $0xb4] ss:$8 sps:$4 sm:$0xff]   ;;  %v6066_v7 = vld [vmem:[#allocation8 + $0xb0] ss:$8 sps:$4 sm:$0xff]  }
 0x142   :  { %1636 = vmatprep.subr.bf16.mxu0 %v5981_v8  ;;  %1800 = vmatprep.subr.bf16.mxu1 %v5984_v9  ;;  %v6071_v8 = vld [vmem:[#allocation8 + $0xc4] ss:$8 sps:$4 sm:$0xff]   ;;  %v6069_v9 = vld [vmem:[#allocation8 + $0xc0] ss:$8 sps:$4 sm:$0xff]  }
 0x145   :  { %1637 = vmatpush1.bf16.msra.mxu0 %v5979_v10  ;;  %1801 = vmatpush1.bf16.msra.mxu1 %v5982_v11  ;;  %v6074_v10 = vld [vmem:[#allocation8 + $0xd4] ss:$8 sps:$4 sm:$0xff]   ;;  %v6072_v11 = vld [vmem:[#allocation8 + $0xd0] ss:$8 sps:$4 sm:$0xff]  }
 0x146   :  { %1647 = vmatprep.subr.bf16.mxu0 %v5987_v13  ;;  %1811 = vmatprep.subr.bf16.mxu1 %v5990_v14  ;;  %v6075_v13 = vld [vmem:[#allocation8 + $0xe0] ss:$8 sps:$4 sm:$0xff]   ;;  %v6080_v14 = vld [vmem:[#allocation8 + $0xf4] ss:$8 sps:$4 sm:$0xff]  }
 0x148   :  { %1639 = vmatmul.mubr.bf16.vlgmr.msra.gmra.mrb[0].mxu0 %v155_v17  ;;  %1803 = vmatmul.mubr.bf16.vlgmr.msra.gmra.mrb[0].mxu1 %v155_v17  ;;  %v6129_v17 = vld [vmem:[#allocation10] ss:$8 sps:$4 sm:$0xff]  }
 0x149   :  { %1648 = vmatpush1.bf16.msra.mxu0 %v5985_v15  ;;  %1812 = vmatpush1.bf16.msra.mxu1 %v5988_v16  ;;  %v6078_v15 = vld [vmem:[#allocation8 + $0xf0] ss:$8 sps:$4 sm:$0xff]   ;;  %v6083_v16 = vld [vmem:[#allocation8 + $0x104] ss:$8 sps:$4 sm:$0xff]  }
 0x14a   :  { %1649 = vmatprep.subr.bf16.mxu0 %v5993_v18  ;;  %1813 = vmatprep.subr.bf16.mxu1 %v5996_v19  ;;  %v6131_v18 = vld [vmem:[#allocation10 + $0x4] ss:$8 sps:$4 sm:$0xff]   ;;  %v6134_v19 = vld [vmem:[#allocation10 + $0x14] ss:$8 sps:$4 sm:$0xff]  }
 0x14b   :  { %1679 = vmatprep.mubr.bf16.mxu0 %v6840_v44  ;;  %1843 = vmatprep.mubr.bf16.mxu1 %v6840_v44  ;;  %v6015_v44 = vld [vmem:[#allocation7 + $0x6a0] ss:$16 sps:$4 sm:$0xff]  }
 0x14d   :  { %1650 = vmatpush1.bf16.msra.mxu0 %v5991_v20  ;;  %1814 = vmatpush1.bf16.msra.mxu1 %v5994_v21  ;;  %v6132_v20 = vld [vmem:[#allocation10 + $0x10] ss:$8 sps:$4 sm:$0xff]   ;;  %v6137_v21 = vld [vmem:[#allocation10 + $0x24] ss:$8 sps:$4 sm:$0xff]  }
 0x14e   :  { %1651 = vmatprep.subr.bf16.mxu0 %v5999_v22  ;;  %1815 = vmatprep.subr.bf16.mxu1 %v6002_v23  ;;  %v6135_v22 = vld [vmem:[#allocation10 + $0x20] ss:$8 sps:$4 sm:$0xff]   ;;  %v6140_v23 = vld [vmem:[#allocation10 + $0x34] ss:$8 sps:$4 sm:$0xff]  }
 0x151   :  { %1652 = vmatpush1.bf16.msra.mxu0 %v5997_v24  ;;  %1816 = vmatpush1.bf16.msra.mxu1 %v6000_v25  ;;  %v6138_v24 = vld [vmem:[#allocation10 + $0x30] ss:$8 sps:$4 sm:$0xff]   ;;  %v6143_v25 = vld [vmem:[#allocation10 + $0x44] ss:$8 sps:$4 sm:$0xff]  }
 0x152   :  { %1653 = vmatprep.subr.bf16.mxu0 %v6005_v26  ;;  %1817 = vmatprep.subr.bf16.mxu1 %v6008_v27  ;;  %v6141_v26 = vld [vmem:[#allocation10 + $0x40] ss:$8 sps:$4 sm:$0xff]   ;;  %v6146_v27 = vld [vmem:[#allocation10 + $0x54] ss:$8 sps:$4 sm:$0xff]  }
 0x155   :  { %1654 = vmatpush1.bf16.msra.mxu0 %v6003_v28  ;;  %1818 = vmatpush1.bf16.msra.mxu1 %v6006_v29  ;;  %v6144_v28 = vld [vmem:[#allocation10 + $0x50] ss:$8 sps:$4 sm:$0xff]   ;;  %v6149_v29 = vld [vmem:[#allocation10 + $0x64] ss:$8 sps:$4 sm:$0xff]  }
 0x156   :  { %1655 = vmatprep.subr.bf16.mxu0 %v6011_v30  ;;  %1819 = vmatprep.subr.bf16.mxu1 %v6014_v31  ;;  %v6147_v30 = vld [vmem:[#allocation10 + $0x60] ss:$8 sps:$4 sm:$0xff]   ;;  %v6152_v31 = vld [vmem:[#allocation10 + $0x74] ss:$8 sps:$4 sm:$0xff]  }
 0x159   :  { %1656 = vmatpush1.bf16.msra.mxu0 %v6009_v32  ;;  %1820 = vmatpush1.bf16.msra.mxu1 %v6012_v33  ;;  %v6150_v32 = vld [vmem:[#allocation10 + $0x70] ss:$8 sps:$4 sm:$0xff]   ;;  %v6155_v33 = vld [vmem:[#allocation10 + $0x84] ss:$8 sps:$4 sm:$0xff]  }
 0x15a   :  { %1657 = vmatprep.subr.bf16.mxu0 %v6017_v34  ;;  %1821 = vmatprep.subr.bf16.mxu1 %v6020_v35  ;;  %v6153_v34 = vld [vmem:[#allocation10 + $0x80] ss:$8 sps:$4 sm:$0xff]   ;;  %v6158_v35 = vld [vmem:[#allocation10 + $0x94] ss:$8 sps:$4 sm:$0xff]  }
 0x15d   :  { %1658 = vmatpush1.bf16.msra.mxu0 %v6015_v44  ;;  %1822 = vmatpush1.bf16.msra.mxu1 %v6018_v36  ;;  %v6156_v44 = vld [vmem:[#allocation10 + $0x90] ss:$8 sps:$4 sm:$0xff]   ;;  %v6161_v36 = vld [vmem:[#allocation10 + $0xa4] ss:$8 sps:$4 sm:$0xff]  }
 0x15e   :  { %1659 = vmatprep.subr.bf16.mxu0 %v6023_v37  ;;  %1823 = vmatprep.subr.bf16.mxu1 %v6026_v38  ;;  %v6159_v37 = vld [vmem:[#allocation10 + $0xa0] ss:$8 sps:$4 sm:$0xff]   ;;  %v384_v38 = vlaneseq }
 0x161   :  { %1660 = vmatpush1.bf16.msra.mxu0 %v6021_v39  ;;  %1824 = vmatpush1.bf16.msra.mxu1 %v6024_v40  ;;  %v6164_v39 = vld [vmem:[#allocation10 + $0xb4] ss:$8 sps:$4 sm:$0xff]   ;;  %v6162_v40 = vld [vmem:[#allocation10 + $0xb0] ss:$8 sps:$4 sm:$0xff]  }
 0x162   :  { %1661 = vmatprep.subr.bf16.mxu0 %v6029_v41  ;;  %1825 = vmatprep.subr.bf16.mxu1 %v6032_v42  ;;  %v7043_v41 = vshrl.u32 %v384_v38, 7  ;;  %v6167_v42 = vld [vmem:[#allocation10 + $0xc4] ss:$8 sps:$4 sm:$0xff]   ;;  %v6128_v38 = vld [vmem:[#allocation8 + $0x1f4] ss:$8 sps:$4 sm:$0xff]  }
 0x165   :  { %1662 = vmatpush1.bf16.msra.mxu0 %v6027_v43  ;;  %1826 = vmatpush1.bf16.msra.mxu1 %v6030_v45  ;;  %v6165_v43 = vld [vmem:[#allocation10 + $0xc0] ss:$8 sps:$4 sm:$0xff]   ;;  %v7046_v45 = vsub.s32 0, %v7043_v41 }
 0x166   :  { %2256 = vmatprep.subr.bf16.mxu0 %v6035_v47  ;;  %2546 = vmatprep.subr.bf16.mxu1 %v6131_v18  ;;  %v7051_v47 = vld [vmem:[%s7196_s3] sm:$0xf]  ;;  %v6101_v18 = vld [vmem:[#allocation8 + $0x164] ss:$8 sps:$4 sm:$0xff]  }
 0x168   :  { %1680 = vmatmul.mubr.bf16.vlgmr.msra.gmra.mrb[0].mxu0 %v157_v49  ;;  %1844 = vmatmul.mubr.bf16.vlgmr.msra.gmra.mrb[0].mxu1 %v157_v49  ;;  %v7057_v49 = vsub.s32 3, %v7043_v41 }
 0x169   :  { %2257 = vmatpush1.bf16.msra.mxu0 %v6033_v48  ;;  %2547 = vmatpush1.bf16.msra.mxu1 %v6129_v17  ;;  %v7054_v48 = vsub.s32 1, %v7043_v41  ;;  %v6096_v17 = vld [vmem:[#allocation8 + $0x150] ss:$8 sps:$4 sm:$0xff]  }
 0x16a   :  { %2258 = vmatprep.subr.bf16.mxu0 %v6038_v50  ;;  %2548 = vmatprep.subr.bf16.mxu1 %v6134_v19  ;;  %v6168_v50 = vld [vmem:[#allocation10 + $0xd0] ss:$8 sps:$4 sm:$0xff]   ;;  %v6099_v19 = vld [vmem:[#allocation8 + $0x160] ss:$8 sps:$4 sm:$0xff]  }
 0x16d   :  { %2259 = vmatpush1.bf16.msra.mxu0 %v6036_v51  ;;  %2549 = vmatpush1.bf16.msra.mxu1 %v6132_v20  ;;  %v387_v51 = vrot.slane %v7051_v47, %v7046_v45  ;;  %v6104_v20 = vld [vmem:[#allocation8 + $0x174] ss:$8 sps:$4 sm:$0xff]  }
 0x16e   :  { %2260 = vmatprep.subr.bf16.mxu0 %v6041_v52  ;;  %2550 = vmatprep.subr.bf16.mxu1 %v6137_v21  ;;  %v391_v52 = vrot.slane %v7051_v47, %v7054_v48  ;;  %v6102_v21 = vld [vmem:[#allocation8 + $0x170] ss:$8 sps:$4 sm:$0xff]  }
 0x171   :  { %2261 = vmatpush1.bf16.msra.mxu0 %v6039_v53  ;;  %2551 = vmatpush1.bf16.msra.mxu1 %v6135_v22  ;;  %v399_v53 = vrot.slane %v7051_v47, %v7057_v49  ;;  %v6107_v22 = vld [vmem:[#allocation8 + $0x184] ss:$8 sps:$4 sm:$0xff]  }
 0x172   :  { %2262 = vmatprep.subr.bf16.mxu0 %v6044_v54  ;;  %2552 = vmatprep.subr.bf16.mxu1 %v6140_v23  ;;  %v6105_v23 = vld [vmem:[#allocation8 + $0x180] ss:$8 sps:$4 sm:$0xff]  }
 0x175   :  { %2263 = vmatpush1.bf16.msra.mxu0 %v6042_v55  ;;  %2553 = vmatpush1.bf16.msra.mxu1 %v6138_v24  ;;  %v6110_v24 = vld [vmem:[#allocation8 + $0x194] ss:$8 sps:$4 sm:$0xff]  }
 0x176   :  { %2264 = vmatprep.subr.bf16.mxu0 %v6047_v56  ;;  %2554 = vmatprep.subr.bf16.mxu1 %v6143_v25  ;;  %v6108_v25 = vld [vmem:[#allocation8 + $0x190] ss:$8 sps:$4 sm:$0xff]  }
 0x179   :  { %2265 = vmatpush1.bf16.msra.mxu0 %v6045_v57  ;;  %2555 = vmatpush1.bf16.msra.mxu1 %v6141_v26  ;;  %v6113_v26 = vld [vmem:[#allocation8 + $0x1a4] ss:$8 sps:$4 sm:$0xff]  }
 0x17a   :  { %2266 = vmatprep.subr.bf16.mxu0 %v6050_v58  ;;  %2556 = vmatprep.subr.bf16.mxu1 %v6146_v27  ;;  %v6111_v27 = vld [vmem:[#allocation8 + $0x1a0] ss:$8 sps:$4 sm:$0xff]  }
 0x17d   :  { %2267 = vmatpush1.bf16.msra.mxu0 %v6048_v59  ;;  %2557 = vmatpush1.bf16.msra.mxu1 %v6144_v28  ;;  %v6116_v28 = vld [vmem:[#allocation8 + $0x1b4] ss:$8 sps:$4 sm:$0xff]  }
 0x17e   :  { %2268 = vmatprep.subr.bf16.mxu0 %v6053_v60  ;;  %2558 = vmatprep.subr.bf16.mxu1 %v6149_v29  ;;  %v6114_v29 = vld [vmem:[#allocation8 + $0x1b0] ss:$8 sps:$4 sm:$0xff]  }
 0x181   :  { %2269 = vmatpush1.bf16.msra.mxu0 %v6051_v61  ;;  %2559 = vmatpush1.bf16.msra.mxu1 %v6147_v30  ;;  %v6119_v30 = vld [vmem:[#allocation8 + $0x1c4] ss:$8 sps:$4 sm:$0xff]  }
 0x182   :  { %2270 = vmatprep.subr.bf16.mxu0 %v6056_v62  ;;  %2560 = vmatprep.subr.bf16.mxu1 %v6152_v31  ;;  %v6117_v31 = vld [vmem:[#allocation8 + $0x1c0] ss:$8 sps:$4 sm:$0xff]  }
 0x185   :  { %2271 = vmatpush1.bf16.msra.mxu0 %v6054_v63  ;;  %2561 = vmatpush1.bf16.msra.mxu1 %v6150_v32  ;;  %v7068_v32 = vsub.s32 2, %v7043_v41 }
 0x186   :  { %2272 = vmatprep.subr.bf16.mxu0 %v6059_v0  ;;  %2562 = vmatprep.subr.bf16.mxu1 %v6155_v33  ;;  %v6122_v33 = vld [vmem:[#allocation8 + $0x1d4] ss:$8 sps:$4 sm:$0xff]  }
 0x189   :  { %2273 = vmatpush1.bf16.msra.mxu0 %v6057_v1  ;;  %2563 = vmatpush1.bf16.msra.mxu1 %v6153_v34  ;;  %v6120_v34 = vld [vmem:[#allocation8 + $0x1d0] ss:$8 sps:$4 sm:$0xff]  }
 0x18a   :  { %2274 = vmatprep.subr.bf16.mxu0 %v6062_v2  ;;  %2564 = vmatprep.subr.bf16.mxu1 %v6158_v35  ;;  %v395_v35 = vrot.slane %v7051_v47, %v7068_v32  ;;  %v6176_v47 = vld [vmem:[#allocation10 + $0xf4] ss:$8 sps:$4 sm:$0xff]  }
 0x18d   :  { %2275 = vmatpush1.bf16.msra.mxu0 %v6060_v3  ;;  %2565 = vmatpush1.bf16.msra.mxu1 %v6156_v44  ;;  %v6125_v44 = vld [vmem:[#allocation8 + $0x1e4] ss:$8 sps:$4 sm:$0xff]  }
 0x18e   :  { %2276 = vmatprep.subr.bf16.mxu0 %v6065_v4  ;;  %2566 = vmatprep.subr.bf16.mxu1 %v6161_v36  ;;  %v6123_v36 = vld [vmem:[#allocation8 + $0x1e0] ss:$8 sps:$4 sm:$0xff]  }
 0x191   :  { %2277 = vmatpush1.bf16.msra.mxu0 %v6063_v5  ;;  %2567 = vmatpush1.bf16.msra.mxu1 %v6159_v37  ;;  %v6081_v5 = vld [vmem:[#allocation8 + $0x100] ss:$8 sps:$4 sm:$0xff]  }
 0x192   :  { %2278 = vmatprep.subr.bf16.mxu0 %v6068_v6  ;;  %2568 = vmatprep.subr.bf16.mxu1 %v6164_v39  ;;  %v6126_v39 = vld [vmem:[#allocation8 + $0x1f0] ss:$8 sps:$4 sm:$0xff]  }
 0x195   :  { %2279 = vmatpush1.bf16.msra.mxu0 %v6066_v7  ;;  %2569 = vmatpush1.bf16.msra.mxu1 %v6162_v40  ;;  %v6086_v7 = vld [vmem:[#allocation8 + $0x114] ss:$8 sps:$4 sm:$0xff]  }
 0x196   :  { %2280 = vmatprep.subr.bf16.mxu0 %v6071_v8  ;;  %2570 = vmatprep.subr.bf16.mxu1 %v6167_v42 }
 0x199   :  { %2281 = vmatpush1.bf16.msra.mxu0 %v6069_v9  ;;  %2571 = vmatpush1.bf16.msra.mxu1 %v6165_v43  ;;  %v6084_v9 = vld [vmem:[#allocation8 + $0x110] ss:$8 sps:$4 sm:$0xff]   ;;  %v6173_v43 = vld [vmem:[#allocation10 + $0xe4] ss:$8 sps:$4 sm:$0xff]  }
 0x19a   :  { %2282 = vmatprep.subr.bf16.mxu0 %v6074_v10  ;;  %2572 = vmatprep.subr.bf16.mxu1 %v6170_v46  ;;  %v6089_v10 = vld [vmem:[#allocation8 + $0x124] ss:$8 sps:$4 sm:$0xff]   ;;  %v6171_v46 = vld [vmem:[#allocation10 + $0xe0] ss:$8 sps:$4 sm:$0xff]  }
 0x19d   :  { %2283 = vmatpush1.bf16.msra.mxu0 %v6072_v11  ;;  %2573 = vmatpush1.bf16.msra.mxu1 %v6168_v50  ;;  %v6087_v11 = vld [vmem:[#allocation8 + $0x120] ss:$8 sps:$4 sm:$0xff]   ;;  %v6174_v50 = vld [vmem:[#allocation10 + $0xf0] ss:$8 sps:$4 sm:$0xff]  }
 0x19e   :  { %2284 = vmatprep.subr.bf16.mxu0 %v6077_v12  ;;  %v6092_v12 = vld [vmem:[#allocation8 + $0x134] ss:$8 sps:$4 sm:$0xff]   ;;  %2574 = vmatprep.subr.bf16.mxu1 %v6173_v43  ;;  %v6237_v43 = vld [vmem:[#allocation11 + $0x140] ss:$16 sps:$4 sm:$0xff]  }
 0x1a1   :  { %2285 = vmatpush1.bf16.msra.mxu0 %v6075_v13  ;;  %v6090_v13 = vld [vmem:[#allocation8 + $0x130] ss:$8 sps:$4 sm:$0xff]   ;;  %2575 = vmatpush1.bf16.msra.mxu1 %v6171_v46 }
 0x1a2   :  { %2286 = vmatprep.subr.bf16.mxu0 %v6080_v14  ;;  %v6095_v14 = vld [vmem:[#allocation8 + $0x144] ss:$8 sps:$4 sm:$0xff]   ;;  %2576 = vmatprep.subr.bf16.mxu1 %v6176_v47  ;;  %v6240_v46 = vld [vmem:[#allocation11 + $0x148] ss:$16 sps:$4 sm:$0xff]  }
 0x1a3   :  { %v6245_v47 = vld [vmem:[#allocation11 + $0x164] ss:$16 sps:$4 sm:$0xff]  }
 0x1a5   :  { %2287 = vmatpush1.bf16.msra.mxu0 %v6078_v15  ;;  %v6093_v15 = vld [vmem:[#allocation8 + $0x140] ss:$8 sps:$4 sm:$0xff]   ;;  %2577 = vmatpush1.bf16.msra.mxu1 %v6174_v50  ;;  %v6248_v50 = vld [vmem:[#allocation11 + $0x16c] ss:$16 sps:$4 sm:$0xff]  }
 0x1a6   :  { %2297 = vmatprep.subr.bf16.mxu0 %v6083_v16  ;;  %v6098_v16 = vld [vmem:[#allocation8 + $0x154] ss:$8 sps:$4 sm:$0xff]  }
 0x23b   :  { %v1681_v54 = vpop.f32.mrb[0].mxu0  ;;  %v7065_v55 = vpop.f32.mrb[0].mxu1 }
 0x23c   :  { %v5625_v56 = vadd.f32 %v1681_v54, %v387_v51  ;;  %v1683_v57 = vpop.f32.mrb[1].mxu0  ;;  %v1847_v58 = vpop.f32.mrb[1].mxu1  ;;  %v5627_v37 = vadd.f32 %v7065_v55, %v395_v35  ;;  %v1924_v51 = vld [vmem:[%s7198_s5] sm:$0x3] }
 0x23d   :  { %v5626_v59 = vadd.f32 %v1683_v57, %v391_v52  ;;  %v5628_v60 = vadd.f32 %v1847_v58, %v399_v53  ;;  %v1685_v61 = vpop.f32.mrb[2].mxu0  ;;  %v1849_v62 = vpop.f32.mrb[2].mxu1  ;;  %v1929_v52 = vrot.slane %v1924_v51, %v7046_v45  ;;  %v1933_v53 = vrot.slane %v1924_v51, %v7054_v48  ;;  %v6225_v35 = vld [vmem:[#allocation11 + $0x100] ss:$16 sps:$4 sm:$0xff]  }
 0x23e   :  { %v1852_v63 = vmax.f32 %v5625_v56, 0.0  ;;  %v1686_v0 = vpop.f32.mrb[3].mxu0  ;;  %v1850_v1 = vpop.f32.mrb[3].mxu1  ;;  %v1854_v40 = vmax.f32 %v5627_v37, 0.0  ;;  %v6236_v37 = vld [vmem:[#allocation11 + $0x12c] ss:$16 sps:$4 sm:$0xff]  }
 0x23f   :  { %v1853_v2 = vmax.f32 %v5626_v59, 0.0  ;;  %v1855_v3 = vmax.f32 %v5628_v60, 0.0  ;;  %v6177_v0 = vld [vmem:[#allocation11] ss:$16 sps:$4 sm:$0xff]   ;;  %v6179_v1 = vld [vmem:[#allocation11 + $0x4] ss:$16 sps:$4 sm:$0xff]  }
 0x240   :  { %v1856_v6 = vpack.c.bf16 %v1852_v63, %v1852_v63  ;;  %v1858_v42 = vpack.c.bf16 %v1854_v40, %v1854_v40  ;;  %3057 = vmatprep.subr.bf16.mxu1 %v6179_v1  ;;  %v6239_v40 = vld [vmem:[#allocation11 + $0x144] ss:$16 sps:$4 sm:$0xff]   ;;  %v6243_v51 = vld [vmem:[#allocation11 + $0x160] ss:$16 sps:$4 sm:$0xff]  }
 0x241   :  { %v1857_v4 = vpack.c.bf16 %v1853_v2, %v1853_v2  ;;  %v1859_v8 = vpack.c.bf16 %v1855_v3, %v1855_v3  ;;  %v6180_v2 = vld [vmem:[#allocation11 + $0x8] ss:$16 sps:$4 sm:$0xff]   ;;  %v6182_v3 = vld [vmem:[#allocation11 + $0xc] ss:$16 sps:$4 sm:$0xff]  }
 0x243   :  { %2288 = vmatprep.mubr.bf16.mxu0 %v1857_v4  ;;  %v6185_v4 = vld [vmem:[#allocation11 + $0x24] ss:$16 sps:$4 sm:$0xff]  }
 0x244   :  { %2289 = vmatmul.mubr.bf16.vlgmr.msra.gmra.mrb[4].mxu0 %v1856_v6  ;;  %v6183_v6 = vld [vmem:[#allocation11 + $0x20] ss:$16 sps:$4 sm:$0xff]  }
 0x245   :  { %2298 = vmatpush1.bf16.msra.mxu0 %v6081_v5  ;;  %2329 = vmatprep.mubr.bf16.mxu0 %v1859_v8  ;;  %v6188_v5 = vld [vmem:[#allocation11 + $0x2c] ss:$16 sps:$4 sm:$0xff]   ;;  %v6191_v8 = vld [vmem:[#allocation11 + $0x44] ss:$16 sps:$4 sm:$0xff]  }
 0x246   :  { %2299 = vmatprep.subr.bf16.mxu0 %v6086_v7  ;;  %v6186_v7 = vld [vmem:[#allocation11 + $0x28] ss:$16 sps:$4 sm:$0xff]  }
 0x249   :  { %2300 = vmatpush1.bf16.msra.mxu0 %v6084_v9  ;;  %v6194_v9 = vld [vmem:[#allocation11 + $0x4c] ss:$16 sps:$4 sm:$0xff]  }
 0x24a   :  { %2301 = vmatprep.subr.bf16.mxu0 %v6089_v10  ;;  %v6189_v10 = vld [vmem:[#allocation11 + $0x40] ss:$16 sps:$4 sm:$0xff]  }
 0x24d   :  { %2302 = vmatpush1.bf16.msra.mxu0 %v6087_v11  ;;  %v6192_v11 = vld [vmem:[#allocation11 + $0x48] ss:$16 sps:$4 sm:$0xff]  }
 0x24e   :  { %2303 = vmatprep.subr.bf16.mxu0 %v6092_v12  ;;  %v6197_v12 = vld [vmem:[#allocation11 + $0x64] ss:$16 sps:$4 sm:$0xff]  }
 0x251   :  { %2304 = vmatpush1.bf16.msra.mxu0 %v6090_v13  ;;  %v6200_v13 = vld [vmem:[#allocation11 + $0x6c] ss:$16 sps:$4 sm:$0xff]  }
 0x252   :  { %2305 = vmatprep.subr.bf16.mxu0 %v6095_v14  ;;  %v6195_v14 = vld [vmem:[#allocation11 + $0x60] ss:$16 sps:$4 sm:$0xff]  }
 0x255   :  { %2306 = vmatpush1.bf16.msra.mxu0 %v6093_v15  ;;  %v6198_v15 = vld [vmem:[#allocation11 + $0x68] ss:$16 sps:$4 sm:$0xff]  }
 0x256   :  { %2307 = vmatprep.subr.bf16.mxu0 %v6098_v16  ;;  %v6203_v16 = vld [vmem:[#allocation11 + $0x84] ss:$16 sps:$4 sm:$0xff]  }
 0x259   :  { %2308 = vmatpush1.bf16.msra.mxu0 %v6096_v17  ;;  %v6206_v17 = vld [vmem:[#allocation11 + $0x8c] ss:$16 sps:$4 sm:$0xff]  }
 0x25a   :  { %2309 = vmatprep.subr.bf16.mxu0 %v6101_v18  ;;  %v6201_v18 = vld [vmem:[#allocation11 + $0x80] ss:$16 sps:$4 sm:$0xff]  }
 0x25d   :  { %2310 = vmatpush1.bf16.msra.mxu0 %v6099_v19  ;;  %v6204_v19 = vld [vmem:[#allocation11 + $0x88] ss:$16 sps:$4 sm:$0xff]  }
 0x25e   :  { %2311 = vmatprep.subr.bf16.mxu0 %v6104_v20  ;;  %v6209_v20 = vld [vmem:[#allocation11 + $0xa4] ss:$16 sps:$4 sm:$0xff]  }
 0x261   :  { %2312 = vmatpush1.bf16.msra.mxu0 %v6102_v21  ;;  %v6212_v21 = vld [vmem:[#allocation11 + $0xac] ss:$16 sps:$4 sm:$0xff]  }
 0x262   :  { %2313 = vmatprep.subr.bf16.mxu0 %v6107_v22  ;;  %v6207_v22 = vld [vmem:[#allocation11 + $0xa0] ss:$16 sps:$4 sm:$0xff]  }
 0x265   :  { %2314 = vmatpush1.bf16.msra.mxu0 %v6105_v23  ;;  %v6210_v23 = vld [vmem:[#allocation11 + $0xa8] ss:$16 sps:$4 sm:$0xff]  }
 0x266   :  { %2315 = vmatprep.subr.bf16.mxu0 %v6110_v24  ;;  %v6215_v24 = vld [vmem:[#allocation11 + $0xc4] ss:$16 sps:$4 sm:$0xff]  }
 0x269   :  { %2316 = vmatpush1.bf16.msra.mxu0 %v6108_v25  ;;  %v6218_v25 = vld [vmem:[#allocation11 + $0xcc] ss:$16 sps:$4 sm:$0xff]  }
 0x26a   :  { %2317 = vmatprep.subr.bf16.mxu0 %v6113_v26  ;;  %v6213_v26 = vld [vmem:[#allocation11 + $0xc0] ss:$16 sps:$4 sm:$0xff]  }
 0x26d   :  { %2318 = vmatpush1.bf16.msra.mxu0 %v6111_v27  ;;  %v6216_v27 = vld [vmem:[#allocation11 + $0xc8] ss:$16 sps:$4 sm:$0xff]  }
 0x26e   :  { %2319 = vmatprep.subr.bf16.mxu0 %v6116_v28  ;;  %v6221_v28 = vld [vmem:[#allocation11 + $0xe4] ss:$16 sps:$4 sm:$0xff]  }
 0x271   :  { %2320 = vmatpush1.bf16.msra.mxu0 %v6114_v29  ;;  %v6224_v29 = vld [vmem:[#allocation11 + $0xec] ss:$16 sps:$4 sm:$0xff]  }
 0x272   :  { %2321 = vmatprep.subr.bf16.mxu0 %v6119_v30  ;;  %v6219_v30 = vld [vmem:[#allocation11 + $0xe0] ss:$16 sps:$4 sm:$0xff]  }
 0x275   :  { %2322 = vmatpush1.bf16.msra.mxu0 %v6117_v31  ;;  %v6222_v31 = vld [vmem:[#allocation11 + $0xe8] ss:$16 sps:$4 sm:$0xff]  }
 0x276   :  { %2323 = vmatprep.subr.bf16.mxu0 %v6122_v33  ;;  %v6227_v33 = vld [vmem:[#allocation11 + $0x104] ss:$16 sps:$4 sm:$0xff]  }
 0x279   :  { %2324 = vmatpush1.bf16.msra.mxu0 %v6120_v34  ;;  %v6230_v34 = vld [vmem:[#allocation11 + $0x10c] ss:$16 sps:$4 sm:$0xff]  }
 0x27a   :  { %2325 = vmatprep.subr.bf16.mxu0 %v6125_v44  ;;  %v6228_v44 = vld [vmem:[#allocation11 + $0x108] ss:$16 sps:$4 sm:$0xff]  }
 0x27d   :  { %2326 = vmatpush1.bf16.msra.mxu0 %v6123_v36  ;;  %v6233_v36 = vld [vmem:[#allocation11 + $0x124] ss:$16 sps:$4 sm:$0xff]  }
 0x27e   :  { %2327 = vmatprep.subr.bf16.mxu0 %v6128_v38  ;;  %v6231_v38 = vld [vmem:[#allocation11 + $0x120] ss:$16 sps:$4 sm:$0xff]  }
 0x281   :  { %2328 = vmatpush1.bf16.msra.mxu0 %v6126_v39  ;;  %v6234_v39 = vld [vmem:[#allocation11 + $0x128] ss:$16 sps:$4 sm:$0xff]  }
 0x282   :  { %3098 = vmatprep.subr.bf16.mxu0 %v6182_v3 }
 0x284   :  { %2330 = vmatmul.mubr.bf16.vlgmr.msra.gmra.mrb[4].mxu0 %v1858_v42  ;;  %v6242_v42 = vld [vmem:[#allocation11 + $0x14c] ss:$16 sps:$4 sm:$0xff]  }
 0x285   :  { %3099 = vmatpush1.bf16.msra.mxu0 %v6180_v2 }
 0x286   :  { %3100 = vmatprep.subr.bf16.mxu0 %v6188_v5  ;;  %v6254_v5 = vld [vmem:[#allocation11 + $0x18c] ss:$16 sps:$4 sm:$0xff]  }
 0x289   :  { %3101 = vmatpush1.bf16.msra.mxu0 %v6186_v7  ;;  %v6252_v7 = vld [vmem:[#allocation11 + $0x188] ss:$16 sps:$4 sm:$0xff]  }
 0x28a   :  { %3102 = vmatprep.subr.bf16.mxu0 %v6194_v9  ;;  %v6255_v9 = vld [vmem:[#allocation11 + $0x1a0] ss:$16 sps:$4 sm:$0xff]  }
 0x28d   :  { %3103 = vmatpush1.bf16.msra.mxu0 %v6192_v11  ;;  %v6258_v11 = vld [vmem:[#allocation11 + $0x1a8] ss:$16 sps:$4 sm:$0xff]  }
 0x28e   :  { %3104 = vmatprep.subr.bf16.mxu0 %v6200_v13  ;;  %v6263_v13 = vld [vmem:[#allocation11 + $0x1c4] ss:$16 sps:$4 sm:$0xff]  }
 0x291   :  { %3105 = vmatpush1.bf16.msra.mxu0 %v6198_v15  ;;  %v6261_v15 = vld [vmem:[#allocation11 + $0x1c0] ss:$16 sps:$4 sm:$0xff]  }
 0x292   :  { %3106 = vmatprep.subr.bf16.mxu0 %v6206_v17  ;;  %v6269_v17 = vld [vmem:[#allocation11 + $0x1e4] ss:$16 sps:$4 sm:$0xff]  }
 0x295   :  { %3107 = vmatpush1.bf16.msra.mxu0 %v6204_v19  ;;  %v6267_v19 = vld [vmem:[#allocation11 + $0x1e0] ss:$16 sps:$4 sm:$0xff]  }
 0x296   :  { %3108 = vmatprep.subr.bf16.mxu0 %v6212_v21  ;;  %v6275_v21 = vld [vmem:[#allocation13 + $0x4] ss:$28 sps:$4 sm:$0xff]  }
 0x299   :  { %3109 = vmatpush1.bf16.msra.mxu0 %v6210_v23  ;;  %v2602_v23 = vld [vmem:[%s7201_s8] ss:$2 sm:$0x3] }
 0x29a   :  { %3110 = vmatprep.subr.bf16.mxu0 %v6218_v25 }
 0x29d   :  { %3111 = vmatpush1.bf16.msra.mxu0 %v6216_v27  ;;  %v2611_v27 = vrot.slane %v2602_v23, %v7054_v48 }
 0x29e   :  { %3112 = vmatprep.subr.bf16.mxu0 %v6224_v29 }
 0x2a1   :  { %3113 = vmatpush1.bf16.msra.mxu0 %v6222_v31 }
 0x2a2   :  { %3114 = vmatprep.subr.bf16.mxu0 %v6230_v34 }
 0x2a5   :  { %3115 = vmatpush1.bf16.msra.mxu0 %v6228_v44 }
 0x2a6   :  { %3116 = vmatprep.subr.bf16.mxu0 %v6236_v37 }
 0x2a9   :  { %3117 = vmatpush1.bf16.msra.mxu0 %v6234_v39 }
 0x2aa   :  { %3118 = vmatprep.subr.bf16.mxu0 %v6242_v42 }
 0x2ad   :  { %3119 = vmatpush1.bf16.msra.mxu0 %v6240_v46 }
 0x2ae   :  { %3120 = vmatprep.subr.bf16.mxu0 %v6248_v50 }
 0x357   :  { %v2331_v54 = vpop.f32.mrb[4].mxu0 }
 0x358   :  { %v5629_v55 = vadd.f32 %v2331_v54, %v1929_v52  ;;  %v2333_v56 = vpop.f32.mrb[5].mxu0  ;;  %v6246_v52 = vld [vmem:[#allocation11 + $0x168] ss:$16 sps:$4 sm:$0xff]  }
 0x359   :  { %v5630_v57 = vadd.f32 %v2333_v56, %v1933_v53  ;;  %v2335_v58 = vpop.f32.mrb[6].mxu0  ;;  %3121 = vmatpush1.bf16.msra.mxu0 %v6246_v52  ;;  %v2374_v53 = vld [vmem:[%s7200_s7] sm:$0x3]  ;;  %v6276_v52 = vld [vmem:[#allocation13 + $0x8] ss:$28 sps:$4 sm:$0xff]  }
 0x35a   :  { %v2338_v59 = vmax.f32 %v5629_v55, 0.0  ;;  %v2336_v60 = vpop.f32.mrb[7].mxu0  ;;  %v2379_v54 = vrot.slane %v2374_v53, %v7046_v45  ;;  %v2383_v55 = vrot.slane %v2374_v53, %v7054_v48  ;;  %3122 = vmatprep.subr.bf16.mxu0 %v6254_v5  ;;  %v6281_v53 = vld [vmem:[#allocation13 + $0x3c] ss:$28 sps:$4 sm:$0xff]  }
 0x35b   :  { %v2339_v61 = vmax.f32 %v5630_v57, 0.0  ;;  %v6305_v5 = vld [vmem:[#allocation13 + $0x11c] ss:$28 sps:$4 sm:$0xff]  }
 0x35c   :  { %v2340_v63 = vpack.c.bf16 %v2338_v59, %v2338_v59 }
 0x35d   :  { %v2341_v62 = vpack.c.bf16 %v2339_v61, %v2339_v61  ;;  %3123 = vmatpush1.bf16.msra.mxu0 %v6252_v7  ;;  %v6303_v7 = vld [vmem:[#allocation13 + $0x118] ss:$28 sps:$4 sm:$0xff]  }
 0x35f   :  { %2578 = vmatprep.mubr.bf16.mxu1 %v2341_v62 }
 0x360   :  { %2579 = vmatmul.mubr.bf16.vlgmr.msra.gmra.mrb[4].mxu1 %v2340_v63 }
 0x361   :  { %3058 = vmatpush1.bf16.msra.mxu1 %v6177_v0  ;;  %v2587_v0 = vld [vmem:[#allocation5] sm:$0xff] }
 0x362   :  { %3059 = vmatprep.subr.bf16.mxu1 %v6185_v4  ;;  %v6251_v4 = vld [vmem:[#allocation11 + $0x184] ss:$16 sps:$4 sm:$0xff]  }
 0x365   :  { %3060 = vmatpush1.bf16.msra.mxu1 %v6183_v6  ;;  %v6249_v6 = vld [vmem:[#allocation11 + $0x180] ss:$16 sps:$4 sm:$0xff]  }
 0x366   :  { %3061 = vmatprep.subr.bf16.mxu1 %v6191_v8  ;;  %v6257_v8 = vld [vmem:[#allocation11 + $0x1a4] ss:$16 sps:$4 sm:$0xff]  }
 0x369   :  { %3062 = vmatpush1.bf16.msra.mxu1 %v6189_v10  ;;  %v6260_v10 = vld [vmem:[#allocation11 + $0x1ac] ss:$16 sps:$4 sm:$0xff]  }
 0x36a   :  { %3063 = vmatprep.subr.bf16.mxu1 %v6197_v12  ;;  %3124 = vmatprep.subr.bf16.mxu0 %v6260_v10  ;;  %v6841_v12 = vmov 1   ;;  %v6314_v10 = vld [vmem:[#allocation13 + $0x15c] ss:$28 sps:$4 sm:$0xff]  }
 0x36b   :  { %3125 = vmatpush1.bf16.msra.mxu0 %v6258_v11  ;;  %v6309_v11 = vld [vmem:[#allocation13 + $0x150] ss:$28 sps:$4 sm:$0xff]  }
 0x36d   :  { %3064 = vmatpush1.bf16.msra.mxu1 %v6195_v14  ;;  %v6266_v14 = vld [vmem:[#allocation11 + $0x1cc] ss:$16 sps:$4 sm:$0xff]  }
 0x36e   :  { %3065 = vmatprep.subr.bf16.mxu1 %v6203_v16  ;;  %v6264_v16 = vld [vmem:[#allocation11 + $0x1c8] ss:$16 sps:$4 sm:$0xff]   ;;  %3126 = vmatprep.subr.bf16.mxu0 %v6266_v14  ;;  %v6320_v14 = vld [vmem:[#allocation13 + $0x194] ss:$28 sps:$4 sm:$0xff]  }
 0x36f   :  { %3127 = vmatpush1.bf16.msra.mxu0 %v6264_v16  ;;  %v6318_v16 = vld [vmem:[#allocation13 + $0x190] ss:$28 sps:$4 sm:$0xff]  }
 0x371   :  { %3066 = vmatpush1.bf16.msra.mxu1 %v6201_v18  ;;  %v6272_v18 = vld [vmem:[#allocation11 + $0x1ec] ss:$16 sps:$4 sm:$0xff]  }
 0x372   :  { %3067 = vmatprep.subr.bf16.mxu1 %v6209_v20  ;;  %v6270_v20 = vld [vmem:[#allocation11 + $0x1e8] ss:$16 sps:$4 sm:$0xff]   ;;  %3128 = vmatprep.subr.bf16.mxu0 %v6272_v18 }
 0x373   :  { %3129 = vmatpush1.bf16.msra.mxu0 %v6270_v20  ;;  %v6326_v18 = vld [vmem:[#allocation13 + $0x1cc] ss:$28 sps:$4 sm:$0xff]  }
 0x374   :  { %v6324_v20 = vld [vmem:[#allocation13 + $0x1c8] ss:$28 sps:$4 sm:$0xff]  }
 0x375   :  { %3068 = vmatpush1.bf16.msra.mxu1 %v6207_v22  ;;  %v6278_v22 = vld [vmem:[#allocation13 + $0xc] ss:$28 sps:$4 sm:$0xff]  }
 0x376   :  { %3069 = vmatprep.subr.bf16.mxu1 %v6215_v24  ;;  %4674 = vmatprep.subr.bf16.mxu0 %v6278_v22  ;;  %v5292_v24 = vld [vmem:[%s7201_s8 + $0x1] ss:$2 sm:$0x3] }
 0x377   :  { %v2626_v29 = vrot.slane %v5292_v24, %v7054_v48  ;;  %v6332_v22 = vld [vmem:[#allocation13 + $0x204] ss:$28 sps:$4 sm:$0xff]  }
 0x379   :  { %3070 = vmatpush1.bf16.msra.mxu1 %v6213_v26  ;;  %v2607_v26 = vrot.slane %v2602_v23, %v7046_v45  ;;  %v6327_v23 = vld [vmem:[#allocation13 + $0x1f8] ss:$28 sps:$4 sm:$0xff]  }
 0x37a   :  { %3071 = vmatprep.subr.bf16.mxu1 %v6221_v28  ;;  %v2622_v28 = vrot.slane %v5292_v24, %v7046_v45  ;;  %v6330_v24 = vld [vmem:[#allocation13 + $0x200] ss:$28 sps:$4 sm:$0xff]  }
 0x37d   :  { %3072 = vmatpush1.bf16.msra.mxu1 %v6219_v30  ;;  %v2633_v30 = vld [vmem:[%s7202_s9] sm:$0x3] }
 0x37e   :  { %3073 = vmatprep.subr.bf16.mxu1 %v6227_v33  ;;  %v2638_v31 = vrot.slane %v2633_v30, %v7046_v45  ;;  %v2642_v33 = vrot.slane %v2633_v30, %v7054_v48  ;;  %v6344_v30 = vld [vmem:[#allocation13 + $0x274] ss:$28 sps:$4 sm:$0xff]  }
 0x381   :  { %3074 = vmatpush1.bf16.msra.mxu1 %v6225_v35 }
 0x382   :  { %3075 = vmatprep.subr.bf16.mxu1 %v6233_v36 }
 0x385   :  { %3076 = vmatpush1.bf16.msra.mxu1 %v6231_v38 }
 0x386   :  { %3077 = vmatprep.subr.bf16.mxu1 %v6239_v40 }
 0x389   :  { %3078 = vmatpush1.bf16.msra.mxu1 %v6237_v43 }
 0x38a   :  { %3079 = vmatprep.subr.bf16.mxu1 %v6245_v47 }
 0x38d   :  { %3080 = vmatpush1.bf16.msra.mxu1 %v6243_v51  ;;  %v6273_v51 = vld [vmem:[#allocation13] ss:$28 sps:$4 sm:$0xff]  }
 0x38e   :  { %3081 = vmatprep.subr.bf16.mxu1 %v6251_v4  ;;  %v6300_v4 = vld [vmem:[#allocation13 + $0xe8] ss:$28 sps:$4 sm:$0xff]  }
 0x391   :  { %3082 = vmatpush1.bf16.msra.mxu1 %v6249_v6  ;;  %v6308_v6 = vld [vmem:[#allocation13 + $0x124] ss:$28 sps:$4 sm:$0xff]  }
 0x392   :  { %3083 = vmatprep.subr.bf16.mxu1 %v6257_v8  ;;  %v6306_v8 = vld [vmem:[#allocation13 + $0x120] ss:$28 sps:$4 sm:$0xff]  }
 0x395   :  { %3084 = vmatpush1.bf16.msra.mxu1 %v6255_v9  ;;  %v6311_v9 = vld [vmem:[#allocation13 + $0x154] ss:$28 sps:$4 sm:$0xff]  }
 0x396   :  { %3085 = vmatprep.subr.bf16.mxu1 %v6263_v13  ;;  %v6317_v13 = vld [vmem:[#allocation13 + $0x18c] ss:$28 sps:$4 sm:$0xff]  }
 0x399   :  { %3086 = vmatpush1.bf16.msra.mxu1 %v6261_v15  ;;  %v6315_v15 = vld [vmem:[#allocation13 + $0x188] ss:$28 sps:$4 sm:$0xff]  }
 0x39a   :  { %3087 = vmatprep.subr.bf16.mxu1 %v6269_v17  ;;  %v6323_v17 = vld [vmem:[#allocation13 + $0x1c4] ss:$28 sps:$4 sm:$0xff]  }
 0x39d   :  { %3088 = vmatpush1.bf16.msra.mxu1 %v6267_v19  ;;  %v6321_v19 = vld [vmem:[#allocation13 + $0x1c0] ss:$28 sps:$4 sm:$0xff]  }
 0x39e   :  { %4592 = vmatprep.subr.bf16.mxu1 %v6275_v21  ;;  %v6329_v21 = vld [vmem:[#allocation13 + $0x1fc] ss:$28 sps:$4 sm:$0xff]  }
 0x433   :  { %v2580_v56 = vpop.f32.mrb[4].mxu1 }
 0x434   :  { %v2581_v57 = vadd.f32 %v2580_v56, %v2379_v54  ;;  %v2582_v58 = vpop.f32.mrb[5].mxu1  ;;  %v6284_v54 = vld [vmem:[#allocation13 + $0x44] ss:$28 sps:$4 sm:$0xff]  }
 0x435   :  { %v2583_v59 = vadd.f32 %v2582_v58, %v2383_v55  ;;  %v2584_v60 = vpop.f32.mrb[6].mxu1  ;;  %v6279_v55 = vld [vmem:[#allocation13 + $0x38] ss:$28 sps:$4 sm:$0xff]   ;;  %v6282_v56 = vld [vmem:[#allocation13 + $0x40] ss:$28 sps:$4 sm:$0xff]  }
 0x436   :  { %4925 = vst [vmem:[#allocation15] sm:$0xff] %v2581_v57  ;;  %v2585_v61 = vpop.f32.mrb[7].mxu1  ;;  %v6290_v58 = vld [vmem:[#allocation13 + $0x7c] ss:$28 sps:$4 sm:$0xff]  }
 0x437   :  { %v2588_v62 = vmul.f32 0.5, %v2583_v59  ;;  %4926 = vst [vmem:[#allocation17] sm:$0xff] %v2583_v59  ;;  %v6285_v59 = vld [vmem:[#allocation13 + $0x70] ss:$28 sps:$4 sm:$0xff]   ;;  %v6288_v60 = vld [vmem:[#allocation13 + $0x78] ss:$28 sps:$4 sm:$0xff]  }
 0x438   :  { %v6293_v61 = vld [vmem:[#allocation13 + $0xac] ss:$28 sps:$4 sm:$0xff]  }
 0x439   :  { %v2589_v63 = vmul.f32 1.442695, %v2588_v62  ;;  %v6296_v62 = vld [vmem:[#allocation13 + $0xb4] ss:$28 sps:$4 sm:$0xff]  }
 0x43b   :  { %6593 = vpow2.f32 %v2589_v63  ;;  %v6291_v63 = vld [vmem:[#allocation13 + $0xa8] ss:$28 sps:$4 sm:$0xff]  }
 0x445   :  { %v6594_v1 = vpop.eup %6593 }
 0x446   :  { %v2591_v2 = vmul.f32 %v6594_v1, %v2587_v0  ;;  %v6294_v0 = vld [vmem:[#allocation13 + $0xb0] ss:$28 sps:$4 sm:$0xff]   ;;  %v6299_v1 = vld [vmem:[#allocation13 + $0xe4] ss:$28 sps:$4 sm:$0xff]  }
 0x448   :  { %v2592_v3 = vadd.f32 %v2591_v2, %v2581_v57  ;;  %v6287_v57 = vld [vmem:[#allocation13 + $0x74] ss:$28 sps:$4 sm:$0xff]   ;;  %v6302_v2 = vld [vmem:[#allocation13 + $0xec] ss:$28 sps:$4 sm:$0xff]  }
 0x44a   :  { %2595 = vperm.xlu0 %5695, %v2592_v3  }
 0x44e   :  { %5696 = vset.pattern.permute.xlu0 %v6841_v12  ;;  %v6312_v12 = vld [vmem:[#allocation13 + $0x158] ss:$28 sps:$4 sm:$0xff]  }
 0x44f   :  { %2599 = vperm.xlu0 %5696, %v2592_v3   ;;  %v6297_v3 = vld [vmem:[#allocation13 + $0xe0] ss:$28 sps:$4 sm:$0xff]  }
 0x4c9   :  { %v2596_v25 = vpop.permute.xlu0 %2595 }
 0x4ca   :  { %v2614_v35 = vmul.f32 %v2607_v26, %v2596_v25  ;;  %v2615_v44 = vmul.f32 %v2611_v27, %v2596_v25  ;;  %v6335_v25 = vld [vmem:[#allocation13 + $0x234] ss:$28 sps:$4 sm:$0xff]   ;;  %v6338_v26 = vld [vmem:[#allocation13 + $0x23c] ss:$28 sps:$4 sm:$0xff]  }
 0x4cb   :  { %v6333_v27 = vld [vmem:[#allocation13 + $0x230] ss:$28 sps:$4 sm:$0xff]  }
 0x4ce   :  { %v2600_v34 = vpop.permute.xlu0 %2599 }
 0x4cf   :  { %v2629_v36 = vmul.f32 %v2622_v28, %v2600_v34  ;;  %v2630_v37 = vmul.f32 %v2626_v29, %v2600_v34  ;;  %v6336_v28 = vld [vmem:[#allocation13 + $0x238] ss:$28 sps:$4 sm:$0xff]   ;;  %v6341_v29 = vld [vmem:[#allocation13 + $0x26c] ss:$28 sps:$4 sm:$0xff]   ;;  %v6347_v34 = vld [vmem:[#allocation13 + $0x2a4] ss:$28 sps:$4 sm:$0xff]  }
 0x4d1   :  { %v2631_v38 = vadd.f32 %v2629_v36, %v2614_v35  ;;  %v2632_v39 = vadd.f32 %v2630_v37, %v2615_v44  ;;  %v6350_v35 = vld [vmem:[#allocation13 + $0x2ac] ss:$28 sps:$4 sm:$0xff]   ;;  %v6345_v44 = vld [vmem:[#allocation13 + $0x2a0] ss:$28 sps:$4 sm:$0xff]  }
 0x4d2   :  { %v6348_v36 = vld [vmem:[#allocation13 + $0x2a8] ss:$28 sps:$4 sm:$0xff]   ;;  %v6353_v37 = vld [vmem:[#allocation13 + $0x2dc] ss:$28 sps:$4 sm:$0xff]  }
 0x4d3   :  { %v2645_v40 = vadd.f32 %v2638_v31, %v2631_v38  ;;  %v2646_v42 = vadd.f32 %v2642_v33, %v2632_v39  ;;  %v6339_v31 = vld [vmem:[#allocation13 + $0x268] ss:$28 sps:$4 sm:$0xff]   ;;  %v6342_v33 = vld [vmem:[#allocation13 + $0x270] ss:$28 sps:$4 sm:$0xff]   ;;  %v6351_v39 = vld [vmem:[#allocation13 + $0x2d8] ss:$28 sps:$4 sm:$0xff]  }
 0x4d4   :  { %v6356_v38 = vld [vmem:[#allocation13 + $0x2e4] ss:$28 sps:$4 sm:$0xff]  }
 0x4d5   :  { %v2647_v43 = vmax.f32 %v2645_v40, 0.0  ;;  %v2648_v46 = vmax.f32 %v2646_v42, 0.0  ;;  %v6354_v40 = vld [vmem:[#allocation13 + $0x2e0] ss:$28 sps:$4 sm:$0xff]   ;;  %v6359_v42 = vld [vmem:[#allocation13 + $0x314] ss:$28 sps:$4 sm:$0xff]  }
 0x4d7   :  { %v2649_v47 = vpack.c.bf16 %v2647_v43, %v2647_v43  ;;  %v2650_v50 = vpack.c.bf16 %v2648_v46, %v2648_v46  ;;  %v6362_v43 = vld [vmem:[#allocation13 + $0x31c] ss:$28 sps:$4 sm:$0xff]   ;;  %v6357_v46 = vld [vmem:[#allocation13 + $0x310] ss:$28 sps:$4 sm:$0xff]  }
 0x4d9   :  { %3089 = vmatprep.mubr.bf16.mxu1 %v2650_v50  ;;  %3130 = vmatprep.mubr.bf16.mxu0 %v2650_v50  ;;  %v6365_v50 = vld [vmem:[#allocation13 + $0x34c] ss:$28 sps:$4 sm:$0xff]  }
 0x4da   :  { %3090 = vmatmul.mubr.bf16.vlgmr.msra.gmra.mrb[8].mxu1 %v2649_v47  ;;  %3131 = vmatmul.mubr.bf16.vlgmr.msra.gmra.mrb[8].mxu0 %v2649_v47  ;;  %v6360_v47 = vld [vmem:[#allocation13 + $0x318] ss:$28 sps:$4 sm:$0xff]  }
 0x4db   :  { %4593 = vmatpush1.bf16.msra.mxu1 %v6273_v51  ;;  %4675 = vmatpush1.bf16.msra.mxu0 %v6276_v52  ;;  %v6368_v51 = vld [vmem:[#allocation13 + $0x354] ss:$28 sps:$4 sm:$0xff]   ;;  %v6363_v52 = vld [vmem:[#allocation13 + $0x348] ss:$28 sps:$4 sm:$0xff]  }
 0x4dc   :  { %4594 = vmatprep.subr.bf16.mxu1 %v6281_v53  ;;  %4676 = vmatprep.subr.bf16.mxu0 %v6284_v54  ;;  %v6366_v53 = vld [vmem:[#allocation13 + $0x350] ss:$28 sps:$4 sm:$0xff]   ;;  %v6371_v54 = vld [vmem:[#allocation13 + $0x384] ss:$28 sps:$4 sm:$0xff]  }
 0x4df   :  { %4595 = vmatpush1.bf16.msra.mxu1 %v6279_v55  ;;  %4677 = vmatpush1.bf16.msra.mxu0 %v6282_v56  ;;  %v6374_v55 = vld [vmem:[#allocation13 + $0x38c] ss:$28 sps:$4 sm:$0xff]   ;;  %v7101_v56 = vld [vmem:[%s7204_s11] sm:$0xf] }
 0x4e0   :  { %4596 = vmatprep.subr.bf16.mxu1 %v6287_v57  ;;  %4678 = vmatprep.subr.bf16.mxu0 %v6290_v58  ;;  %v2720_v57 = vrot.slane %v7101_v56, %v7046_v45  ;;  %v2724_v58 = vrot.slane %v7101_v56, %v7054_v48 }
 0x4e3   :  { %4597 = vmatpush1.bf16.msra.mxu1 %v6285_v59  ;;  %4679 = vmatpush1.bf16.msra.mxu0 %v6288_v60  ;;  %v2732_v59 = vrot.slane %v7101_v56, %v7057_v49 }
 0x4e4   :  { %4598 = vmatprep.subr.bf16.mxu1 %v6293_v61  ;;  %4680 = vmatprep.subr.bf16.mxu0 %v6296_v62 }
 0x4e7   :  { %4599 = vmatpush1.bf16.msra.mxu1 %v6291_v63  ;;  %4681 = vmatpush1.bf16.msra.mxu0 %v6294_v0 }
 0x4e8   :  { %4600 = vmatprep.subr.bf16.mxu1 %v6299_v1  ;;  %4682 = vmatprep.subr.bf16.mxu0 %v6302_v2 }
 0x4eb   :  { %4601 = vmatpush1.bf16.msra.mxu1 %v6297_v3  ;;  %4683 = vmatpush1.bf16.msra.mxu0 %v6300_v4 }
 0x4ec   :  { %4602 = vmatprep.subr.bf16.mxu1 %v6305_v5  ;;  %4684 = vmatprep.subr.bf16.mxu0 %v6308_v6 }
 0x4ef   :  { %4603 = vmatpush1.bf16.msra.mxu1 %v6303_v7  ;;  %4685 = vmatpush1.bf16.msra.mxu0 %v6306_v8 }
 0x4f0   :  { %4604 = vmatprep.subr.bf16.mxu1 %v6311_v9  ;;  %4686 = vmatprep.subr.bf16.mxu0 %v6314_v10 }
 0x4f3   :  { %4605 = vmatpush1.bf16.msra.mxu1 %v6309_v11  ;;  %4687 = vmatpush1.bf16.msra.mxu0 %v6312_v12  ;;  %v6369_v11 = vld [vmem:[#allocation13 + $0x380] ss:$28 sps:$4 sm:$0xff]   ;;  %v6372_v12 = vld [vmem:[#allocation13 + $0x388] ss:$28 sps:$4 sm:$0xff]  }
 0x4f4   :  { %4606 = vmatprep.subr.bf16.mxu1 %v6317_v13  ;;  %4688 = vmatprep.subr.bf16.mxu0 %v6320_v14  ;;  %v6377_v14 = vld [vmem:[#allocation13 + $0x3bc] ss:$28 sps:$4 sm:$0xff]  }
 0x4f7   :  { %4607 = vmatpush1.bf16.msra.mxu1 %v6315_v15  ;;  %4689 = vmatpush1.bf16.msra.mxu0 %v6318_v16  ;;  %v6380_v15 = vld [vmem:[#allocation13 + $0x3c4] ss:$28 sps:$4 sm:$0xff]  }
 0x4f8   :  { %4608 = vmatprep.subr.bf16.mxu1 %v6323_v17  ;;  %4690 = vmatprep.subr.bf16.mxu0 %v6326_v18  ;;  %v6375_v17 = vld [vmem:[#allocation13 + $0x3b8] ss:$28 sps:$4 sm:$0xff]   ;;  %v6378_v18 = vld [vmem:[#allocation13 + $0x3c0] ss:$28 sps:$4 sm:$0xff]  }
 0x4fb   :  { %4609 = vmatpush1.bf16.msra.mxu1 %v6321_v19  ;;  %4691 = vmatpush1.bf16.msra.mxu0 %v6324_v20  ;;  %v6383_v19 = vld [vmem:[#allocation13 + $0x3f4] ss:$28 sps:$4 sm:$0xff]   ;;  %v6386_v20 = vld [vmem:[#allocation13 + $0x3fc] ss:$28 sps:$4 sm:$0xff]  }
 0x4fc   :  { %4610 = vmatprep.subr.bf16.mxu1 %v6329_v21  ;;  %4692 = vmatprep.subr.bf16.mxu0 %v6332_v22  ;;  %v6381_v21 = vld [vmem:[#allocation13 + $0x3f0] ss:$28 sps:$4 sm:$0xff]   ;;  %v6384_v22 = vld [vmem:[#allocation13 + $0x3f8] ss:$28 sps:$4 sm:$0xff]  }
 0x4ff   :  { %4611 = vmatpush1.bf16.msra.mxu1 %v6327_v23  ;;  %4693 = vmatpush1.bf16.msra.mxu0 %v6330_v24  ;;  %v6389_v23 = vld [vmem:[#allocation13 + $0x42c] ss:$28 sps:$4 sm:$0xff]   ;;  %v6392_v24 = vld [vmem:[#allocation13 + $0x434] ss:$28 sps:$4 sm:$0xff]  }
 0x500   :  { %4612 = vmatprep.subr.bf16.mxu1 %v6335_v25  ;;  %4694 = vmatprep.subr.bf16.mxu0 %v6338_v26  ;;  %v6387_v25 = vld [vmem:[#allocation13 + $0x428] ss:$28 sps:$4 sm:$0xff]   ;;  %v6390_v26 = vld [vmem:[#allocation13 + $0x430] ss:$28 sps:$4 sm:$0xff]  }
 0x503   :  { %4613 = vmatpush1.bf16.msra.mxu1 %v6333_v27  ;;  %4695 = vmatpush1.bf16.msra.mxu0 %v6336_v28  ;;  %v6395_v27 = vld [vmem:[#allocation13 + $0x464] ss:$28 sps:$4 sm:$0xff]   ;;  %v6398_v28 = vld [vmem:[#allocation13 + $0x46c] ss:$28 sps:$4 sm:$0xff]  }
 0x504   :  { %4614 = vmatprep.subr.bf16.mxu1 %v6341_v29  ;;  %4696 = vmatprep.subr.bf16.mxu0 %v6344_v30  ;;  %v6393_v29 = vld [vmem:[#allocation13 + $0x460] ss:$28 sps:$4 sm:$0xff]   ;;  %v6396_v30 = vld [vmem:[#allocation13 + $0x468] ss:$28 sps:$4 sm:$0xff]  }
 0x507   :  { %4615 = vmatpush1.bf16.msra.mxu1 %v6339_v31  ;;  %4697 = vmatpush1.bf16.msra.mxu0 %v6342_v33  ;;  %v6401_v31 = vld [vmem:[#allocation13 + $0x49c] ss:$28 sps:$4 sm:$0xff]   ;;  %v6404_v33 = vld [vmem:[#allocation13 + $0x4a4] ss:$28 sps:$4 sm:$0xff]  }
 0x508   :  { %4616 = vmatprep.subr.bf16.mxu1 %v6347_v34  ;;  %4698 = vmatprep.subr.bf16.mxu0 %v6350_v35  ;;  %v6399_v34 = vld [vmem:[#allocation13 + $0x498] ss:$28 sps:$4 sm:$0xff]   ;;  %v6402_v35 = vld [vmem:[#allocation13 + $0x4a0] ss:$28 sps:$4 sm:$0xff]  }
 0x50b   :  { %4617 = vmatpush1.bf16.msra.mxu1 %v6345_v44  ;;  %4699 = vmatpush1.bf16.msra.mxu0 %v6348_v36  ;;  %v6407_v44 = vld [vmem:[#allocation13 + $0x4d4] ss:$28 sps:$4 sm:$0xff]   ;;  %v6410_v36 = vld [vmem:[#allocation13 + $0x4dc] ss:$28 sps:$4 sm:$0xff]  }
 0x50c   :  { %4618 = vmatprep.subr.bf16.mxu1 %v6353_v37  ;;  %4700 = vmatprep.subr.bf16.mxu0 %v6356_v38  ;;  %v6405_v37 = vld [vmem:[#allocation13 + $0x4d0] ss:$28 sps:$4 sm:$0xff]   ;;  %v6408_v38 = vld [vmem:[#allocation13 + $0x4d8] ss:$28 sps:$4 sm:$0xff]  }
 0x50f   :  { %4619 = vmatpush1.bf16.msra.mxu1 %v6351_v39  ;;  %4701 = vmatpush1.bf16.msra.mxu0 %v6354_v40  ;;  %v6413_v39 = vld [vmem:[#allocation13 + $0x50c] ss:$28 sps:$4 sm:$0xff]   ;;  %v6416_v40 = vld [vmem:[#allocation13 + $0x514] ss:$28 sps:$4 sm:$0xff]  }
 0x510   :  { %4620 = vmatprep.subr.bf16.mxu1 %v6359_v42  ;;  %4702 = vmatprep.subr.bf16.mxu0 %v6362_v43  ;;  %v6411_v42 = vld [vmem:[#allocation13 + $0x508] ss:$28 sps:$4 sm:$0xff]   ;;  %v6414_v43 = vld [vmem:[#allocation13 + $0x510] ss:$28 sps:$4 sm:$0xff]  }
 0x513   :  { %4621 = vmatpush1.bf16.msra.mxu1 %v6357_v46  ;;  %4703 = vmatpush1.bf16.msra.mxu0 %v6360_v47  ;;  %v6419_v46 = vld [vmem:[#allocation13 + $0x544] ss:$28 sps:$4 sm:$0xff]   ;;  %v6422_v47 = vld [vmem:[#allocation13 + $0x54c] ss:$28 sps:$4 sm:$0xff]  }
 0x514   :  { %4622 = vmatprep.subr.bf16.mxu1 %v6365_v50  ;;  %4704 = vmatprep.subr.bf16.mxu0 %v6368_v51  ;;  %v6417_v50 = vld [vmem:[#allocation13 + $0x540] ss:$28 sps:$4 sm:$0xff]   ;;  %v6420_v51 = vld [vmem:[#allocation13 + $0x548] ss:$28 sps:$4 sm:$0xff]  }
 0x517   :  { %4623 = vmatpush1.bf16.msra.mxu1 %v6363_v52  ;;  %4705 = vmatpush1.bf16.msra.mxu0 %v6366_v53  ;;  %v6425_v52 = vld [vmem:[#allocation13 + $0x57c] ss:$28 sps:$4 sm:$0xff]   ;;  %v6428_v53 = vld [vmem:[#allocation13 + $0x584] ss:$28 sps:$4 sm:$0xff]  }
 0x518   :  { %4633 = vmatprep.subr.bf16.mxu1 %v6371_v54  ;;  %4715 = vmatprep.subr.bf16.mxu0 %v6374_v55  ;;  %v6423_v54 = vld [vmem:[#allocation13 + $0x578] ss:$28 sps:$4 sm:$0xff]   ;;  %v6426_v55 = vld [vmem:[#allocation13 + $0x580] ss:$28 sps:$4 sm:$0xff]  }
 0x5ad   :  { %v3091_v60 = vpop.f32.mrb[8].mxu1  ;;  %v7109_v61 = vpop.f32.mrb[8].mxu0 }
 0x5ae   :  { %v3092_v62 = vadd.f32 %v3091_v60, %v2720_v57  ;;  %v3093_v63 = vpop.f32.mrb[9].mxu1  ;;  %v3134_v0 = vpop.f32.mrb[9].mxu0  ;;  %v6431_v57 = vld [vmem:[#allocation13 + $0x5b4] ss:$28 sps:$4 sm:$0xff]  }
 0x5af   :  { %v3094_v1 = vadd.f32 %v3093_v63, %v2724_v58  ;;  %v3135_v2 = vadd.f32 %v3134_v0, %v2732_v59  ;;  %v3095_v3 = vpop.f32.mrb[10].mxu1  ;;  %v3136_v4 = vpop.f32.mrb[10].mxu0  ;;  %v6434_v58 = vld [vmem:[#allocation13 + $0x5bc] ss:$28 sps:$4 sm:$0xff]   ;;  %v6429_v59 = vld [vmem:[#allocation13 + $0x5b0] ss:$28 sps:$4 sm:$0xff]  }
 0x5b0   :  { %v3139_v5 = vmax.f32 %v3092_v62, 0.0  ;;  %v3096_v6 = vpop.f32.mrb[11].mxu1  ;;  %v3137_v7 = vpop.f32.mrb[11].mxu0  ;;  %v6432_v60 = vld [vmem:[#allocation13 + $0x5b8] ss:$28 sps:$4 sm:$0xff]  }
 0x5b1   :  { %v3140_v8 = vmax.f32 %v3094_v1, 0.0  ;;  %v3142_v9 = vmax.f32 %v3135_v2, 0.0  ;;  %v6437_v62 = vld [vmem:[#allocation13 + $0x5ec] ss:$28 sps:$4 sm:$0xff]   ;;  %v6440_v63 = vld [vmem:[#allocation13 + $0x5f4] ss:$28 sps:$4 sm:$0xff]  }
 0x5b2   :  { %v7113_v13 = vpack.c.bf16 %v3139_v5, %v3139_v5  ;;  %v6435_v0 = vld [vmem:[#allocation13 + $0x5e8] ss:$28 sps:$4 sm:$0xff]   ;;  %v6438_v1 = vld [vmem:[#allocation13 + $0x5f0] ss:$28 sps:$4 sm:$0xff]   ;;  %v6441_v4 = vld [vmem:[#allocation13 + $0x620] ss:$28 sps:$4 sm:$0xff]  }
 0x5b3   :  { %v7111_v10 = vpack.c.bf16 %v3140_v8, %v3140_v8  ;;  %v7117_v16 = vpack.c.bf16 %v3142_v9, %v3142_v9  ;;  %v6443_v2 = vld [vmem:[#allocation13 + $0x624] ss:$28 sps:$4 sm:$0xff]   ;;  %v6446_v3 = vld [vmem:[#allocation13 + $0x62c] ss:$28 sps:$4 sm:$0xff]   ;;  %v6449_v6 = vld [vmem:[#allocation13 + $0x65c] ss:$28 sps:$4 sm:$0xff]  }
 0x5b4   :  { %v6444_v5 = vld [vmem:[#allocation13 + $0x628] ss:$28 sps:$4 sm:$0xff]   ;;  %v6447_v8 = vld [vmem:[#allocation13 + $0x658] ss:$28 sps:$4 sm:$0xff]   ;;  %v6450_v9 = vld [vmem:[#allocation13 + $0x660] ss:$28 sps:$4 sm:$0xff]  }
 0x5b5   :  { %4624 = vmatprep.mubr.bf16.mxu1 %v7111_v10  ;;  %4706 = vmatprep.mubr.bf16.mxu0 %v7111_v10  ;;  %v6452_v7 = vld [vmem:[#allocation13 + $0x664] ss:$28 sps:$4 sm:$0xff]  }
 0x5b6   :  { %4625 = vmatmul.mubr.bf16.vlgmr.msra.gmra.mrb[12].mxu1 %v7113_v13  ;;  %4707 = vmatmul.mubr.bf16.vlgmr.msra.gmra.mrb[12].mxu0 %v7113_v13 }
 0x5b7   :  { %4634 = vmatpush1.bf16.msra.mxu1 %v6369_v11  ;;  %4716 = vmatpush1.bf16.msra.mxu0 %v6372_v12  ;;  %v2728_v11 = vrot.slane %v7101_v56, %v7068_v32  ;;  %v6455_v12 = vld [vmem:[#allocation13 + $0x694] ss:$28 sps:$4 sm:$0xff]  }
 0x5b8   :  { %4665 = vmatprep.mubr.bf16.mxu1 %v7117_v16  ;;  %4747 = vmatprep.mubr.bf16.mxu0 %v7117_v16  ;;  %v6467_v56 = vld [vmem:[#allocation13 + $0x14] ss:$28 sps:$4 sm:$0xff]  }
 0x5b9   :  { %4635 = vmatprep.subr.bf16.mxu1 %v6377_v14  ;;  %4717 = vmatprep.subr.bf16.mxu0 %v6380_v15  ;;  %v6458_v14 = vld [vmem:[#allocation13 + $0x69c] ss:$28 sps:$4 sm:$0xff]   ;;  %v6453_v15 = vld [vmem:[#allocation13 + $0x690] ss:$28 sps:$4 sm:$0xff]  }
 0x5bb   :  { %4636 = vmatpush1.bf16.msra.mxu1 %v6375_v17  ;;  %4718 = vmatpush1.bf16.msra.mxu0 %v6378_v18  ;;  %v6456_v17 = vld [vmem:[#allocation13 + $0x698] ss:$28 sps:$4 sm:$0xff]   ;;  %v3133_v18 = vadd.f32 %v7109_v61, %v2728_v11  ;;  %v6523_v11 = vld [vmem:[#allocation13 + $0x600] ss:$28 sps:$4 sm:$0xff]  }
 0x5bc   :  { %4637 = vmatprep.subr.bf16.mxu1 %v6383_v19  ;;  %4719 = vmatprep.subr.bf16.mxu0 %v6386_v20  ;;  %v6461_v19 = vld [vmem:[#allocation13 + $0x6cc] ss:$28 sps:$4 sm:$0xff]   ;;  %v6464_v20 = vld [vmem:[#allocation13 + $0x6d4] ss:$28 sps:$4 sm:$0xff]  }
 0x5bd   :  { %v6469_v61 = vld [vmem:[#allocation13 + $0x18] ss:$28 sps:$4 sm:$0xff]  }
 0x5bf   :  { %4638 = vmatpush1.bf16.msra.mxu1 %v6381_v21  ;;  %4720 = vmatpush1.bf16.msra.mxu0 %v6384_v22  ;;  %v6459_v21 = vld [vmem:[#allocation13 + $0x6c8] ss:$28 sps:$4 sm:$0xff]   ;;  %v6462_v22 = vld [vmem:[#allocation13 + $0x6d0] ss:$28 sps:$4 sm:$0xff]  }
 0x5c0   :  { %4639 = vmatprep.subr.bf16.mxu1 %v6389_v23  ;;  %4721 = vmatprep.subr.bf16.mxu0 %v6392_v24  ;;  %v3141_v23 = vmax.f32 %v3133_v18, 0.0  ;;  %v6468_v24 = vld [vmem:[#allocation13 + $0x1d8] ss:$28 sps:$4 sm:$0xff]   ;;  %v6525_v18 = vld [vmem:[#allocation13 + $0x2b0] ss:$28 sps:$4 sm:$0xff]  }
 0x5c3   :  { %4640 = vmatpush1.bf16.msra.mxu1 %v6387_v25  ;;  %4722 = vmatpush1.bf16.msra.mxu0 %v6390_v26  ;;  %v6465_v25 = vld [vmem:[#allocation13 + $0x10] ss:$28 sps:$4 sm:$0xff]   ;;  %v7126_v26 = vpack.c.bf16 %v3141_v23, %v3141_v23 }
 0x5c4   :  { %4641 = vmatprep.subr.bf16.mxu1 %v6395_v27  ;;  %4723 = vmatprep.subr.bf16.mxu0 %v6398_v28  ;;  %v6472_v27 = vld [vmem:[#allocation13 + $0x4c] ss:$28 sps:$4 sm:$0xff]  }
 0x5c5   :  { %v6473_v28 = vld [vmem:[#allocation13 + $0x210] ss:$28 sps:$4 sm:$0xff]  }
 0x5c6   :  { %v6534_v23 = vld [vmem:[#allocation13 + $0x4b0] ss:$28 sps:$4 sm:$0xff]  }
 0x5c7   :  { %4642 = vmatpush1.bf16.msra.mxu1 %v6393_v29  ;;  %4724 = vmatpush1.bf16.msra.mxu0 %v6396_v30  ;;  %v6470_v29 = vld [vmem:[#allocation13 + $0x48] ss:$28 sps:$4 sm:$0xff]   ;;  %v6474_v30 = vld [vmem:[#allocation13 + $0x50] ss:$28 sps:$4 sm:$0xff]  }
 0x5c8   :  { %4643 = vmatprep.subr.bf16.mxu1 %v6401_v31  ;;  %4725 = vmatprep.subr.bf16.mxu0 %v6404_v33  ;;  %v6477_v31 = vld [vmem:[#allocation13 + $0x84] ss:$28 sps:$4 sm:$0xff]  }
 0x5c9   :  { %v6478_v33 = vld [vmem:[#allocation13 + $0x248] ss:$28 sps:$4 sm:$0xff]  }
 0x5cb   :  { %4644 = vmatpush1.bf16.msra.mxu1 %v6399_v34  ;;  %4726 = vmatpush1.bf16.msra.mxu0 %v6402_v35  ;;  %v6475_v34 = vld [vmem:[#allocation13 + $0x80] ss:$28 sps:$4 sm:$0xff]   ;;  %v6479_v35 = vld [vmem:[#allocation13 + $0x88] ss:$28 sps:$4 sm:$0xff]  }
 0x5cc   :  { %4645 = vmatprep.subr.bf16.mxu1 %v6407_v44  ;;  %4727 = vmatprep.subr.bf16.mxu0 %v6410_v36  ;;  %v6482_v44 = vld [vmem:[#allocation13 + $0xbc] ss:$28 sps:$4 sm:$0xff]  }
 0x5cd   :  { %v6483_v36 = vld [vmem:[#allocation13 + $0x280] ss:$28 sps:$4 sm:$0xff]  }
 0x5cf   :  { %4646 = vmatpush1.bf16.msra.mxu1 %v6405_v37  ;;  %4728 = vmatpush1.bf16.msra.mxu0 %v6408_v38  ;;  %v6480_v37 = vld [vmem:[#allocation13 + $0xb8] ss:$28 sps:$4 sm:$0xff]   ;;  %v6484_v38 = vld [vmem:[#allocation13 + $0xc0] ss:$28 sps:$4 sm:$0xff]  }
 0x5d0   :  { %4647 = vmatprep.subr.bf16.mxu1 %v6413_v39  ;;  %4729 = vmatprep.subr.bf16.mxu0 %v6416_v40  ;;  %v6487_v39 = vld [vmem:[#allocation13 + $0xf4] ss:$28 sps:$4 sm:$0xff]  }
 0x5d1   :  { %v6485_v40 = vld [vmem:[#allocation13 + $0xf0] ss:$28 sps:$4 sm:$0xff]  }
 0x5d3   :  { %4648 = vmatpush1.bf16.msra.mxu1 %v6411_v42  ;;  %4730 = vmatpush1.bf16.msra.mxu0 %v6414_v43  ;;  %v6489_v42 = vld [vmem:[#allocation13 + $0xf8] ss:$28 sps:$4 sm:$0xff]   ;;  %v6492_v43 = vld [vmem:[#allocation13 + $0x12c] ss:$28 sps:$4 sm:$0xff]  }
 0x5d4   :  { %4649 = vmatprep.subr.bf16.mxu1 %v6419_v46  ;;  %4731 = vmatprep.subr.bf16.mxu0 %v6422_v47  ;;  %v6493_v46 = vld [vmem:[#allocation13 + $0x2f0] ss:$28 sps:$4 sm:$0xff]   ;;  %v6490_v47 = vld [vmem:[#allocation13 + $0x128] ss:$28 sps:$4 sm:$0xff]  }
 0x5d7   :  { %4650 = vmatpush1.bf16.msra.mxu1 %v6417_v50  ;;  %4732 = vmatpush1.bf16.msra.mxu0 %v6420_v51  ;;  %v6494_v50 = vld [vmem:[#allocation13 + $0x130] ss:$28 sps:$4 sm:$0xff]   ;;  %v6497_v51 = vld [vmem:[#allocation13 + $0x164] ss:$28 sps:$4 sm:$0xff]  }
 0x5d8   :  { %4651 = vmatprep.subr.bf16.mxu1 %v6425_v52  ;;  %4733 = vmatprep.subr.bf16.mxu0 %v6428_v53  ;;  %v6498_v52 = vld [vmem:[#allocation13 + $0x328] ss:$28 sps:$4 sm:$0xff]   ;;  %v6495_v53 = vld [vmem:[#allocation13 + $0x160] ss:$28 sps:$4 sm:$0xff]  }
 0x5db   :  { %4652 = vmatpush1.bf16.msra.mxu1 %v6423_v54  ;;  %4734 = vmatpush1.bf16.msra.mxu0 %v6426_v55  ;;  %v6499_v54 = vld [vmem:[#allocation13 + $0x168] ss:$28 sps:$4 sm:$0xff]   ;;  %v6502_v55 = vld [vmem:[#allocation13 + $0x19c] ss:$28 sps:$4 sm:$0xff]  }
 0x5dc   :  { %4653 = vmatprep.subr.bf16.mxu1 %v6431_v57  ;;  %4735 = vmatprep.subr.bf16.mxu0 %v6434_v58  ;;  %v6503_v57 = vld [vmem:[#allocation13 + $0x360] ss:$28 sps:$4 sm:$0xff]   ;;  %v6500_v58 = vld [vmem:[#allocation13 + $0x198] ss:$28 sps:$4 sm:$0xff]  }
 0x5df   :  { %4654 = vmatpush1.bf16.msra.mxu1 %v6429_v59  ;;  %4736 = vmatpush1.bf16.msra.mxu0 %v6432_v60  ;;  %v6504_v59 = vld [vmem:[#allocation13 + $0x1a0] ss:$28 sps:$4 sm:$0xff]   ;;  %v6507_v60 = vld [vmem:[#allocation13 + $0x1d4] ss:$28 sps:$4 sm:$0xff]  }
 0x5e0   :  { %4655 = vmatprep.subr.bf16.mxu1 %v6437_v62  ;;  %4737 = vmatprep.subr.bf16.mxu0 %v6440_v63  ;;  %v6508_v62 = vld [vmem:[#allocation13 + $0x558] ss:$28 sps:$4 sm:$0xff]   ;;  %v6505_v63 = vld [vmem:[#allocation13 + $0x1d0] ss:$28 sps:$4 sm:$0xff]  }
 0x5e3   :  { %4656 = vmatpush1.bf16.msra.mxu1 %v6435_v0  ;;  %4738 = vmatpush1.bf16.msra.mxu0 %v6438_v1  ;;  %v6509_v0 = vld [vmem:[#allocation13 + $0x398] ss:$28 sps:$4 sm:$0xff]   ;;  %v6512_v1 = vld [vmem:[#allocation13 + $0x20c] ss:$28 sps:$4 sm:$0xff]  }
 0x5e4   :  { %4657 = vmatprep.subr.bf16.mxu1 %v6443_v2  ;;  %4739 = vmatprep.subr.bf16.mxu0 %v6446_v3  ;;  %v6513_v2 = vld [vmem:[#allocation13 + $0x590] ss:$28 sps:$4 sm:$0xff]   ;;  %v6510_v3 = vld [vmem:[#allocation13 + $0x208] ss:$28 sps:$4 sm:$0xff]  }
 0x5e7   :  { %4658 = vmatpush1.bf16.msra.mxu1 %v6441_v4  ;;  %4740 = vmatpush1.bf16.msra.mxu0 %v6444_v5  ;;  %v6514_v4 = vld [vmem:[#allocation13 + $0x3d0] ss:$28 sps:$4 sm:$0xff]   ;;  %v6517_v5 = vld [vmem:[#allocation13 + $0x244] ss:$28 sps:$4 sm:$0xff]  }
 0x5e8   :  { %4659 = vmatprep.subr.bf16.mxu1 %v6449_v6  ;;  %4741 = vmatprep.subr.bf16.mxu0 %v6452_v7  ;;  %v6518_v6 = vld [vmem:[#allocation13 + $0x5c8] ss:$28 sps:$4 sm:$0xff]   ;;  %v6515_v7 = vld [vmem:[#allocation13 + $0x240] ss:$28 sps:$4 sm:$0xff]  }
 0x5eb   :  { %4660 = vmatpush1.bf16.msra.mxu1 %v6447_v8  ;;  %4742 = vmatpush1.bf16.msra.mxu0 %v6450_v9  ;;  %v6519_v8 = vld [vmem:[#allocation13 + $0x408] ss:$28 sps:$4 sm:$0xff]   ;;  %v6522_v9 = vld [vmem:[#allocation13 + $0x27c] ss:$28 sps:$4 sm:$0xff]  }
 0x5ec   :  { %4661 = vmatprep.subr.bf16.mxu1 %v6455_v12  ;;  %4743 = vmatprep.subr.bf16.mxu0 %v6458_v14  ;;  %v6520_v12 = vld [vmem:[#allocation13 + $0x278] ss:$28 sps:$4 sm:$0xff]   ;;  %v6524_v14 = vld [vmem:[#allocation13 + $0x440] ss:$28 sps:$4 sm:$0xff]  }
 0x5ef   :  { %4662 = vmatpush1.bf16.msra.mxu1 %v6453_v15  ;;  %4744 = vmatpush1.bf16.msra.mxu0 %v6456_v17  ;;  %v6527_v15 = vld [vmem:[#allocation13 + $0x2b4] ss:$28 sps:$4 sm:$0xff]  }
 0x5f0   :  { %4663 = vmatprep.subr.bf16.mxu1 %v6461_v19  ;;  %4745 = vmatprep.subr.bf16.mxu0 %v6464_v20  ;;  %v6528_v17 = vld [vmem:[#allocation13 + $0x638] ss:$28 sps:$4 sm:$0xff]   ;;  %v6532_v20 = vld [vmem:[#allocation13 + $0x2ec] ss:$28 sps:$4 sm:$0xff]  }
 0x5f1   :  { %v6529_v19 = vld [vmem:[#allocation13 + $0x478] ss:$28 sps:$4 sm:$0xff]  }
 0x5f3   :  { %4664 = vmatpush1.bf16.msra.mxu1 %v6459_v21  ;;  %4746 = vmatpush1.bf16.msra.mxu0 %v6462_v22  ;;  %v6533_v21 = vld [vmem:[#allocation13 + $0x670] ss:$28 sps:$4 sm:$0xff]   ;;  %v6530_v22 = vld [vmem:[#allocation13 + $0x2e8] ss:$28 sps:$4 sm:$0xff]  }
 0x5f4   :  { %4756 = vmatprep.subr.bf16.mxu1 %v6467_v56  ;;  %5581 = vmatprep.subr.bf16.mxu0 %v6468_v24  ;;  %v6537_v56 = vld [vmem:[#allocation13 + $0x324] ss:$28 sps:$4 sm:$0xff]  }
 0x5f5   :  { %v6538_v24 = vld [vmem:[#allocation13 + $0x6a8] ss:$28 sps:$4 sm:$0xff]  }
 0x5f6   :  { %4666 = vmatmul.mubr.bf16.vlgmr.msra.gmra.mrb[12].mxu1 %v7126_v26  ;;  %4748 = vmatmul.mubr.bf16.vlgmr.msra.gmra.mrb[12].mxu0 %v7126_v26 }
 0x5f7   :  { %4757 = vmatpush1.bf16.msra.mxu1 %v6465_v25  ;;  %4788 = vmatprep.mubr.bf16.mxu1 %v7111_v10  ;;  %v6535_v25 = vld [vmem:[#allocation13 + $0x320] ss:$28 sps:$4 sm:$0xff]  }
 0x5f8   :  { %5582 = vmatpush3.bf16.msra.mxu0 %v6469_v61  ;;  %4870 = vmatprep.mubr.bf16.mxu0 %v7111_v10  ;;  %v6488_v10 = vld [vmem:[#allocation13 + $0x2b8] ss:$28 sps:$4 sm:$0xff]   ;;  %v6539_v61 = vld [vmem:[#allocation13 + $0x4e8] ss:$28 sps:$4 sm:$0xff]  }
 0x5f9   :  { %4758 = vmatprep.subr.bf16.mxu1 %v6472_v27  ;;  %5583 = vmatprep.subr.bf16.mxu0 %v6473_v28  ;;  %v6542_v27 = vld [vmem:[#allocation13 + $0x35c] ss:$28 sps:$4 sm:$0xff]  }
 0x5fa   :  { %v6543_v28 = vld [vmem:[#allocation13 + $0x6e0] ss:$28 sps:$4 sm:$0xff]  }
 0x5fb   :  { %4759 = vmatpush1.bf16.msra.mxu1 %v6470_v29  ;;  %v6540_v29 = vld [vmem:[#allocation13 + $0x358] ss:$28 sps:$4 sm:$0xff]  }
 0x5fc   :  { %5584 = vmatpush3.bf16.msra.mxu0 %v6474_v30  ;;  %4760 = vmatprep.subr.bf16.mxu1 %v6477_v31  ;;  %v6544_v30 = vld [vmem:[#allocation13 + $0x520] ss:$28 sps:$4 sm:$0xff]   ;;  %v6547_v31 = vld [vmem:[#allocation13 + $0x394] ss:$28 sps:$4 sm:$0xff]  }
 0x5fd   :  { %5585 = vmatprep.subr.bf16.mxu0 %v6478_v33  ;;  %v6545_v33 = vld [vmem:[#allocation13 + $0x390] ss:$28 sps:$4 sm:$0xff]  }
 0x5ff   :  { %4761 = vmatpush1.bf16.msra.mxu1 %v6475_v34  ;;  %v6550_v34 = vld [vmem:[#allocation13 + $0x3cc] ss:$28 sps:$4 sm:$0xff]  }
 0x600   :  { %5586 = vmatpush3.bf16.msra.mxu0 %v6479_v35  ;;  %4762 = vmatprep.subr.bf16.mxu1 %v6482_v44  ;;  %v6548_v35 = vld [vmem:[#allocation13 + $0x3c8] ss:$28 sps:$4 sm:$0xff]  }
 0x601   :  { %5587 = vmatprep.subr.bf16.mxu0 %v6483_v36  ;;  %v6553_v44 = vld [vmem:[#allocation13 + $0x404] ss:$28 sps:$4 sm:$0xff]  }
 0x602   :  { %v6551_v36 = vld [vmem:[#allocation13 + $0x400] ss:$28 sps:$4 sm:$0xff]  }
 0x603   :  { %4763 = vmatpush1.bf16.msra.mxu1 %v6480_v37  ;;  %v6556_v37 = vld [vmem:[#allocation13 + $0x43c] ss:$28 sps:$4 sm:$0xff]  }
 0x604   :  { %5588 = vmatpush3.bf16.msra.mxu0 %v6484_v38  ;;  %4764 = vmatprep.subr.bf16.mxu1 %v6487_v39  ;;  %v6554_v38 = vld [vmem:[#allocation13 + $0x438] ss:$28 sps:$4 sm:$0xff]  }
 0x605   :  { %5589 = vmatprep.subr.bf16.mxu0 %v6488_v10  ;;  %v6559_v39 = vld [vmem:[#allocation13 + $0x474] ss:$28 sps:$4 sm:$0xff]  }
 0x606   :  { %v6557_v10 = vld [vmem:[#allocation13 + $0x470] ss:$28 sps:$4 sm:$0xff]  }
 0x607   :  { %4765 = vmatpush1.bf16.msra.mxu1 %v6485_v40  ;;  %v6560_v40 = vld [vmem:[#allocation13 + $0x4a8] ss:$28 sps:$4 sm:$0xff]  }
 0x608   :  { %5590 = vmatpush3.bf16.msra.mxu0 %v6489_v42  ;;  %4766 = vmatprep.subr.bf16.mxu1 %v6492_v43  ;;  %v6565_v42 = vld [vmem:[#allocation13 + $0x4e4] ss:$28 sps:$4 sm:$0xff]   ;;  %v6568_v43 = vld [vmem:[#allocation13 + $0x51c] ss:$28 sps:$4 sm:$0xff]  }
 0x609   :  { %5591 = vmatprep.subr.bf16.mxu0 %v6493_v46  ;;  %v6566_v46 = vld [vmem:[#allocation13 + $0x518] ss:$28 sps:$4 sm:$0xff]  }
 0x60b   :  { %4767 = vmatpush1.bf16.msra.mxu1 %v6490_v47  ;;  %v6571_v47 = vld [vmem:[#allocation13 + $0x554] ss:$28 sps:$4 sm:$0xff]  }
 0x60c   :  { %5592 = vmatpush3.bf16.msra.mxu0 %v6494_v50  ;;  %4768 = vmatprep.subr.bf16.mxu1 %v6497_v51  ;;  %v6569_v50 = vld [vmem:[#allocation13 + $0x550] ss:$28 sps:$4 sm:$0xff]  }
 0x60d   :  { %5593 = vmatprep.subr.bf16.mxu0 %v6498_v52  ;;  %v6574_v51 = vld [vmem:[#allocation13 + $0x58c] ss:$28 sps:$4 sm:$0xff]  }
 0x60e   :  { %v6572_v52 = vld [vmem:[#allocation13 + $0x588] ss:$28 sps:$4 sm:$0xff]  }
 0x60f   :  { %4769 = vmatpush1.bf16.msra.mxu1 %v6495_v53  ;;  %v6577_v53 = vld [vmem:[#allocation13 + $0x5c4] ss:$28 sps:$4 sm:$0xff]  }
 0x610   :  { %5594 = vmatpush3.bf16.msra.mxu0 %v6499_v54  ;;  %4770 = vmatprep.subr.bf16.mxu1 %v6502_v55  ;;  %v6575_v54 = vld [vmem:[#allocation13 + $0x5c0] ss:$28 sps:$4 sm:$0xff]  }
 0x611   :  { %5595 = vmatprep.subr.bf16.mxu0 %v6503_v57  ;;  %v6580_v55 = vld [vmem:[#allocation13 + $0x5fc] ss:$28 sps:$4 sm:$0xff]  }
 0x612   :  { %v6578_v57 = vld [vmem:[#allocation13 + $0x5f8] ss:$28 sps:$4 sm:$0xff]  }
 0x613   :  { %4771 = vmatpush1.bf16.msra.mxu1 %v6500_v58  ;;  %v6583_v58 = vld [vmem:[#allocation13 + $0x634] ss:$28 sps:$4 sm:$0xff]  }
 0x614   :  { %5596 = vmatpush3.bf16.msra.mxu0 %v6504_v59  ;;  %4772 = vmatprep.subr.bf16.mxu1 %v6507_v60  ;;  %v6581_v59 = vld [vmem:[#allocation13 + $0x630] ss:$28 sps:$4 sm:$0xff]  }
 0x615   :  { %5603 = vmatprep.subr.bf16.mxu0 %v6508_v62  ;;  %v6586_v60 = vld [vmem:[#allocation13 + $0x66c] ss:$28 sps:$4 sm:$0xff]  }
 0x616   :  { %v6584_v62 = vld [vmem:[#allocation13 + $0x668] ss:$28 sps:$4 sm:$0xff]  }
 0x617   :  { %4871 = vmatmul.mubr.bf16.vlgmr.msra.gmra.mrb[16].mxu0 %v7113_v13  ;;  %4773 = vmatpush1.bf16.msra.mxu1 %v6505_v63  ;;  %v6589_v63 = vld [vmem:[#allocation13 + $0x6a4] ss:$28 sps:$4 sm:$0xff]  }
 0x618   :  { %5604 = vmatpush3.bf16.msra.mxu0 %v6509_v0  ;;  %4910 = vmatprep.mubr.bf16.mxu0 %v7117_v16  ;;  %v6587_v0 = vld [vmem:[#allocation13 + $0x6a0] ss:$28 sps:$4 sm:$0xff]  }
 0x619   :  { %4774 = vmatprep.subr.bf16.mxu1 %v6512_v1  ;;  %5605 = vmatprep.subr.bf16.mxu0 %v6513_v2  ;;  %v6592_v1 = vld [vmem:[#allocation13 + $0x6dc] ss:$28 sps:$4 sm:$0xff]  }
 0x61a   :  { %v6590_v2 = vld [vmem:[#allocation13 + $0x6d8] ss:$28 sps:$4 sm:$0xff]  }
 0x61b   :  { %4775 = vmatpush1.bf16.msra.mxu1 %v6510_v3  ;;  %v7141_v3 = vld [vmem:[%s7206_s13] sm:$0xff]  ;;  %s6842_s13 = smov [#allocation15]  }
 0x61c   :  { %5606 = vmatpush3.bf16.msra.mxu0 %v6514_v4  ;;  %4776 = vmatprep.subr.bf16.mxu1 %v6517_v5  ;;  %v3408_v4 = vrot.slane %v7141_v3, %v7046_v45  ;;  %v3416_v5 = vrot.slane %v7141_v3, %v7068_v32  ;;  %s4943_s20 = sshll.u32 %s6842_s13, 4  ;;  %s4944_s20 = int_to_ptr.vmem [resolvable:$true] %s4943_s20 }
 0x61d   :  { %5607 = vmatprep.subr.bf16.mxu0 %v6518_v6  ;;  %v3412_v6 = vrot.slane %v7141_v3, %v7054_v48  ;;  %s6749_s23 = scalar_lea.vmem %s4944_s20, 128  ;;  %p6754_p1 = scmp.lt.s32.totalorder %s4944_s20, %s4944_s20 }
 0x61e   :  { %p6750_p0 = scmp.ne.s32.totalorder %s4944_s20, %s6749_s23  ;;  %p6755_p2 = scmp.lt.s32.totalorder %s6749_s23, %s6749_s23 }
 0x61f   :  { %4777 = vmatpush1.bf16.msra.mxu1 %v6515_v7  ;;  %v3420_v7 = vrot.slane %v7141_v3, %v7057_v49 }
 0x620   :  { %5608 = vmatpush3.bf16.msra.mxu0 %v6519_v8  ;;  %4778 = vmatprep.subr.bf16.mxu1 %v6522_v9  ;;  %p6756_p3 = por %p6755_p2, %p6754_p1 }
 0x621   :  { %5609 = vmatprep.subr.bf16.mxu0 %v6523_v11 }
 0x622   :  { %p6757_p4 = pnand %p6756_p3, %p6750_p0 }
 0x623   :  { %4779 = vmatpush1.bf16.msra.mxu1 %v6520_v12 }
 0x624   :  { %5610 = vmatpush3.bf16.msra.mxu0 %v6524_v14  ;;  %4780 = vmatprep.subr.bf16.mxu1 %v6527_v15 }
 0x625   :  { %5611 = vmatprep.subr.bf16.mxu0 %v6528_v17 }
 0x627   :  { %4781 = vmatpush1.bf16.msra.mxu1 %v6525_v18 }
 0x628   :  { %5612 = vmatpush3.bf16.msra.mxu0 %v6529_v19  ;;  %4782 = vmatprep.subr.bf16.mxu1 %v6532_v20 }
 0x629   :  { %5613 = vmatprep.subr.bf16.mxu0 %v6533_v21 }
 0x62b   :  { %4783 = vmatpush1.bf16.msra.mxu1 %v6530_v22 }
 0x62c   :  { %5614 = vmatpush3.bf16.msra.mxu0 %v6534_v23  ;;  %4784 = vmatprep.subr.bf16.mxu1 %v6537_v56 }
 0x62d   :  { %5615 = vmatprep.subr.bf16.mxu0 %v6538_v24 }
 0x62f   :  { %4785 = vmatpush1.bf16.msra.mxu1 %v6535_v25 }
 0x630   :  { %5616 = vmatpush3.bf16.msra.mxu0 %v6539_v61  ;;  %4786 = vmatprep.subr.bf16.mxu1 %v6542_v27 }
 0x631   :  { %5617 = vmatprep.subr.bf16.mxu0 %v6543_v28 }
 0x633   :  { %4787 = vmatpush1.bf16.msra.mxu1 %v6540_v29 }
 0x634   :  { %5618 = vmatpush3.bf16.msra.mxu0 %v6544_v30  ;;  %4797 = vmatprep.subr.bf16.mxu1 %v6547_v31 }
 0x636   :  { %4789 = vmatmul.mubr.bf16.vlgmr.msra.gmra.mrb[16].mxu1 %v7113_v13  ;;  %v6562_v13 = vld [vmem:[#allocation13 + $0x4ac] ss:$28 sps:$4 sm:$0xff]  }
 0x637   :  { %4911 = vmatmul.mubr.bf16.vlgmr.msra.gmra.mrb[20].mxu0 %v7126_v26  ;;  %4798 = vmatpush1.bf16.msra.mxu1 %v6545_v33 }
 0x638   :  { %4829 = vmatprep.mubr.bf16.mxu1 %v7117_v16  ;;  %4799 = vmatprep.subr.bf16.mxu1 %v6550_v34  ;;  %v6563_v16 = vld [vmem:[#allocation13 + $0x4e0] ss:$28 sps:$4 sm:$0xff]  }
 0x63b   :  { %4800 = vmatpush1.bf16.msra.mxu1 %v6548_v35 }
 0x63c   :  { %4801 = vmatprep.subr.bf16.mxu1 %v6553_v44 }
 0x63f   :  { %4802 = vmatpush1.bf16.msra.mxu1 %v6551_v36 }
 0x640   :  { %4803 = vmatprep.subr.bf16.mxu1 %v6556_v37 }
 0x643   :  { %4804 = vmatpush1.bf16.msra.mxu1 %v6554_v38 }
 0x644   :  { %4805 = vmatprep.subr.bf16.mxu1 %v6559_v39 }
 0x647   :  { %4806 = vmatpush1.bf16.msra.mxu1 %v6557_v10 }
 0x648   :  { %4807 = vmatprep.subr.bf16.mxu1 %v6562_v13 }
 0x64b   :  { %4808 = vmatpush1.bf16.msra.mxu1 %v6560_v40 }
 0x64c   :  { %4809 = vmatprep.subr.bf16.mxu1 %v6565_v42 }
 0x64f   :  { %4810 = vmatpush1.bf16.msra.mxu1 %v6563_v16 }
 0x650   :  { %4811 = vmatprep.subr.bf16.mxu1 %v6568_v43 }
 0x653   :  { %4812 = vmatpush1.bf16.msra.mxu1 %v6566_v46 }
 0x654   :  { %4813 = vmatprep.subr.bf16.mxu1 %v6571_v47 }
 0x657   :  { %4814 = vmatpush1.bf16.msra.mxu1 %v6569_v50 }
 0x658   :  { %4815 = vmatprep.subr.bf16.mxu1 %v6574_v51 }
 0x65b   :  { %4816 = vmatpush1.bf16.msra.mxu1 %v6572_v52 }
 0x65c   :  { %4817 = vmatprep.subr.bf16.mxu1 %v6577_v53 }
 0x65f   :  { %4818 = vmatpush1.bf16.msra.mxu1 %v6575_v54 }
 0x660   :  { %4819 = vmatprep.subr.bf16.mxu1 %v6580_v55 }
 0x663   :  { %4820 = vmatpush1.bf16.msra.mxu1 %v6578_v57 }
 0x664   :  { %4821 = vmatprep.subr.bf16.mxu1 %v6583_v58 }
 0x667   :  { %4822 = vmatpush1.bf16.msra.mxu1 %v6581_v59 }
 0x668   :  { %4823 = vmatprep.subr.bf16.mxu1 %v6586_v60 }
 0x66b   :  { %4824 = vmatpush1.bf16.msra.mxu1 %v6584_v62 }
 0x66c   :  { %4825 = vmatprep.subr.bf16.mxu1 %v6589_v63 }
 0x66f   :  { %4826 = vmatpush1.bf16.msra.mxu1 %v6587_v0 }
 0x670   :  { %4827 = vmatprep.subr.bf16.mxu1 %v6592_v1 }
 0x673   :  { %4828 = vmatpush1.bf16.msra.mxu1 %v6590_v2 }
 0x676   :  { %4830 = vmatmul.mubr.bf16.vlgmr.msra.gmra.mrb[16].mxu1 %v7126_v26 }
 0x6c9   :  { %v4667_v8 = vpop.f32.mrb[12].mxu1  ;;  %v4749_v9 = vpop.f32.mrb[12].mxu0 }
 0x6ca   :  { %v5631_v26 = vadd.f32 %v4667_v8, %v3408_v4  ;;  %v5633_v11 = vadd.f32 %v4749_v9, %v3416_v5  ;;  %v4669_v12 = vpop.f32.mrb[13].mxu1  ;;  %v4751_v14 = vpop.f32.mrb[13].mxu0 }
 0x6cb   :  { %v5632_v15 = vadd.f32 %v4669_v12, %v3412_v6  ;;  %v5634_v17 = vadd.f32 %v4751_v14, %v3420_v7  ;;  %v4671_v18 = vpop.f32.mrb[14].mxu1  ;;  %v4753_v19 = vpop.f32.mrb[14].mxu0 }
 0x6cc   :  { %4918 = vst [vmem:[#allocation14] sm:$0xff] %v5631_v26  ;;  %4920 = vst [vmem:[#allocation14 + $0x10] sm:$0xff] %v5633_v11  ;;  %v4672_v45 = vpop.f32.mrb[15].mxu1  ;;  %v4754_v32 = vpop.f32.mrb[15].mxu0 }
 0x6cd   :  { %4919 = vst [vmem:[#allocation14 + $0x8] sm:$0xff] %v5632_v15  ;;  %4921 = vst [vmem:[#allocation14 + $0x18] sm:$0xff] %v5634_v17 }
 0x6ce   :  { %6760 = shalt.err (!%p6757_p4)
}
 0x6cf   :  { %s6761_s0 = scalar_lea.hbm %s7208_s15, 128 }
 0x6d0   :  { %p6762_p5 = scmp.ne.s32.totalorder %s7208_s15, %s6761_s0  ;;  %p6765_p6 = scmp.lt.u32.totalorder %s6761_s0, %s7208_s15 }
 0x6d2   :  { %p6767_p7 = pnand %p6765_p6, %p6762_p5 }
 0x6d4   :  { %6770 = shalt.err (!%p6767_p7)
}
 0x6d5   :  { %4946 = dma.vmem_to_hbm [thread:$0]  %s4944_s20, 128, %s7208_s15, [#allocation16]  }
 0x6d6   :  { %s6843_s12 = smov [#allocation17]  }
 0x6d7   :  { %s4953_s26 = sshll.u32 %s6843_s12, 4  ;;  %s4954_s26 = int_to_ptr.vmem [resolvable:$true] %s4953_s26 }
 0x6d8   :  { %s6771_s3 = scalar_lea.vmem %s4954_s26, 128  ;;  %p6776_p9 = scmp.lt.s32.totalorder %s4954_s26, %s4954_s26 }
 0x6d9   :  { %p6772_p8 = scmp.ne.s32.totalorder %s4954_s26, %s6771_s3  ;;  %p6777_p10 = scmp.lt.s32.totalorder %s6771_s3, %s6771_s3 }
 0x6db   :  { %p6778_p11 = por %p6777_p10, %p6776_p9 }
 0x6dd   :  { %p6779_p12 = pnand %p6778_p11, %p6772_p8 }
 0x6df   :  { %6782 = shalt.err (!%p6779_p12)
}
 0x6e0   :  { %s6783_s28 = scalar_lea.hbm %s7209_s16, 128 }
 0x6e1   :  { %p6784_p13 = scmp.ne.s32.totalorder %s7209_s16, %s6783_s28  ;;  %p6787_p0 = scmp.lt.u32.totalorder %s6783_s28, %s7209_s16 }
 0x6e3   :  { %p6789_p1 = pnand %p6787_p0, %p6784_p13 }
 0x6e5   :  { %6792 = shalt.err (!%p6789_p1)
}
 0x6e6   :  { %4956 = dma.vmem_to_hbm [thread:$0]  %s4954_s26, 128, %s7209_s16, [#allocation16]   ;;  %v3431_v23 = vsub.s32 6, %v7043_v41  ;;  %v3423_v31 = vsub.s32 4, %v7043_v41  ;;  %v3427_v33 = vsub.s32 5, %v7043_v41 }
 0x6e7   :  { %s6844_s16 = smov [#allocation14]  }
 0x6e8   :  { %v3432_v56 = vrot.slane %v7141_v3, %v3431_v23  ;;  %v3424_v34 = vrot.slane %v7141_v3, %v3423_v31  ;;  %v3428_v35 = vrot.slane %v7141_v3, %v3427_v33  ;;  %s4933_s29 = sshll.u32 %s6844_s16, 4  ;;  %s4934_s29 = int_to_ptr.vmem [resolvable:$true] %s4933_s29 }
 0x6e9   :  { %s6793_s8 = scalar_lea.vmem %s4934_s29, 896  ;;  %p6798_p3 = scmp.lt.s32.totalorder %s4934_s29, %s4934_s29 }
 0x6ea   :  { %v5597_v48 = vpop.f32.mrb[16].mxu0  ;;  %p6794_p2 = scmp.ne.s32.totalorder %s4934_s29, %s6793_s8  ;;  %p6799_p4 = scmp.lt.s32.totalorder %s6793_s8, %s6793_s8 }
 0x6eb   :  { %v5598_v49 = vpop.f32.mrb[17].mxu0 }
 0x6ec   :  { %v5599_v20 = vadd.f32 %v5598_v49, %v5597_v48  ;;  %v5600_v21 = vpop.f32.mrb[18].mxu0  ;;  %p6800_p5 = por %p6799_p4, %p6798_p3 }
 0x6ed   :  { %v5601_v22 = vpop.f32.mrb[19].mxu0 }
 0x6ee   :  { %v4873_v61 = vadd.f32 %v5599_v20, %v3432_v56  ;;  %p6801_p6 = pnand %p6800_p5, %p6794_p2 }
 0x70a   :  { %v5619_v24 = vpop.f32.mrb[20].mxu0 }
 0x70b   :  { %v5620_v25 = vpop.f32.mrb[21].mxu0 }
 0x70c   :  { %v5621_v27 = vadd.f32 %v5620_v25, %v5619_v24  ;;  %v5622_v28 = vpop.f32.mrb[22].mxu0 }
 0x70d   :  { %v5623_v29 = vpop.f32.mrb[23].mxu0 }
 0x70e   :  { %v4913_v30 = vadd.f32 %v5621_v27, %v4873_v61 }
 0x710   :  { %4924 = vst [vmem:[#allocation14 + $0x30] sm:$0xff] %v4913_v30 }
 0x749   :  { %v4831_v44 = vpop.f32.mrb[16].mxu1 }
 0x74a   :  { %v5635_v36 = vadd.f32 %v4831_v44, %v3424_v34  ;;  %v4833_v37 = vpop.f32.mrb[17].mxu1 }
 0x74b   :  { %v5636_v38 = vadd.f32 %v4833_v37, %v3428_v35  ;;  %v4835_v39 = vpop.f32.mrb[18].mxu1 }
 0x74c   :  { %4922 = vst [vmem:[#allocation14 + $0x20] sm:$0xff] %v5635_v36  ;;  %v4836_v10 = vpop.f32.mrb[19].mxu1 }
 0x74d   :  { %4923 = vst [vmem:[#allocation14 + $0x28] sm:$0xff] %v5636_v38 }
 0x74e   :  { %6804 = shalt.err (!%p6801_p6)
}
 0x74f   :  { %s6805_s4 = scalar_lea.hbm %s7207_s14, 896 }
 0x750   :  { %p6806_p7 = scmp.ne.s32.totalorder %s7207_s14, %s6805_s4  ;;  %p6809_p8 = scmp.lt.u32.totalorder %s6805_s4, %s7207_s14 }
 0x752   :  { %p6811_p9 = pnand %p6809_p8, %p6806_p7 }
 0x754   :  { %6814 = shalt.err (!%p6811_p9)
}
 0x755   :  { %4936 = dma.vmem_to_hbm [thread:$0]  %s4934_s29, 896, %s7207_s14, [#allocation4]  }
 0x756   :  { %6823 = dma.done.wait [#allocation4], 896  }
 0x757   :  { %6824 = vsyncadd [#allocation4], 4294966400 }
 0x758   :  { %6825 = dma.done.wait [#allocation16], 256  }
 0x759   :  { %6826 = vsyncadd [#allocation16], 4294967040 }
 0x75a   :  { %4966 = vsyncpa [#allocation3], 1 }
 0x75b   :  { %4967 = vsyncpa [#allocation6], 1 }
 0x75c   :  { %4968 = vsyncpa [#allocation9], 1 }
 0x75d   :  { %4969 = vsyncpa [#allocation12], 1 }
 0x75e   :  { %4970 = vsyncpa [#allocation4], 1 }
 0x75f   :  { %4971 = vsyncpa [#allocation16], 1 }

</bundles_post_ra>
